<compile_context>
chip_gen: v5e
topology: v5e:2x2
jax: 0.10.0
libtpu: 0.0.40
codegen_flags: <defaults>
</compile_context>

<pallas_src>
import numpy as np
import jax
import jax.numpy as jnp
from jax.experimental import pallas as pl
from jax.experimental.pallas import tpu as pltpu


# ----------------------------------------------------------------------------
# Fused Pallas kernel
# ----------------------------------------------------------------------------
def _make_kernel(bb, C, H, W, K, pad):
    """Fused kernel for a (bb, C, H*W) batch block with static geometry."""
    HW = H * W
    S = 2 * bb                     # mean rows [0,bb), max rows [bb,2bb)
    KK = K * K
    inv_C = 1.0 / C

    def kernel(w_ref, x_ref, o_ref, stats_ref):
        # w_ref     : (2*K*K,) f32 SMEM   scalar-prefetched conv weight [cin,kh,kw]
        # x_ref     : (bb, C, HW)  VMEM   lane-dense input block
        # o_ref     : (bb, C, HW)  VMEM   lane-dense output block
        # stats_ref : (2*bb, HW) f32 VMEM scratch: stacked mean/max maps
        xv = x_ref[...].astype(jnp.float32)                   # (bb, C, HW)

        # ---- channel statistics, stacked on the sublane axis ---------------
        stats_ref[0:bb, :] = jnp.sum(xv, axis=1) * inv_C      # mean over C
        stats_ref[bb:S, :] = jnp.max(xv, axis=1)              # max  over C
        stats = stats_ref[...]                                 # (S, HW), f32

        # ---- hoisted index vectors / masks (computed once per grid step) ---
        lane = jax.lax.broadcasted_iota(jnp.int32, (S, HW), 1)
        if W & (W - 1) == 0:                                   # power-of-two W
            sh = W.bit_length() - 1
            row = lane >> sh
            col = lane & (W - 1)
        else:  # division-free general path (exact for these integer ranges)
            row = jnp.floor(lane.astype(jnp.float32) /
                            np.float32(W)).astype(jnp.int32)
            col = lane - row * W
        is_mean = jax.lax.broadcasted_iota(jnp.int32, (S, HW), 0) < bb

        col_ok = []                                            # per-kw validity
        for kw in range(K):
            d = kw - pad
            if d < 0:
                col_ok.append(col >= -d)
            elif d > 0:
                col_ok.append(col < (W - d))
            else:
                col_ok.append(None)

        # ---- KxK conv: one lane-roll + masked FMA per tap, both channels ---
        acc = jnp.zeros((S, HW), jnp.float32)
        for kh in range(K):
            dh = kh - pad
            if dh < 0:
                row_ok = row >= -dh
            elif dh > 0:
                row_ok = row < (H - dh)
            else:
                row_ok = None
            for kw in range(K):
                dw = kw - pad
                off = dh * W + dw                              # source offset
                # want shifted[p] = stats[p + off]  ->  roll by -off
                shifted = stats if off == 0 else pltpu.roll(
                    stats, (-off) % HW, axis=1)
                m = row_ok
                if col_ok[kw] is not None:
                    m = col_ok[kw] if m is None else (m & col_ok[kw])
                if m is not None:
                    shifted = jnp.where(m, shifted, 0.0)
                # per-sublane weight: mean rows get w[0,kh,kw], max rows w[1,kh,kw]
                w_tap = jnp.where(is_mean,
                                  w_ref[kh * K + kw],
                                  w_ref[KK + kh * K + kw])
                acc = acc + w_tap * shifted

        # ---- sigmoid (EUP) + broadcast multiply -----------------------------
        logits = acc[0:bb, :] + acc[bb:S, :]                   # (bb, HW)
        attn = pl.reciprocal(1.0 + jnp.exp(-logits), approx=False)
        out = x_ref[...].astype(jnp.float32) * attn[:, None, :]
        o_ref[...] = out.astype(o_ref.dtype)

    return kernel


def _tensorcores_per_chip():
    """Best-effort TC-per-chip count (safe fallback: 1)."""
    try:
        kind = jax.devices()[0].device_kind.lower()
    except Exception:
        return 1
    return 2 if ("v7" in kind or "7x" in kind) else 1


def spatial_attention_pallas(x, w, kernel_size=7):
    """x: (N, C, H, W);  w: (1, 2, K, K) Conv2d weight (bias=False)."""
    N, C, H, W = x.shape
    K = kernel_size
    assert K in (3, 7), "kernel size must be 3 or 7"
    pad = 3 if K == 7 else 1
    HW = H * W

    # Free, contiguous reshapes only -- no pad / transpose / concat in XLA.
    xf = x.reshape(N, C, HW)
    wf = w.astype(jnp.float32).reshape(2 * K * K)              # [cin, kh, kw]

    # Batch block: fold the whole batch into one grid step on single-TC chips
    # (v5e/v6e, kills per-step overhead); one "parallel" step per TensorCore
    # on dual-TC chips (v7x).
    cores = _tensorcores_per_chip()
    if cores > 1 and N % cores == 0:
        bb = N // cores
    else:
        bb = N
    # Keep in+out blocks (double-buffered) well inside the scoped-VMEM limit.
    if 4 * bb * C * HW * x.dtype.itemsize > (16 << 20):
        bb = 1
    # TODO(synk): if even a single sample overflows VMEM (huge C*H*W), add a
    # row-band spatial grid axis with a +/-pad halo.

    grid = (N // bb,)
    kernel = _make_kernel(bb, C, H, W, K, pad)

    out = pl.pallas_call(
        kernel,
        out_shape=jax.ShapeDtypeStruct((N, C, HW), x.dtype),
        grid_spec=pltpu.PrefetchScalarGridSpec(
            num_scalar_prefetch=1,                              # conv weights -> SMEM
            grid=grid,
            in_specs=[pl.BlockSpec((bb, C, HW), lambda n, w_s: (n, 0, 0))],
            out_specs=pl.BlockSpec((bb, C, HW), lambda n, w_s: (n, 0, 0)),
            scratch_shapes=[pltpu.VMEM((2 * bb, HW), jnp.float32)],
        ),
        compiler_params=pltpu.CompilerParams(
            dimension_semantics=("parallel",)),
    )(wf, xf)
    return out.reshape(N, C, H, W)


# ----------------------------------------------------------------------------
# Pure-JAX reference (mirrors the PyTorch forward exactly)
# ----------------------------------------------------------------------------
def reference_forward(x, w, kernel_size=7):
    pad = 3 if kernel_size == 7 else 1
    mean = jnp.mean(x, axis=1, keepdims=True)
    mx = jnp.max(x, axis=1, keepdims=True)
    stats = jnp.concatenate([mean, mx], axis=1)                 # (N, 2, H, W)
    conv = jax.lax.conv_general_dilated(
        stats, w, window_strides=(1, 1),
        padding=[(pad, pad), (pad, pad)],
        dimension_numbers=("NCHW", "OIHW", "NCHW"))
    return x * jax.nn.sigmoid(conv)


# ----------------------------------------------------------------------------
# Test
# ----------------------------------------------------------------------------
if __name__ == "__main__":
    key = jax.random.PRNGKey(0)
    N, C, H, W = 2, 32, 16, 16
    kernel_size = 7

    k_x, k_w = jax.random.split(key)
    x = jax.random.normal(k_x, (N, C, H, W), jnp.float32)
    fan_in = 2 * kernel_size * kernel_size
    w = (jax.random.normal(k_w, (1, 2, kernel_size, kernel_size), jnp.float32)
         / np.sqrt(fan_in))

    out = jax.block_until_ready(spatial_attention_pallas(x, w, kernel_size))
    ref = jax.block_until_ready(reference_forward(x, w, kernel_size))

    np.testing.assert_allclose(np.asarray(out), np.asarray(ref),
                               rtol=2e-3, atol=2e-3)
    assert out.shape == (N, C, H, W)
    assert out.dtype == x.dtype
    print("KERNEL_OK")
</pallas_src>

<mosaic_0001>
module attributes {stable_mosaic.version = 11 : i64} {
  func.func @kernel(%arg0: i32, %arg1: memref<98xf32, #tpu.memory_space<smem>>, %arg2: memref<2x32x256xf32, #tpu.memory_space<vmem>>, %arg3: memref<2x32x256xf32, #tpu.memory_space<vmem>>, %arg4: memref<4x256xf32, #tpu.memory_space<vmem>>) attributes {dimension_semantics = [#tpu.dimension_semantics<parallel>], iteration_bounds = array<i64: 1>, scalar_prefetch = 1 : i64, scratch_operands = 1 : i64, tpu.core_type = #tpu.core_type<tc>, window_params = [{transform_indices = @transform_0, window_bounds = array<i64: 2, 32, 256>}, {transform_indices = @transform_1, window_bounds = array<i64: 2, 32, 256>}]} {
    %c0 = arith.constant 0 : index
    %c0_0 = arith.constant 0 : index
    %c0_1 = arith.constant 0 : index
    %0 = vector.load %arg2[%c0, %c0_0, %c0_1] : memref<2x32x256xf32, #tpu.memory_space<vmem>>, vector<2x32x256xf32>
    %cst = arith.constant dense<0.000000e+00> : vector<2x256xf32>
    %1 = vector.multi_reduction <add>, %0, %cst [1] : vector<2x32x256xf32> to vector<2x256xf32>
    %cst_2 = arith.constant 3.125000e-02 : f32
    %2 = vector.broadcast %cst_2 : f32 to vector<2x256xf32>
    %3 = arith.mulf %1, %2 : vector<2x256xf32>
    %c0_3 = arith.constant 0 : index
    %c0_4 = arith.constant 0 : index
    %4 = vector.load %arg4[%c0_3, %c0_4] : memref<4x256xf32, #tpu.memory_space<vmem>>, vector<2x256xf32>
    tpu.vector_store %arg4[%c0_3, %c0_4], %3 {strides = array<i32>} : memref<4x256xf32, #tpu.memory_space<vmem>>, vector<2x256xf32>,
    %cst_5 = arith.constant dense<0xFF800000> : vector<2x256xf32>
    %5 = vector.multi_reduction <maximumf>, %0, %cst_5 [1] : vector<2x32x256xf32> to vector<2x256xf32>
    %c2 = arith.constant 2 : index
    %c0_6 = arith.constant 0 : index
    %6 = vector.load %arg4[%c2, %c0_6] : memref<4x256xf32, #tpu.memory_space<vmem>>, vector<2x256xf32>
    tpu.vector_store %arg4[%c2, %c0_6], %5 {strides = array<i32>} : memref<4x256xf32, #tpu.memory_space<vmem>>, vector<2x256xf32>,
    %c0_7 = arith.constant 0 : index
    %c0_8 = arith.constant 0 : index
    %7 = vector.load %arg4[%c0_7, %c0_8] : memref<4x256xf32, #tpu.memory_space<vmem>>, vector<4x256xf32>
    %8 = tpu.iota {dimensions = array<i32: 1>} : vector<4x256xi32>
    %c4_i32 = arith.constant 4 : i32
    %9 = vector.broadcast %c4_i32 : i32 to vector<4x256xi32>
    %10 = arith.shrsi %8, %9 : vector<4x256xi32>
    %c15_i32 = arith.constant 15 : i32
    %11 = vector.broadcast %c15_i32 : i32 to vector<4x256xi32>
    %12 = arith.andi %8, %11 : vector<4x256xi32>
    %13 = tpu.iota {dimensions = array<i32: 0>} : vector<4x256xi32>
    %c2_i32 = arith.constant 2 : i32
    %14 = vector.broadcast %c2_i32 : i32 to vector<4x256xi32>
    %15 = arith.cmpi slt, %13, %14 : vector<4x256xi32>
    %c3_i32 = arith.constant 3 : i32
    %16 = vector.broadcast %c3_i32 : i32 to vector<4x256xi32>
    %17 = arith.cmpi sge, %12, %16 : vector<4x256xi32>
    %c2_i32_9 = arith.constant 2 : i32
    %18 = vector.broadcast %c2_i32_9 : i32 to vector<4x256xi32>
    %19 = arith.cmpi sge, %12, %18 : vector<4x256xi32>
    %c1_i32 = arith.constant 1 : i32
    %20 = vector.broadcast %c1_i32 : i32 to vector<4x256xi32>
    %21 = arith.cmpi sge, %12, %20 : vector<4x256xi32>
    %c15_i32_10 = arith.constant 15 : i32
    %22 = vector.broadcast %c15_i32_10 : i32 to vector<4x256xi32>
    %23 = arith.cmpi slt, %12, %22 : vector<4x256xi32>
    %c14_i32 = arith.constant 14 : i32
    %24 = vector.broadcast %c14_i32 : i32 to vector<4x256xi32>
    %25 = arith.cmpi slt, %12, %24 : vector<4x256xi32>
    %c13_i32 = arith.constant 13 : i32
    %26 = vector.broadcast %c13_i32 : i32 to vector<4x256xi32>
    %27 = arith.cmpi slt, %12, %26 : vector<4x256xi32>
    %cst_11 = arith.constant 0.000000e+00 : f32
    %28 = vector.broadcast %cst_11 : f32 to vector<4x256xf32>
    %c3_i32_12 = arith.constant 3 : i32
    %29 = vector.broadcast %c3_i32_12 : i32 to vector<4x256xi32>
    %30 = arith.cmpi sge, %10, %29 : vector<4x256xi32>
    %c51_i32 = arith.constant 51 : i32
    %31 = tpu.dynamic_rotate %7 by %c51_i32 dim 1 : vector<4x256xf32>, i32 -> vector<4x256xf32>
    %32 = arith.andi %30, %17 : vector<4x256xi1>
    %cst_13 = arith.constant 0.000000e+00 : f32
    %33 = vector.broadcast %cst_13 : f32 to vector<4x256xf32>
    %34 = arith.select %32, %31, %33 : vector<4x256xi1>, vector<4x256xf32>
    %c0_14 = arith.constant 0 : index
    %35 = memref.load %arg1[%c0_14] : memref<98xf32, #tpu.memory_space<smem>>
    %c49 = arith.constant 49 : index
    %36 = memref.load %arg1[%c49] : memref<98xf32, #tpu.memory_space<smem>>
    %37 = vector.broadcast %35 : f32 to vector<4x256xf32>
    %38 = vector.broadcast %36 : f32 to vector<4x256xf32>
    %39 = arith.select %15, %37, %38 : vector<4x256xi1>, vector<4x256xf32>
    %40 = arith.mulf %39, %34 : vector<4x256xf32>
    %41 = arith.addf %28, %40 : vector<4x256xf32>
    %c50_i32 = arith.constant 50 : i32
    %42 = tpu.dynamic_rotate %7 by %c50_i32 dim 1 : vector<4x256xf32>, i32 -> vector<4x256xf32>
    %43 = arith.andi %30, %19 : vector<4x256xi1>
    %cst_15 = arith.constant 0.000000e+00 : f32
    %44 = vector.broadcast %cst_15 : f32 to vector<4x256xf32>
    %45 = arith.select %43, %42, %44 : vector<4x256xi1>, vector<4x256xf32>
    %c1 = arith.constant 1 : index
    %46 = memref.load %arg1[%c1] : memref<98xf32, #tpu.memory_space<smem>>
    %c50 = arith.constant 50 : index
    %47 = memref.load %arg1[%c50] : memref<98xf32, #tpu.memory_space<smem>>
    %48 = vector.broadcast %46 : f32 to vector<4x256xf32>
    %49 = vector.broadcast %47 : f32 to vector<4x256xf32>
    %50 = arith.select %15, %48, %49 : vector<4x256xi1>, vector<4x256xf32>
    %51 = arith.mulf %50, %45 : vector<4x256xf32>
    %52 = arith.addf %41, %51 : vector<4x256xf32>
    %c49_i32 = arith.constant 49 : i32
    %53 = tpu.dynamic_rotate %7 by %c49_i32 dim 1 : vector<4x256xf32>, i32 -> vector<4x256xf32>
    %54 = arith.andi %30, %21 : vector<4x256xi1>
    %cst_16 = arith.constant 0.000000e+00 : f32
    %55 = vector.broadcast %cst_16 : f32 to vector<4x256xf32>
    %56 = arith.select %54, %53, %55 : vector<4x256xi1>, vector<4x256xf32>
    %c2_17 = arith.constant 2 : index
    %57 = memref.load %arg1[%c2_17] : memref<98xf32, #tpu.memory_space<smem>>
    %c51 = arith.constant 51 : index
    %58 = memref.load %arg1[%c51] : memref<98xf32, #tpu.memory_space<smem>>
    %59 = vector.broadcast %57 : f32 to vector<4x256xf32>
    %60 = vector.broadcast %58 : f32 to vector<4x256xf32>
    %61 = arith.select %15, %59, %60 : vector<4x256xi1>, vector<4x256xf32>
    %62 = arith.mulf %61, %56 : vector<4x256xf32>
    %63 = arith.addf %52, %62 : vector<4x256xf32>
    %c48_i32 = arith.constant 48 : i32
    %64 = tpu.dynamic_rotate %7 by %c48_i32 dim 1 : vector<4x256xf32>, i32 -> vector<4x256xf32>
    %cst_18 = arith.constant 0.000000e+00 : f32
    %65 = vector.broadcast %cst_18 : f32 to vector<4x256xf32>
    %66 = arith.select %30, %64, %65 : vector<4x256xi1>, vector<4x256xf32>
    %c3 = arith.constant 3 : index
    %67 = memref.load %arg1[%c3] : memref<98xf32, #tpu.memory_space<smem>>
    %c52 = arith.constant 52 : index
    %68 = memref.load %arg1[%c52] : memref<98xf32, #tpu.memory_space<smem>>
    %69 = vector.broadcast %67 : f32 to vector<4x256xf32>
    %70 = vector.broadcast %68 : f32 to vector<4x256xf32>
    %71 = arith.select %15, %69, %70 : vector<4x256xi1>, vector<4x256xf32>
    %72 = arith.mulf %71, %66 : vector<4x256xf32>
    %73 = arith.addf %63, %72 : vector<4x256xf32>
    %c47_i32 = arith.constant 47 : i32
    %74 = tpu.dynamic_rotate %7 by %c47_i32 dim 1 : vector<4x256xf32>, i32 -> vector<4x256xf32>
    %75 = arith.andi %30, %23 : vector<4x256xi1>
    %cst_19 = arith.constant 0.000000e+00 : f32
    %76 = vector.broadcast %cst_19 : f32 to vector<4x256xf32>
    %77 = arith.select %75, %74, %76 : vector<4x256xi1>, vector<4x256xf32>
    %c4 = arith.constant 4 : index
    %78 = memref.load %arg1[%c4] : memref<98xf32, #tpu.memory_space<smem>>
    %c53 = arith.constant 53 : index
    %79 = memref.load %arg1[%c53] : memref<98xf32, #tpu.memory_space<smem>>
    %80 = vector.broadcast %78 : f32 to vector<4x256xf32>
    %81 = vector.broadcast %79 : f32 to vector<4x256xf32>
    %82 = arith.select %15, %80, %81 : vector<4x256xi1>, vector<4x256xf32>
    %83 = arith.mulf %82, %77 : vector<4x256xf32>
    %84 = arith.addf %73, %83 : vector<4x256xf32>
    %c46_i32 = arith.constant 46 : i32
    %85 = tpu.dynamic_rotate %7 by %c46_i32 dim 1 : vector<4x256xf32>, i32 -> vector<4x256xf32>
    %86 = arith.andi %30, %25 : vector<4x256xi1>
    %cst_20 = arith.constant 0.000000e+00 : f32
    %87 = vector.broadcast %cst_20 : f32 to vector<4x256xf32>
    %88 = arith.select %86, %85, %87 : vector<4x256xi1>, vector<4x256xf32>
    %c5 = arith.constant 5 : index
    %89 = memref.load %arg1[%c5] : memref<98xf32, #tpu.memory_space<smem>>
    %c54 = arith.constant 54 : index
    %90 = memref.load %arg1[%c54] : memref<98xf32, #tpu.memory_space<smem>>
    %91 = vector.broadcast %89 : f32 to vector<4x256xf32>
    %92 = vector.broadcast %90 : f32 to vector<4x256xf32>
    %93 = arith.select %15, %91, %92 : vector<4x256xi1>, vector<4x256xf32>
    %94 = arith.mulf %93, %88 : vector<4x256xf32>
    %95 = arith.addf %84, %94 : vector<4x256xf32>
    %c45_i32 = arith.constant 45 : i32
    %96 = tpu.dynamic_rotate %7 by %c45_i32 dim 1 : vector<4x256xf32>, i32 -> vector<4x256xf32>
    %97 = arith.andi %30, %27 : vector<4x256xi1>
    %cst_21 = arith.constant 0.000000e+00 : f32
    %98 = vector.broadcast %cst_21 : f32 to vector<4x256xf32>
    %99 = arith.select %97, %96, %98 : vector<4x256xi1>, vector<4x256xf32>
    %c6 = arith.constant 6 : index
    %100 = memref.load %arg1[%c6] : memref<98xf32, #tpu.memory_space<smem>>
    %c55 = arith.constant 55 : index
    %101 = memref.load %arg1[%c55] : memref<98xf32, #tpu.memory_space<smem>>
    %102 = vector.broadcast %100 : f32 to vector<4x256xf32>
    %103 = vector.broadcast %101 : f32 to vector<4x256xf32>
    %104 = arith.select %15, %102, %103 : vector<4x256xi1>, vector<4x256xf32>
    %105 = arith.mulf %104, %99 : vector<4x256xf32>
    %106 = arith.addf %95, %105 : vector<4x256xf32>
    %c2_i32_22 = arith.constant 2 : i32
    %107 = vector.broadcast %c2_i32_22 : i32 to vector<4x256xi32>
    %108 = arith.cmpi sge, %10, %107 : vector<4x256xi32>
    %c35_i32 = arith.constant 35 : i32
    %109 = tpu.dynamic_rotate %7 by %c35_i32 dim 1 : vector<4x256xf32>, i32 -> vector<4x256xf32>
    %110 = arith.andi %108, %17 : vector<4x256xi1>
    %cst_23 = arith.constant 0.000000e+00 : f32
    %111 = vector.broadcast %cst_23 : f32 to vector<4x256xf32>
    %112 = arith.select %110, %109, %111 : vector<4x256xi1>, vector<4x256xf32>
    %c7 = arith.constant 7 : index
    %113 = memref.load %arg1[%c7] : memref<98xf32, #tpu.memory_space<smem>>
    %c56 = arith.constant 56 : index
    %114 = memref.load %arg1[%c56] : memref<98xf32, #tpu.memory_space<smem>>
    %115 = vector.broadcast %113 : f32 to vector<4x256xf32>
    %116 = vector.broadcast %114 : f32 to vector<4x256xf32>
    %117 = arith.select %15, %115, %116 : vector<4x256xi1>, vector<4x256xf32>
    %118 = arith.mulf %117, %112 : vector<4x256xf32>
    %119 = arith.addf %106, %118 : vector<4x256xf32>
    %c34_i32 = arith.constant 34 : i32
    %120 = tpu.dynamic_rotate %7 by %c34_i32 dim 1 : vector<4x256xf32>, i32 -> vector<4x256xf32>
    %121 = arith.andi %108, %19 : vector<4x256xi1>
    %cst_24 = arith.constant 0.000000e+00 : f32
    %122 = vector.broadcast %cst_24 : f32 to vector<4x256xf32>
    %123 = arith.select %121, %120, %122 : vector<4x256xi1>, vector<4x256xf32>
    %c8 = arith.constant 8 : index
    %124 = memref.load %arg1[%c8] : memref<98xf32, #tpu.memory_space<smem>>
    %c57 = arith.constant 57 : index
    %125 = memref.load %arg1[%c57] : memref<98xf32, #tpu.memory_space<smem>>
    %126 = vector.broadcast %124 : f32 to vector<4x256xf32>
    %127 = vector.broadcast %125 : f32 to vector<4x256xf32>
    %128 = arith.select %15, %126, %127 : vector<4x256xi1>, vector<4x256xf32>
    %129 = arith.mulf %128, %123 : vector<4x256xf32>
    %130 = arith.addf %119, %129 : vector<4x256xf32>
    %c33_i32 = arith.constant 33 : i32
    %131 = tpu.dynamic_rotate %7 by %c33_i32 dim 1 : vector<4x256xf32>, i32 -> vector<4x256xf32>
    %132 = arith.andi %108, %21 : vector<4x256xi1>
    %cst_25 = arith.constant 0.000000e+00 : f32
    %133 = vector.broadcast %cst_25 : f32 to vector<4x256xf32>
    %134 = arith.select %132, %131, %133 : vector<4x256xi1>, vector<4x256xf32>
    %c9 = arith.constant 9 : index
    %135 = memref.load %arg1[%c9] : memref<98xf32, #tpu.memory_space<smem>>
    %c58 = arith.constant 58 : index
    %136 = memref.load %arg1[%c58] : memref<98xf32, #tpu.memory_space<smem>>
    %137 = vector.broadcast %135 : f32 to vector<4x256xf32>
    %138 = vector.broadcast %136 : f32 to vector<4x256xf32>
    %139 = arith.select %15, %137, %138 : vector<4x256xi1>, vector<4x256xf32>
    %140 = arith.mulf %139, %134 : vector<4x256xf32>
    %141 = arith.addf %130, %140 : vector<4x256xf32>
    %c32_i32 = arith.constant 32 : i32
    %142 = tpu.dynamic_rotate %7 by %c32_i32 dim 1 : vector<4x256xf32>, i32 -> vector<4x256xf32>
    %cst_26 = arith.constant 0.000000e+00 : f32
    %143 = vector.broadcast %cst_26 : f32 to vector<4x256xf32>
    %144 = arith.select %108, %142, %143 : vector<4x256xi1>, vector<4x256xf32>
    %c10 = arith.constant 10 : index
    %145 = memref.load %arg1[%c10] : memref<98xf32, #tpu.memory_space<smem>>
    %c59 = arith.constant 59 : index
    %146 = memref.load %arg1[%c59] : memref<98xf32, #tpu.memory_space<smem>>
    %147 = vector.broadcast %145 : f32 to vector<4x256xf32>
    %148 = vector.broadcast %146 : f32 to vector<4x256xf32>
    %149 = arith.select %15, %147, %148 : vector<4x256xi1>, vector<4x256xf32>
    %150 = arith.mulf %149, %144 : vector<4x256xf32>
    %151 = arith.addf %141, %150 : vector<4x256xf32>
    %c31_i32 = arith.constant 31 : i32
    %152 = tpu.dynamic_rotate %7 by %c31_i32 dim 1 : vector<4x256xf32>, i32 -> vector<4x256xf32>
    %153 = arith.andi %108, %23 : vector<4x256xi1>
    %cst_27 = arith.constant 0.000000e+00 : f32
    %154 = vector.broadcast %cst_27 : f32 to vector<4x256xf32>
    %155 = arith.select %153, %152, %154 : vector<4x256xi1>, vector<4x256xf32>
    %c11 = arith.constant 11 : index
    %156 = memref.load %arg1[%c11] : memref<98xf32, #tpu.memory_space<smem>>
    %c60 = arith.constant 60 : index
    %157 = memref.load %arg1[%c60] : memref<98xf32, #tpu.memory_space<smem>>
    %158 = vector.broadcast %156 : f32 to vector<4x256xf32>
    %159 = vector.broadcast %157 : f32 to vector<4x256xf32>
    %160 = arith.select %15, %158, %159 : vector<4x256xi1>, vector<4x256xf32>
    %161 = arith.mulf %160, %155 : vector<4x256xf32>
    %162 = arith.addf %151, %161 : vector<4x256xf32>
    %c30_i32 = arith.constant 30 : i32
    %163 = tpu.dynamic_rotate %7 by %c30_i32 dim 1 : vector<4x256xf32>, i32 -> vector<4x256xf32>
    %164 = arith.andi %108, %25 : vector<4x256xi1>
    %cst_28 = arith.constant 0.000000e+00 : f32
    %165 = vector.broadcast %cst_28 : f32 to vector<4x256xf32>
    %166 = arith.select %164, %163, %165 : vector<4x256xi1>, vector<4x256xf32>
    %c12 = arith.constant 12 : index
    %167 = memref.load %arg1[%c12] : memref<98xf32, #tpu.memory_space<smem>>
    %c61 = arith.constant 61 : index
    %168 = memref.load %arg1[%c61] : memref<98xf32, #tpu.memory_space<smem>>
    %169 = vector.broadcast %167 : f32 to vector<4x256xf32>
    %170 = vector.broadcast %168 : f32 to vector<4x256xf32>
    %171 = arith.select %15, %169, %170 : vector<4x256xi1>, vector<4x256xf32>
    %172 = arith.mulf %171, %166 : vector<4x256xf32>
    %173 = arith.addf %162, %172 : vector<4x256xf32>
    %c29_i32 = arith.constant 29 : i32
    %174 = tpu.dynamic_rotate %7 by %c29_i32 dim 1 : vector<4x256xf32>, i32 -> vector<4x256xf32>
    %175 = arith.andi %108, %27 : vector<4x256xi1>
    %cst_29 = arith.constant 0.000000e+00 : f32
    %176 = vector.broadcast %cst_29 : f32 to vector<4x256xf32>
    %177 = arith.select %175, %174, %176 : vector<4x256xi1>, vector<4x256xf32>
    %c13 = arith.constant 13 : index
    %178 = memref.load %arg1[%c13] : memref<98xf32, #tpu.memory_space<smem>>
    %c62 = arith.constant 62 : index
    %179 = memref.load %arg1[%c62] : memref<98xf32, #tpu.memory_space<smem>>
    %180 = vector.broadcast %178 : f32 to vector<4x256xf32>
    %181 = vector.broadcast %179 : f32 to vector<4x256xf32>
    %182 = arith.select %15, %180, %181 : vector<4x256xi1>, vector<4x256xf32>
    %183 = arith.mulf %182, %177 : vector<4x256xf32>
    %184 = arith.addf %173, %183 : vector<4x256xf32>
    %c1_i32_30 = arith.constant 1 : i32
    %185 = vector.broadcast %c1_i32_30 : i32 to vector<4x256xi32>
    %186 = arith.cmpi sge, %10, %185 : vector<4x256xi32>
    %c19_i32 = arith.constant 19 : i32
    %187 = tpu.dynamic_rotate %7 by %c19_i32 dim 1 : vector<4x256xf32>, i32 -> vector<4x256xf32>
    %188 = arith.andi %186, %17 : vector<4x256xi1>
    %cst_31 = arith.constant 0.000000e+00 : f32
    %189 = vector.broadcast %cst_31 : f32 to vector<4x256xf32>
    %190 = arith.select %188, %187, %189 : vector<4x256xi1>, vector<4x256xf32>
    %c14 = arith.constant 14 : index
    %191 = memref.load %arg1[%c14] : memref<98xf32, #tpu.memory_space<smem>>
    %c63 = arith.constant 63 : index
    %192 = memref.load %arg1[%c63] : memref<98xf32, #tpu.memory_space<smem>>
    %193 = vector.broadcast %191 : f32 to vector<4x256xf32>
    %194 = vector.broadcast %192 : f32 to vector<4x256xf32>
    %195 = arith.select %15, %193, %194 : vector<4x256xi1>, vector<4x256xf32>
    %196 = arith.mulf %195, %190 : vector<4x256xf32>
    %197 = arith.addf %184, %196 : vector<4x256xf32>
    %c18_i32 = arith.constant 18 : i32
    %198 = tpu.dynamic_rotate %7 by %c18_i32 dim 1 : vector<4x256xf32>, i32 -> vector<4x256xf32>
    %199 = arith.andi %186, %19 : vector<4x256xi1>
    %cst_32 = arith.constant 0.000000e+00 : f32
    %200 = vector.broadcast %cst_32 : f32 to vector<4x256xf32>
    %201 = arith.select %199, %198, %200 : vector<4x256xi1>, vector<4x256xf32>
    %c15 = arith.constant 15 : index
    %202 = memref.load %arg1[%c15] : memref<98xf32, #tpu.memory_space<smem>>
    %c64 = arith.constant 64 : index
    %203 = memref.load %arg1[%c64] : memref<98xf32, #tpu.memory_space<smem>>
    %204 = vector.broadcast %202 : f32 to vector<4x256xf32>
    %205 = vector.broadcast %203 : f32 to vector<4x256xf32>
    %206 = arith.select %15, %204, %205 : vector<4x256xi1>, vector<4x256xf32>
    %207 = arith.mulf %206, %201 : vector<4x256xf32>
    %208 = arith.addf %197, %207 : vector<4x256xf32>
    %c17_i32 = arith.constant 17 : i32
    %209 = tpu.dynamic_rotate %7 by %c17_i32 dim 1 : vector<4x256xf32>, i32 -> vector<4x256xf32>
    %210 = arith.andi %186, %21 : vector<4x256xi1>
    %cst_33 = arith.constant 0.000000e+00 : f32
    %211 = vector.broadcast %cst_33 : f32 to vector<4x256xf32>
    %212 = arith.select %210, %209, %211 : vector<4x256xi1>, vector<4x256xf32>
    %c16 = arith.constant 16 : index
    %213 = memref.load %arg1[%c16] : memref<98xf32, #tpu.memory_space<smem>>
    %c65 = arith.constant 65 : index
    %214 = memref.load %arg1[%c65] : memref<98xf32, #tpu.memory_space<smem>>
    %215 = vector.broadcast %213 : f32 to vector<4x256xf32>
    %216 = vector.broadcast %214 : f32 to vector<4x256xf32>
    %217 = arith.select %15, %215, %216 : vector<4x256xi1>, vector<4x256xf32>
    %218 = arith.mulf %217, %212 : vector<4x256xf32>
    %219 = arith.addf %208, %218 : vector<4x256xf32>
    %c16_i32 = arith.constant 16 : i32
    %220 = tpu.dynamic_rotate %7 by %c16_i32 dim 1 : vector<4x256xf32>, i32 -> vector<4x256xf32>
    %cst_34 = arith.constant 0.000000e+00 : f32
    %221 = vector.broadcast %cst_34 : f32 to vector<4x256xf32>
    %222 = arith.select %186, %220, %221 : vector<4x256xi1>, vector<4x256xf32>
    %c17 = arith.constant 17 : index
    %223 = memref.load %arg1[%c17] : memref<98xf32, #tpu.memory_space<smem>>
    %c66 = arith.constant 66 : index
    %224 = memref.load %arg1[%c66] : memref<98xf32, #tpu.memory_space<smem>>
    %225 = vector.broadcast %223 : f32 to vector<4x256xf32>
    %226 = vector.broadcast %224 : f32 to vector<4x256xf32>
    %227 = arith.select %15, %225, %226 : vector<4x256xi1>, vector<4x256xf32>
    %228 = arith.mulf %227, %222 : vector<4x256xf32>
    %229 = arith.addf %219, %228 : vector<4x256xf32>
    %c15_i32_35 = arith.constant 15 : i32
    %230 = tpu.dynamic_rotate %7 by %c15_i32_35 dim 1 : vector<4x256xf32>, i32 -> vector<4x256xf32>
    %231 = arith.andi %186, %23 : vector<4x256xi1>
    %cst_36 = arith.constant 0.000000e+00 : f32
    %232 = vector.broadcast %cst_36 : f32 to vector<4x256xf32>
    %233 = arith.select %231, %230, %232 : vector<4x256xi1>, vector<4x256xf32>
    %c18 = arith.constant 18 : index
    %234 = memref.load %arg1[%c18] : memref<98xf32, #tpu.memory_space<smem>>
    %c67 = arith.constant 67 : index
    %235 = memref.load %arg1[%c67] : memref<98xf32, #tpu.memory_space<smem>>
    %236 = vector.broadcast %234 : f32 to vector<4x256xf32>
    %237 = vector.broadcast %235 : f32 to vector<4x256xf32>
    %238 = arith.select %15, %236, %237 : vector<4x256xi1>, vector<4x256xf32>
    %239 = arith.mulf %238, %233 : vector<4x256xf32>
    %240 = arith.addf %229, %239 : vector<4x256xf32>
    %c14_i32_37 = arith.constant 14 : i32
    %241 = tpu.dynamic_rotate %7 by %c14_i32_37 dim 1 : vector<4x256xf32>, i32 -> vector<4x256xf32>
    %242 = arith.andi %186, %25 : vector<4x256xi1>
    %cst_38 = arith.constant 0.000000e+00 : f32
    %243 = vector.broadcast %cst_38 : f32 to vector<4x256xf32>
    %244 = arith.select %242, %241, %243 : vector<4x256xi1>, vector<4x256xf32>
    %c19 = arith.constant 19 : index
    %245 = memref.load %arg1[%c19] : memref<98xf32, #tpu.memory_space<smem>>
    %c68 = arith.constant 68 : index
    %246 = memref.load %arg1[%c68] : memref<98xf32, #tpu.memory_space<smem>>
    %247 = vector.broadcast %245 : f32 to vector<4x256xf32>
    %248 = vector.broadcast %246 : f32 to vector<4x256xf32>
    %249 = arith.select %15, %247, %248 : vector<4x256xi1>, vector<4x256xf32>
    %250 = arith.mulf %249, %244 : vector<4x256xf32>
    %251 = arith.addf %240, %250 : vector<4x256xf32>
    %c13_i32_39 = arith.constant 13 : i32
    %252 = tpu.dynamic_rotate %7 by %c13_i32_39 dim 1 : vector<4x256xf32>, i32 -> vector<4x256xf32>
    %253 = arith.andi %186, %27 : vector<4x256xi1>
    %cst_40 = arith.constant 0.000000e+00 : f32
    %254 = vector.broadcast %cst_40 : f32 to vector<4x256xf32>
    %255 = arith.select %253, %252, %254 : vector<4x256xi1>, vector<4x256xf32>
    %c20 = arith.constant 20 : index
    %256 = memref.load %arg1[%c20] : memref<98xf32, #tpu.memory_space<smem>>
    %c69 = arith.constant 69 : index
    %257 = memref.load %arg1[%c69] : memref<98xf32, #tpu.memory_space<smem>>
    %258 = vector.broadcast %256 : f32 to vector<4x256xf32>
    %259 = vector.broadcast %257 : f32 to vector<4x256xf32>
    %260 = arith.select %15, %258, %259 : vector<4x256xi1>, vector<4x256xf32>
    %261 = arith.mulf %260, %255 : vector<4x256xf32>
    %262 = arith.addf %251, %261 : vector<4x256xf32>
    %c3_i32_41 = arith.constant 3 : i32
    %263 = tpu.dynamic_rotate %7 by %c3_i32_41 dim 1 : vector<4x256xf32>, i32 -> vector<4x256xf32>
    %cst_42 = arith.constant 0.000000e+00 : f32
    %264 = vector.broadcast %cst_42 : f32 to vector<4x256xf32>
    %265 = arith.select %17, %263, %264 : vector<4x256xi1>, vector<4x256xf32>
    %c21 = arith.constant 21 : index
    %266 = memref.load %arg1[%c21] : memref<98xf32, #tpu.memory_space<smem>>
    %c70 = arith.constant 70 : index
    %267 = memref.load %arg1[%c70] : memref<98xf32, #tpu.memory_space<smem>>
    %268 = vector.broadcast %266 : f32 to vector<4x256xf32>
    %269 = vector.broadcast %267 : f32 to vector<4x256xf32>
    %270 = arith.select %15, %268, %269 : vector<4x256xi1>, vector<4x256xf32>
    %271 = arith.mulf %270, %265 : vector<4x256xf32>
    %272 = arith.addf %262, %271 : vector<4x256xf32>
    %c2_i32_43 = arith.constant 2 : i32
    %273 = tpu.dynamic_rotate %7 by %c2_i32_43 dim 1 : vector<4x256xf32>, i32 -> vector<4x256xf32>
    %cst_44 = arith.constant 0.000000e+00 : f32
    %274 = vector.broadcast %cst_44 : f32 to vector<4x256xf32>
    %275 = arith.select %19, %273, %274 : vector<4x256xi1>, vector<4x256xf32>
    %c22 = arith.constant 22 : index
    %276 = memref.load %arg1[%c22] : memref<98xf32, #tpu.memory_space<smem>>
    %c71 = arith.constant 71 : index
    %277 = memref.load %arg1[%c71] : memref<98xf32, #tpu.memory_space<smem>>
    %278 = vector.broadcast %276 : f32 to vector<4x256xf32>
    %279 = vector.broadcast %277 : f32 to vector<4x256xf32>
    %280 = arith.select %15, %278, %279 : vector<4x256xi1>, vector<4x256xf32>
    %281 = arith.mulf %280, %275 : vector<4x256xf32>
    %282 = arith.addf %272, %281 : vector<4x256xf32>
    %c1_i32_45 = arith.constant 1 : i32
    %283 = tpu.dynamic_rotate %7 by %c1_i32_45 dim 1 : vector<4x256xf32>, i32 -> vector<4x256xf32>
    %cst_46 = arith.constant 0.000000e+00 : f32
    %284 = vector.broadcast %cst_46 : f32 to vector<4x256xf32>
    %285 = arith.select %21, %283, %284 : vector<4x256xi1>, vector<4x256xf32>
    %c23 = arith.constant 23 : index
    %286 = memref.load %arg1[%c23] : memref<98xf32, #tpu.memory_space<smem>>
    %c72 = arith.constant 72 : index
    %287 = memref.load %arg1[%c72] : memref<98xf32, #tpu.memory_space<smem>>
    %288 = vector.broadcast %286 : f32 to vector<4x256xf32>
    %289 = vector.broadcast %287 : f32 to vector<4x256xf32>
    %290 = arith.select %15, %288, %289 : vector<4x256xi1>, vector<4x256xf32>
    %291 = arith.mulf %290, %285 : vector<4x256xf32>
    %292 = arith.addf %282, %291 : vector<4x256xf32>
    %c24 = arith.constant 24 : index
    %293 = memref.load %arg1[%c24] : memref<98xf32, #tpu.memory_space<smem>>
    %c73 = arith.constant 73 : index
    %294 = memref.load %arg1[%c73] : memref<98xf32, #tpu.memory_space<smem>>
    %295 = vector.broadcast %293 : f32 to vector<4x256xf32>
    %296 = vector.broadcast %294 : f32 to vector<4x256xf32>
    %297 = arith.select %15, %295, %296 : vector<4x256xi1>, vector<4x256xf32>
    %298 = arith.mulf %297, %7 : vector<4x256xf32>
    %299 = arith.addf %292, %298 : vector<4x256xf32>
    %c255_i32 = arith.constant 255 : i32
    %300 = tpu.dynamic_rotate %7 by %c255_i32 dim 1 : vector<4x256xf32>, i32 -> vector<4x256xf32>
    %cst_47 = arith.constant 0.000000e+00 : f32
    %301 = vector.broadcast %cst_47 : f32 to vector<4x256xf32>
    %302 = arith.select %23, %300, %301 : vector<4x256xi1>, vector<4x256xf32>
    %c25 = arith.constant 25 : index
    %303 = memref.load %arg1[%c25] : memref<98xf32, #tpu.memory_space<smem>>
    %c74 = arith.constant 74 : index
    %304 = memref.load %arg1[%c74] : memref<98xf32, #tpu.memory_space<smem>>
    %305 = vector.broadcast %303 : f32 to vector<4x256xf32>
    %306 = vector.broadcast %304 : f32 to vector<4x256xf32>
    %307 = arith.select %15, %305, %306 : vector<4x256xi1>, vector<4x256xf32>
    %308 = arith.mulf %307, %302 : vector<4x256xf32>
    %309 = arith.addf %299, %308 : vector<4x256xf32>
    %c254_i32 = arith.constant 254 : i32
    %310 = tpu.dynamic_rotate %7 by %c254_i32 dim 1 : vector<4x256xf32>, i32 -> vector<4x256xf32>
    %cst_48 = arith.constant 0.000000e+00 : f32
    %311 = vector.broadcast %cst_48 : f32 to vector<4x256xf32>
    %312 = arith.select %25, %310, %311 : vector<4x256xi1>, vector<4x256xf32>
    %c26 = arith.constant 26 : index
    %313 = memref.load %arg1[%c26] : memref<98xf32, #tpu.memory_space<smem>>
    %c75 = arith.constant 75 : index
    %314 = memref.load %arg1[%c75] : memref<98xf32, #tpu.memory_space<smem>>
    %315 = vector.broadcast %313 : f32 to vector<4x256xf32>
    %316 = vector.broadcast %314 : f32 to vector<4x256xf32>
    %317 = arith.select %15, %315, %316 : vector<4x256xi1>, vector<4x256xf32>
    %318 = arith.mulf %317, %312 : vector<4x256xf32>
    %319 = arith.addf %309, %318 : vector<4x256xf32>
    %c253_i32 = arith.constant 253 : i32
    %320 = tpu.dynamic_rotate %7 by %c253_i32 dim 1 : vector<4x256xf32>, i32 -> vector<4x256xf32>
    %cst_49 = arith.constant 0.000000e+00 : f32
    %321 = vector.broadcast %cst_49 : f32 to vector<4x256xf32>
    %322 = arith.select %27, %320, %321 : vector<4x256xi1>, vector<4x256xf32>
    %c27 = arith.constant 27 : index
    %323 = memref.load %arg1[%c27] : memref<98xf32, #tpu.memory_space<smem>>
    %c76 = arith.constant 76 : index
    %324 = memref.load %arg1[%c76] : memref<98xf32, #tpu.memory_space<smem>>
    %325 = vector.broadcast %323 : f32 to vector<4x256xf32>
    %326 = vector.broadcast %324 : f32 to vector<4x256xf32>
    %327 = arith.select %15, %325, %326 : vector<4x256xi1>, vector<4x256xf32>
    %328 = arith.mulf %327, %322 : vector<4x256xf32>
    %329 = arith.addf %319, %328 : vector<4x256xf32>
    %c15_i32_50 = arith.constant 15 : i32
    %330 = vector.broadcast %c15_i32_50 : i32 to vector<4x256xi32>
    %331 = arith.cmpi slt, %10, %330 : vector<4x256xi32>
    %c243_i32 = arith.constant 243 : i32
    %332 = tpu.dynamic_rotate %7 by %c243_i32 dim 1 : vector<4x256xf32>, i32 -> vector<4x256xf32>
    %333 = arith.andi %331, %17 : vector<4x256xi1>
    %cst_51 = arith.constant 0.000000e+00 : f32
    %334 = vector.broadcast %cst_51 : f32 to vector<4x256xf32>
    %335 = arith.select %333, %332, %334 : vector<4x256xi1>, vector<4x256xf32>
    %c28 = arith.constant 28 : index
    %336 = memref.load %arg1[%c28] : memref<98xf32, #tpu.memory_space<smem>>
    %c77 = arith.constant 77 : index
    %337 = memref.load %arg1[%c77] : memref<98xf32, #tpu.memory_space<smem>>
    %338 = vector.broadcast %336 : f32 to vector<4x256xf32>
    %339 = vector.broadcast %337 : f32 to vector<4x256xf32>
    %340 = arith.select %15, %338, %339 : vector<4x256xi1>, vector<4x256xf32>
    %341 = arith.mulf %340, %335 : vector<4x256xf32>
    %342 = arith.addf %329, %341 : vector<4x256xf32>
    %c242_i32 = arith.constant 242 : i32
    %343 = tpu.dynamic_rotate %7 by %c242_i32 dim 1 : vector<4x256xf32>, i32 -> vector<4x256xf32>
    %344 = arith.andi %331, %19 : vector<4x256xi1>
    %cst_52 = arith.constant 0.000000e+00 : f32
    %345 = vector.broadcast %cst_52 : f32 to vector<4x256xf32>
    %346 = arith.select %344, %343, %345 : vector<4x256xi1>, vector<4x256xf32>
    %c29 = arith.constant 29 : index
    %347 = memref.load %arg1[%c29] : memref<98xf32, #tpu.memory_space<smem>>
    %c78 = arith.constant 78 : index
    %348 = memref.load %arg1[%c78] : memref<98xf32, #tpu.memory_space<smem>>
    %349 = vector.broadcast %347 : f32 to vector<4x256xf32>
    %350 = vector.broadcast %348 : f32 to vector<4x256xf32>
    %351 = arith.select %15, %349, %350 : vector<4x256xi1>, vector<4x256xf32>
    %352 = arith.mulf %351, %346 : vector<4x256xf32>
    %353 = arith.addf %342, %352 : vector<4x256xf32>
    %c241_i32 = arith.constant 241 : i32
    %354 = tpu.dynamic_rotate %7 by %c241_i32 dim 1 : vector<4x256xf32>, i32 -> vector<4x256xf32>
    %355 = arith.andi %331, %21 : vector<4x256xi1>
    %cst_53 = arith.constant 0.000000e+00 : f32
    %356 = vector.broadcast %cst_53 : f32 to vector<4x256xf32>
    %357 = arith.select %355, %354, %356 : vector<4x256xi1>, vector<4x256xf32>
    %c30 = arith.constant 30 : index
    %358 = memref.load %arg1[%c30] : memref<98xf32, #tpu.memory_space<smem>>
    %c79 = arith.constant 79 : index
    %359 = memref.load %arg1[%c79] : memref<98xf32, #tpu.memory_space<smem>>
    %360 = vector.broadcast %358 : f32 to vector<4x256xf32>
    %361 = vector.broadcast %359 : f32 to vector<4x256xf32>
    %362 = arith.select %15, %360, %361 : vector<4x256xi1>, vector<4x256xf32>
    %363 = arith.mulf %362, %357 : vector<4x256xf32>
    %364 = arith.addf %353, %363 : vector<4x256xf32>
    %c240_i32 = arith.constant 240 : i32
    %365 = tpu.dynamic_rotate %7 by %c240_i32 dim 1 : vector<4x256xf32>, i32 -> vector<4x256xf32>
    %cst_54 = arith.constant 0.000000e+00 : f32
    %366 = vector.broadcast %cst_54 : f32 to vector<4x256xf32>
    %367 = arith.select %331, %365, %366 : vector<4x256xi1>, vector<4x256xf32>
    %c31 = arith.constant 31 : index
    %368 = memref.load %arg1[%c31] : memref<98xf32, #tpu.memory_space<smem>>
    %c80 = arith.constant 80 : index
    %369 = memref.load %arg1[%c80] : memref<98xf32, #tpu.memory_space<smem>>
    %370 = vector.broadcast %368 : f32 to vector<4x256xf32>
    %371 = vector.broadcast %369 : f32 to vector<4x256xf32>
    %372 = arith.select %15, %370, %371 : vector<4x256xi1>, vector<4x256xf32>
    %373 = arith.mulf %372, %367 : vector<4x256xf32>
    %374 = arith.addf %364, %373 : vector<4x256xf32>
    %c239_i32 = arith.constant 239 : i32
    %375 = tpu.dynamic_rotate %7 by %c239_i32 dim 1 : vector<4x256xf32>, i32 -> vector<4x256xf32>
    %376 = arith.andi %331, %23 : vector<4x256xi1>
    %cst_55 = arith.constant 0.000000e+00 : f32
    %377 = vector.broadcast %cst_55 : f32 to vector<4x256xf32>
    %378 = arith.select %376, %375, %377 : vector<4x256xi1>, vector<4x256xf32>
    %c32 = arith.constant 32 : index
    %379 = memref.load %arg1[%c32] : memref<98xf32, #tpu.memory_space<smem>>
    %c81 = arith.constant 81 : index
    %380 = memref.load %arg1[%c81] : memref<98xf32, #tpu.memory_space<smem>>
    %381 = vector.broadcast %379 : f32 to vector<4x256xf32>
    %382 = vector.broadcast %380 : f32 to vector<4x256xf32>
    %383 = arith.select %15, %381, %382 : vector<4x256xi1>, vector<4x256xf32>
    %384 = arith.mulf %383, %378 : vector<4x256xf32>
    %385 = arith.addf %374, %384 : vector<4x256xf32>
    %c238_i32 = arith.constant 238 : i32
    %386 = tpu.dynamic_rotate %7 by %c238_i32 dim 1 : vector<4x256xf32>, i32 -> vector<4x256xf32>
    %387 = arith.andi %331, %25 : vector<4x256xi1>
    %cst_56 = arith.constant 0.000000e+00 : f32
    %388 = vector.broadcast %cst_56 : f32 to vector<4x256xf32>
    %389 = arith.select %387, %386, %388 : vector<4x256xi1>, vector<4x256xf32>
    %c33 = arith.constant 33 : index
    %390 = memref.load %arg1[%c33] : memref<98xf32, #tpu.memory_space<smem>>
    %c82 = arith.constant 82 : index
    %391 = memref.load %arg1[%c82] : memref<98xf32, #tpu.memory_space<smem>>
    %392 = vector.broadcast %390 : f32 to vector<4x256xf32>
    %393 = vector.broadcast %391 : f32 to vector<4x256xf32>
    %394 = arith.select %15, %392, %393 : vector<4x256xi1>, vector<4x256xf32>
    %395 = arith.mulf %394, %389 : vector<4x256xf32>
    %396 = arith.addf %385, %395 : vector<4x256xf32>
    %c237_i32 = arith.constant 237 : i32
    %397 = tpu.dynamic_rotate %7 by %c237_i32 dim 1 : vector<4x256xf32>, i32 -> vector<4x256xf32>
    %398 = arith.andi %331, %27 : vector<4x256xi1>
    %cst_57 = arith.constant 0.000000e+00 : f32
    %399 = vector.broadcast %cst_57 : f32 to vector<4x256xf32>
    %400 = arith.select %398, %397, %399 : vector<4x256xi1>, vector<4x256xf32>
    %c34 = arith.constant 34 : index
    %401 = memref.load %arg1[%c34] : memref<98xf32, #tpu.memory_space<smem>>
    %c83 = arith.constant 83 : index
    %402 = memref.load %arg1[%c83] : memref<98xf32, #tpu.memory_space<smem>>
    %403 = vector.broadcast %401 : f32 to vector<4x256xf32>
    %404 = vector.broadcast %402 : f32 to vector<4x256xf32>
    %405 = arith.select %15, %403, %404 : vector<4x256xi1>, vector<4x256xf32>
    %406 = arith.mulf %405, %400 : vector<4x256xf32>
    %407 = arith.addf %396, %406 : vector<4x256xf32>
    %c14_i32_58 = arith.constant 14 : i32
    %408 = vector.broadcast %c14_i32_58 : i32 to vector<4x256xi32>
    %409 = arith.cmpi slt, %10, %408 : vector<4x256xi32>
    %c227_i32 = arith.constant 227 : i32
    %410 = tpu.dynamic_rotate %7 by %c227_i32 dim 1 : vector<4x256xf32>, i32 -> vector<4x256xf32>
    %411 = arith.andi %409, %17 : vector<4x256xi1>
    %cst_59 = arith.constant 0.000000e+00 : f32
    %412 = vector.broadcast %cst_59 : f32 to vector<4x256xf32>
    %413 = arith.select %411, %410, %412 : vector<4x256xi1>, vector<4x256xf32>
    %c35 = arith.constant 35 : index
    %414 = memref.load %arg1[%c35] : memref<98xf32, #tpu.memory_space<smem>>
    %c84 = arith.constant 84 : index
    %415 = memref.load %arg1[%c84] : memref<98xf32, #tpu.memory_space<smem>>
    %416 = vector.broadcast %414 : f32 to vector<4x256xf32>
    %417 = vector.broadcast %415 : f32 to vector<4x256xf32>
    %418 = arith.select %15, %416, %417 : vector<4x256xi1>, vector<4x256xf32>
    %419 = arith.mulf %418, %413 : vector<4x256xf32>
    %420 = arith.addf %407, %419 : vector<4x256xf32>
    %c226_i32 = arith.constant 226 : i32
    %421 = tpu.dynamic_rotate %7 by %c226_i32 dim 1 : vector<4x256xf32>, i32 -> vector<4x256xf32>
    %422 = arith.andi %409, %19 : vector<4x256xi1>
    %cst_60 = arith.constant 0.000000e+00 : f32
    %423 = vector.broadcast %cst_60 : f32 to vector<4x256xf32>
    %424 = arith.select %422, %421, %423 : vector<4x256xi1>, vector<4x256xf32>
    %c36 = arith.constant 36 : index
    %425 = memref.load %arg1[%c36] : memref<98xf32, #tpu.memory_space<smem>>
    %c85 = arith.constant 85 : index
    %426 = memref.load %arg1[%c85] : memref<98xf32, #tpu.memory_space<smem>>
    %427 = vector.broadcast %425 : f32 to vector<4x256xf32>
    %428 = vector.broadcast %426 : f32 to vector<4x256xf32>
    %429 = arith.select %15, %427, %428 : vector<4x256xi1>, vector<4x256xf32>
    %430 = arith.mulf %429, %424 : vector<4x256xf32>
    %431 = arith.addf %420, %430 : vector<4x256xf32>
    %c225_i32 = arith.constant 225 : i32
    %432 = tpu.dynamic_rotate %7 by %c225_i32 dim 1 : vector<4x256xf32>, i32 -> vector<4x256xf32>
    %433 = arith.andi %409, %21 : vector<4x256xi1>
    %cst_61 = arith.constant 0.000000e+00 : f32
    %434 = vector.broadcast %cst_61 : f32 to vector<4x256xf32>
    %435 = arith.select %433, %432, %434 : vector<4x256xi1>, vector<4x256xf32>
    %c37 = arith.constant 37 : index
    %436 = memref.load %arg1[%c37] : memref<98xf32, #tpu.memory_space<smem>>
    %c86 = arith.constant 86 : index
    %437 = memref.load %arg1[%c86] : memref<98xf32, #tpu.memory_space<smem>>
    %438 = vector.broadcast %436 : f32 to vector<4x256xf32>
    %439 = vector.broadcast %437 : f32 to vector<4x256xf32>
    %440 = arith.select %15, %438, %439 : vector<4x256xi1>, vector<4x256xf32>
    %441 = arith.mulf %440, %435 : vector<4x256xf32>
    %442 = arith.addf %431, %441 : vector<4x256xf32>
    %c224_i32 = arith.constant 224 : i32
    %443 = tpu.dynamic_rotate %7 by %c224_i32 dim 1 : vector<4x256xf32>, i32 -> vector<4x256xf32>
    %cst_62 = arith.constant 0.000000e+00 : f32
    %444 = vector.broadcast %cst_62 : f32 to vector<4x256xf32>
    %445 = arith.select %409, %443, %444 : vector<4x256xi1>, vector<4x256xf32>
    %c38 = arith.constant 38 : index
    %446 = memref.load %arg1[%c38] : memref<98xf32, #tpu.memory_space<smem>>
    %c87 = arith.constant 87 : index
    %447 = memref.load %arg1[%c87] : memref<98xf32, #tpu.memory_space<smem>>
    %448 = vector.broadcast %446 : f32 to vector<4x256xf32>
    %449 = vector.broadcast %447 : f32 to vector<4x256xf32>
    %450 = arith.select %15, %448, %449 : vector<4x256xi1>, vector<4x256xf32>
    %451 = arith.mulf %450, %445 : vector<4x256xf32>
    %452 = arith.addf %442, %451 : vector<4x256xf32>
    %c223_i32 = arith.constant 223 : i32
    %453 = tpu.dynamic_rotate %7 by %c223_i32 dim 1 : vector<4x256xf32>, i32 -> vector<4x256xf32>
    %454 = arith.andi %409, %23 : vector<4x256xi1>
    %cst_63 = arith.constant 0.000000e+00 : f32
    %455 = vector.broadcast %cst_63 : f32 to vector<4x256xf32>
    %456 = arith.select %454, %453, %455 : vector<4x256xi1>, vector<4x256xf32>
    %c39 = arith.constant 39 : index
    %457 = memref.load %arg1[%c39] : memref<98xf32, #tpu.memory_space<smem>>
    %c88 = arith.constant 88 : index
    %458 = memref.load %arg1[%c88] : memref<98xf32, #tpu.memory_space<smem>>
    %459 = vector.broadcast %457 : f32 to vector<4x256xf32>
    %460 = vector.broadcast %458 : f32 to vector<4x256xf32>
    %461 = arith.select %15, %459, %460 : vector<4x256xi1>, vector<4x256xf32>
    %462 = arith.mulf %461, %456 : vector<4x256xf32>
    %463 = arith.addf %452, %462 : vector<4x256xf32>
    %c222_i32 = arith.constant 222 : i32
    %464 = tpu.dynamic_rotate %7 by %c222_i32 dim 1 : vector<4x256xf32>, i32 -> vector<4x256xf32>
    %465 = arith.andi %409, %25 : vector<4x256xi1>
    %cst_64 = arith.constant 0.000000e+00 : f32
    %466 = vector.broadcast %cst_64 : f32 to vector<4x256xf32>
    %467 = arith.select %465, %464, %466 : vector<4x256xi1>, vector<4x256xf32>
    %c40 = arith.constant 40 : index
    %468 = memref.load %arg1[%c40] : memref<98xf32, #tpu.memory_space<smem>>
    %c89 = arith.constant 89 : index
    %469 = memref.load %arg1[%c89] : memref<98xf32, #tpu.memory_space<smem>>
    %470 = vector.broadcast %468 : f32 to vector<4x256xf32>
    %471 = vector.broadcast %469 : f32 to vector<4x256xf32>
    %472 = arith.select %15, %470, %471 : vector<4x256xi1>, vector<4x256xf32>
    %473 = arith.mulf %472, %467 : vector<4x256xf32>
    %474 = arith.addf %463, %473 : vector<4x256xf32>
    %c221_i32 = arith.constant 221 : i32
    %475 = tpu.dynamic_rotate %7 by %c221_i32 dim 1 : vector<4x256xf32>, i32 -> vector<4x256xf32>
    %476 = arith.andi %409, %27 : vector<4x256xi1>
    %cst_65 = arith.constant 0.000000e+00 : f32
    %477 = vector.broadcast %cst_65 : f32 to vector<4x256xf32>
    %478 = arith.select %476, %475, %477 : vector<4x256xi1>, vector<4x256xf32>
    %c41 = arith.constant 41 : index
    %479 = memref.load %arg1[%c41] : memref<98xf32, #tpu.memory_space<smem>>
    %c90 = arith.constant 90 : index
    %480 = memref.load %arg1[%c90] : memref<98xf32, #tpu.memory_space<smem>>
    %481 = vector.broadcast %479 : f32 to vector<4x256xf32>
    %482 = vector.broadcast %480 : f32 to vector<4x256xf32>
    %483 = arith.select %15, %481, %482 : vector<4x256xi1>, vector<4x256xf32>
    %484 = arith.mulf %483, %478 : vector<4x256xf32>
    %485 = arith.addf %474, %484 : vector<4x256xf32>
    %c13_i32_66 = arith.constant 13 : i32
    %486 = vector.broadcast %c13_i32_66 : i32 to vector<4x256xi32>
    %487 = arith.cmpi slt, %10, %486 : vector<4x256xi32>
    %c211_i32 = arith.constant 211 : i32
    %488 = tpu.dynamic_rotate %7 by %c211_i32 dim 1 : vector<4x256xf32>, i32 -> vector<4x256xf32>
    %489 = arith.andi %487, %17 : vector<4x256xi1>
    %cst_67 = arith.constant 0.000000e+00 : f32
    %490 = vector.broadcast %cst_67 : f32 to vector<4x256xf32>
    %491 = arith.select %489, %488, %490 : vector<4x256xi1>, vector<4x256xf32>
    %c42 = arith.constant 42 : index
    %492 = memref.load %arg1[%c42] : memref<98xf32, #tpu.memory_space<smem>>
    %c91 = arith.constant 91 : index
    %493 = memref.load %arg1[%c91] : memref<98xf32, #tpu.memory_space<smem>>
    %494 = vector.broadcast %492 : f32 to vector<4x256xf32>
    %495 = vector.broadcast %493 : f32 to vector<4x256xf32>
    %496 = arith.select %15, %494, %495 : vector<4x256xi1>, vector<4x256xf32>
    %497 = arith.mulf %496, %491 : vector<4x256xf32>
    %498 = arith.addf %485, %497 : vector<4x256xf32>
    %c210_i32 = arith.constant 210 : i32
    %499 = tpu.dynamic_rotate %7 by %c210_i32 dim 1 : vector<4x256xf32>, i32 -> vector<4x256xf32>
    %500 = arith.andi %487, %19 : vector<4x256xi1>
    %cst_68 = arith.constant 0.000000e+00 : f32
    %501 = vector.broadcast %cst_68 : f32 to vector<4x256xf32>
    %502 = arith.select %500, %499, %501 : vector<4x256xi1>, vector<4x256xf32>
    %c43 = arith.constant 43 : index
    %503 = memref.load %arg1[%c43] : memref<98xf32, #tpu.memory_space<smem>>
    %c92 = arith.constant 92 : index
    %504 = memref.load %arg1[%c92] : memref<98xf32, #tpu.memory_space<smem>>
    %505 = vector.broadcast %503 : f32 to vector<4x256xf32>
    %506 = vector.broadcast %504 : f32 to vector<4x256xf32>
    %507 = arith.select %15, %505, %506 : vector<4x256xi1>, vector<4x256xf32>
    %508 = arith.mulf %507, %502 : vector<4x256xf32>
    %509 = arith.addf %498, %508 : vector<4x256xf32>
    %c209_i32 = arith.constant 209 : i32
    %510 = tpu.dynamic_rotate %7 by %c209_i32 dim 1 : vector<4x256xf32>, i32 -> vector<4x256xf32>
    %511 = arith.andi %487, %21 : vector<4x256xi1>
    %cst_69 = arith.constant 0.000000e+00 : f32
    %512 = vector.broadcast %cst_69 : f32 to vector<4x256xf32>
    %513 = arith.select %511, %510, %512 : vector<4x256xi1>, vector<4x256xf32>
    %c44 = arith.constant 44 : index
    %514 = memref.load %arg1[%c44] : memref<98xf32, #tpu.memory_space<smem>>
    %c93 = arith.constant 93 : index
    %515 = memref.load %arg1[%c93] : memref<98xf32, #tpu.memory_space<smem>>
    %516 = vector.broadcast %514 : f32 to vector<4x256xf32>
    %517 = vector.broadcast %515 : f32 to vector<4x256xf32>
    %518 = arith.select %15, %516, %517 : vector<4x256xi1>, vector<4x256xf32>
    %519 = arith.mulf %518, %513 : vector<4x256xf32>
    %520 = arith.addf %509, %519 : vector<4x256xf32>
    %c208_i32 = arith.constant 208 : i32
    %521 = tpu.dynamic_rotate %7 by %c208_i32 dim 1 : vector<4x256xf32>, i32 -> vector<4x256xf32>
    %cst_70 = arith.constant 0.000000e+00 : f32
    %522 = vector.broadcast %cst_70 : f32 to vector<4x256xf32>
    %523 = arith.select %487, %521, %522 : vector<4x256xi1>, vector<4x256xf32>
    %c45 = arith.constant 45 : index
    %524 = memref.load %arg1[%c45] : memref<98xf32, #tpu.memory_space<smem>>
    %c94 = arith.constant 94 : index
    %525 = memref.load %arg1[%c94] : memref<98xf32, #tpu.memory_space<smem>>
    %526 = vector.broadcast %524 : f32 to vector<4x256xf32>
    %527 = vector.broadcast %525 : f32 to vector<4x256xf32>
    %528 = arith.select %15, %526, %527 : vector<4x256xi1>, vector<4x256xf32>
    %529 = arith.mulf %528, %523 : vector<4x256xf32>
    %530 = arith.addf %520, %529 : vector<4x256xf32>
    %c207_i32 = arith.constant 207 : i32
    %531 = tpu.dynamic_rotate %7 by %c207_i32 dim 1 : vector<4x256xf32>, i32 -> vector<4x256xf32>
    %532 = arith.andi %487, %23 : vector<4x256xi1>
    %cst_71 = arith.constant 0.000000e+00 : f32
    %533 = vector.broadcast %cst_71 : f32 to vector<4x256xf32>
    %534 = arith.select %532, %531, %533 : vector<4x256xi1>, vector<4x256xf32>
    %c46 = arith.constant 46 : index
    %535 = memref.load %arg1[%c46] : memref<98xf32, #tpu.memory_space<smem>>
    %c95 = arith.constant 95 : index
    %536 = memref.load %arg1[%c95] : memref<98xf32, #tpu.memory_space<smem>>
    %537 = vector.broadcast %535 : f32 to vector<4x256xf32>
    %538 = vector.broadcast %536 : f32 to vector<4x256xf32>
    %539 = arith.select %15, %537, %538 : vector<4x256xi1>, vector<4x256xf32>
    %540 = arith.mulf %539, %534 : vector<4x256xf32>
    %541 = arith.addf %530, %540 : vector<4x256xf32>
    %c206_i32 = arith.constant 206 : i32
    %542 = tpu.dynamic_rotate %7 by %c206_i32 dim 1 : vector<4x256xf32>, i32 -> vector<4x256xf32>
    %543 = arith.andi %487, %25 : vector<4x256xi1>
    %cst_72 = arith.constant 0.000000e+00 : f32
    %544 = vector.broadcast %cst_72 : f32 to vector<4x256xf32>
    %545 = arith.select %543, %542, %544 : vector<4x256xi1>, vector<4x256xf32>
    %c47 = arith.constant 47 : index
    %546 = memref.load %arg1[%c47] : memref<98xf32, #tpu.memory_space<smem>>
    %c96 = arith.constant 96 : index
    %547 = memref.load %arg1[%c96] : memref<98xf32, #tpu.memory_space<smem>>
    %548 = vector.broadcast %546 : f32 to vector<4x256xf32>
    %549 = vector.broadcast %547 : f32 to vector<4x256xf32>
    %550 = arith.select %15, %548, %549 : vector<4x256xi1>, vector<4x256xf32>
    %551 = arith.mulf %550, %545 : vector<4x256xf32>
    %552 = arith.addf %541, %551 : vector<4x256xf32>
    %c205_i32 = arith.constant 205 : i32
    %553 = tpu.dynamic_rotate %7 by %c205_i32 dim 1 : vector<4x256xf32>, i32 -> vector<4x256xf32>
    %554 = arith.andi %487, %27 : vector<4x256xi1>
    %cst_73 = arith.constant 0.000000e+00 : f32
    %555 = vector.broadcast %cst_73 : f32 to vector<4x256xf32>
    %556 = arith.select %554, %553, %555 : vector<4x256xi1>, vector<4x256xf32>
    %c48 = arith.constant 48 : index
    %557 = memref.load %arg1[%c48] : memref<98xf32, #tpu.memory_space<smem>>
    %c97 = arith.constant 97 : index
    %558 = memref.load %arg1[%c97] : memref<98xf32, #tpu.memory_space<smem>>
    %559 = vector.broadcast %557 : f32 to vector<4x256xf32>
    %560 = vector.broadcast %558 : f32 to vector<4x256xf32>
    %561 = arith.select %15, %559, %560 : vector<4x256xi1>, vector<4x256xf32>
    %562 = arith.mulf %561, %556 : vector<4x256xf32>
    %563 = arith.addf %552, %562 : vector<4x256xf32>
    %564 = vector.extract_strided_slice %563 {offsets = [0, 0], sizes = [2, 256], strides = [1, 1]} : vector<4x256xf32> to vector<2x256xf32>
    %565 = vector.extract_strided_slice %563 {offsets = [2, 0], sizes = [2, 256], strides = [1, 1]} : vector<4x256xf32> to vector<2x256xf32>
    %566 = arith.addf %564, %565 : vector<2x256xf32>
    %cst_74 = arith.constant 0.000000e+00 : f32
    %567 = vector.broadcast %cst_74 : f32 to vector<2x256xf32>
    %568 = arith.subf %567, %566 : vector<2x256xf32>
    %569 = math.exp %568 : vector<2x256xf32>
    %cst_75 = arith.constant 1.000000e+00 : f32
    %570 = vector.broadcast %cst_75 : f32 to vector<2x256xf32>
    %571 = arith.addf %570, %569 : vector<2x256xf32>
    %572 = tpu.reciprocal %571 : vector<2x256xf32> -> vector<2x256xf32>
    %c0_76 = arith.constant 0 : index
    %c0_77 = arith.constant 0 : index
    %c0_78 = arith.constant 0 : index
    %573 = vector.load %arg2[%c0_76, %c0_77, %c0_78] : memref<2x32x256xf32, #tpu.memory_space<vmem>>, vector<2x32x256xf32>
    %574 = vector.shape_cast %572 : vector<2x256xf32> to vector<2x1x256xf32>
    %575 = vector.broadcast %574 : vector<2x1x256xf32> to vector<2x32x256xf32>
    %576 = arith.mulf %573, %575 : vector<2x32x256xf32>
    %c0_79 = arith.constant 0 : index
    %c0_80 = arith.constant 0 : index
    %c0_81 = arith.constant 0 : index
    %577 = vector.load %arg3[%c0_79, %c0_80, %c0_81] : memref<2x32x256xf32, #tpu.memory_space<vmem>>, vector<2x32x256xf32>
    tpu.vector_store %arg3[%c0_79, %c0_80, %c0_81], %576 {strides = array<i32>} : memref<2x32x256xf32, #tpu.memory_space<vmem>>, vector<2x32x256xf32>,
    return
  }
  func.func @transform_0(%arg0: i32, %arg1: memref<98xf32, #tpu.memory_space<smem>>) -> (i32, i32, i32) {
    %c0_i32 = arith.constant 0 : i32
    %c0_i32_0 = arith.constant 0 : i32
    %c0_i32_1 = arith.constant 0 : i32
    return %arg0, %c0_i32, %c0_i32_0 : i32, i32, i32
  }
  func.func @transform_1(%arg0: i32, %arg1: memref<98xf32, #tpu.memory_space<smem>>) -> (i32, i32, i32) {
    %c0_i32 = arith.constant 0 : i32
    %c0_i32_0 = arith.constant 0 : i32
    %c0_i32_1 = arith.constant 0 : i32
    return %arg0, %c0_i32, %c0_i32_0 : i32, i32, i32
  }
}

</mosaic_0001>

<bundles_post_ra>
// kernel: tpu_custom_call.1
= control target key start
LH: loop header
LB: loop body
LE: loop exit
PB: predicated region body
PF: predicated region fallthrough
CT: control target
= control target key end

     0   :  { %s1733_s12 = smov [#allocation4]   ;;  %s3074_s0 = inlined_call_operand.hbm [shape: f32[98], index: 0, kind: input, shape index: {}]   ;;  %s3075_s1 = inlined_call_operand.hbm [shape: f32[2,32,256], index: 1, kind: input, shape index: {}]   ;;  %s3076_s2 = inlined_call_operand.hbm [shape: f32[2,32,256], index: 2, kind: output, shape index: {}]  }
   0x1   :  { %s8_s11 = sshll.u32 %s3074_s0, 4  ;;  %s9_s11 = int_to_ptr.hbm [resolvable:$true] %s8_s11 }
   0x2   :  { %11 = dma.hbm_to_smem %s9_s11, 16, %s1733_s12, [#allocation3] }
   0x3   :  { %1727 = dma.done.wait [#allocation3], 16 }
   0x4   :  { %1728 = vsyncadd [#allocation3], 4294967280 }
   0x5   :  { %14 = sfence }
   0x6   :  { %15 = vsyncpa [#allocation6], 0 }
   0x7   :  { %16 = vsyncpa [#allocation7], 0  ;;  %s21_s15 = sshll.u32 %s3075_s1, 4  ;;  %s1734_s16 = smov [#allocation5]   ;;  %s22_s15 = int_to_ptr.hbm [resolvable:$true] %s21_s15 }
   0x8   :  { %s23_s17 = sshll.u32 %s1734_s16, 4  ;;  %s1735_s18 = smov 256   ;;  %s24_s17 = int_to_ptr.vmem [resolvable:$true] %s23_s17 }
   0x9   :  { %s1736_s19 = smov 16  }
   0xa   :  { %29 = dma.hbm_to_vmem [thread:$0]  %s22_s15, 2048, %s24_s17, [#allocation6], %s1735_s18, %s1735_s18, %s1736_s19  }
   0xb   :  { %1729 = dma.done.wait [#allocation6], 2048  }
   0xc   :  { %1730 = vsyncadd [#allocation6], 4294965248  ;;  %v34_v0 = vld [vmem:[#allocation5] sm:$0xff]  ;;  %v35_v1 = vld [vmem:[#allocation5 + $0x8] sm:$0xff]  ;;  %vm96_vm0 = vcmask 1043456   ;;  %vm3077_vm1 = vcmask 1041409  }
   0xd   :  { %v36_v2 = vld [vmem:[#allocation5 + $0x10] sm:$0xff]  ;;  %v37_v3 = vld [vmem:[#allocation5 + $0x18] sm:$0xff]  ;;  %v38_v4 = vld [vmem:[#allocation5 + $0x20] sm:$0xff]  ;;  %vm152_vm2 = vcmask 1043459   ;;  %vm154_vm3 = vcmask 1047559   ;;  %vm102_vm4 = vcmask 1045509  }
   0xe   :  { %v39_v5 = vld [vmem:[#allocation5 + $0x28] sm:$0xff]  ;;  %v50_v6 = vadd.f32 %v36_v2, %v34_v0  ;;  %v106_v7 = vmax.f32 %v34_v0, %v36_v2  ;;  %v40_v8 = vld [vmem:[#allocation5 + $0x30] sm:$0xff]  ;;  %v41_v9 = vld [vmem:[#allocation5 + $0x38] sm:$0xff]  ;;  %v59_v11 = vadd.f32 %v37_v3, %v35_v1  ;;  %v115_v12 = vmax.f32 %v35_v1, %v37_v3  ;;  %s1737_s0 = smov 51   ;;  %s1738_s1 = smov 50  }
   0xf   :  { %v42_v10 = vld [vmem:[#allocation5 + $0x40] sm:$0xff]  ;;  %v43_v13 = vld [vmem:[#allocation5 + $0x48] sm:$0xff]  ;;  %v44_v14 = vld [vmem:[#allocation5 + $0x50] sm:$0xff]  ;;  %s1739_s20 = smov 49   ;;  %s1740_s21 = smov 48  }
  0x10   :  { %v45_v15 = vld [vmem:[#allocation5 + $0x58] sm:$0xff]  ;;  %v51_v16 = vadd.f32 %v50_v6, %v38_v4  ;;  %v107_v17 = vmax.f32 %v106_v7, %v38_v4  ;;  %v46_v18 = vld [vmem:[#allocation5 + $0x60] sm:$0xff]  ;;  %v47_v19 = vld [vmem:[#allocation5 + $0x68] sm:$0xff]  ;;  %v60_v20 = vadd.f32 %v59_v11, %v39_v5  ;;  %v68_v21 = vadd.f32 %v44_v14, %v42_v10  ;;  %s1741_s22 = smov 47   ;;  %s1742_s23 = smov 46  }
  0x11   :  { %v77_v22 = vadd.f32 %v45_v15, %v43_v13  ;;  %v116_v23 = vmax.f32 %v115_v12, %v39_v5  ;;  %v48_v24 = vld [vmem:[#allocation5 + $0x70] sm:$0xff]  ;;  %v49_v25 = vld [vmem:[#allocation5 + $0x78] sm:$0xff]  ;;  %v124_v28 = vmax.f32 %v42_v10, %v44_v14  ;;  %v133_v29 = vmax.f32 %v43_v13, %v45_v15  ;;  %s1743_s24 = smov 45   ;;  %s1744_s25 = smov 35  }
  0x12   :  { %v52_v26 = vadd.f32 %v51_v16, %v40_v8  ;;  %v108_v27 = vmax.f32 %v107_v17, %v40_v8  ;;  %v61_v30 = vadd.f32 %v60_v20, %v41_v9  ;;  %v69_v31 = vadd.f32 %v68_v21, %v46_v18  ;;  %s1745_s26 = smov 34   ;;  %s1746_s27 = smov 33  }
  0x13   :  { %v78_v32 = vadd.f32 %v77_v22, %v47_v19  ;;  %v117_v33 = vmax.f32 %v116_v23, %v41_v9  ;;  %v125_v36 = vmax.f32 %v124_v28, %v46_v18  ;;  %v134_v37 = vmax.f32 %v133_v29, %v47_v19  ;;  %s1747_s28 = smov 32   ;;  %s1748_s29 = smov 31  }
  0x14   :  { %v53_v34 = vrot.slane %v52_v26, 4  ;;  %v109_v35 = vrot.slane %v108_v27, 4  ;;  %v62_v38 = vrot.slane %v61_v30, 4  ;;  %v70_v39 = vadd.f32 %v69_v31, %v48_v24  ;;  %s1749_s30 = smov 30   ;;  %s1750_s3 = smov 29  }
  0x15   :  { %v79_v40 = vadd.f32 %v78_v32, %v49_v25  ;;  %v118_v41 = vrot.slane %v117_v33, 4  ;;  %v126_v44 = vmax.f32 %v125_v36, %v48_v24  ;;  %v135_v45 = vmax.f32 %v134_v37, %v49_v25  ;;  %s1751_s4 = smov 19   ;;  %s1752_s5 = smov 18  }
  0x16   :  { %v54_v42 = vadd.f32 %v53_v34, %v52_v26  ;;  %v110_v43 = vmax.f32 %v108_v27, %v109_v35  ;;  %v63_v46 = vadd.f32 %v62_v38, %v61_v30  ;;  %v71_v47 = vrot.slane %v70_v39, 4  ;;  %s1753_s6 = smov 17   ;;  %s200_s7 = sld [smem:[#allocation4]] }
  0x17   :  { %v80_v48 = vrot.slane %v79_v40, 4  ;;  %v119_v49 = vmax.f32 %v117_v33, %v118_v41  ;;  %v127_v52 = vrot.slane %v126_v44, 4  ;;  %v136_v53 = vrot.slane %v135_v45, 4  ;;  %s1510_s8 = sld [smem:[#allocation4 + $0x31]]  ;;  %s1754_s11 = smov 15  }
  0x18   :  { %v55_v50 = vrot.slane %v54_v42, 2  ;;  %v111_v51 = vrot.slane %v110_v43, 2  ;;  %v64_v54 = vrot.slane %v63_v46, 2  ;;  %v72_v55 = vadd.f32 %v71_v47, %v70_v39  ;;  %s1837_s9 = sld [smem:[#allocation4 + $0x1]]  ;;  %s1755_s14 = smov 14  }
  0x19   :  { %v81_v56 = vadd.f32 %v80_v48, %v79_v40  ;;  %v120_v57 = vrot.slane %v119_v49, 2  ;;  %v128_v60 = vmax.f32 %v126_v44, %v127_v52  ;;  %v137_v61 = vmax.f32 %v135_v45, %v136_v53  ;;  %s1839_s10 = sld [smem:[#allocation4 + $0x32]] }
  0x1a   :  { %v56_v58 = vadd.f32 %v55_v50, %v54_v42  ;;  %v112_v59 = vmax.f32 %v110_v43, %v111_v51  ;;  %v65_v62 = vadd.f32 %v64_v54, %v63_v46  ;;  %v73_v63 = vrot.slane %v72_v55, 2  ;;  %s1862_s12 = sld [smem:[#allocation4 + $0x2]] }
  0x1b   :  { %v82_v0 = vrot.slane %v81_v56, 2  ;;  %v121_v1 = vmax.f32 %v119_v49, %v120_v57  ;;  %v129_v4 = vrot.slane %v128_v60, 2  ;;  %v138_v5 = vrot.slane %v137_v61, 2  ;;  %s1870_s13 = sld [smem:[#allocation4 + $0x33]] }
  0x1c   :  { %v57_v2 = vrot.slane %v56_v58, 1  ;;  %v113_v3 = vrot.slane %v112_v59, 1  ;;  %v66_v6 = vrot.slane %v65_v62, 1  ;;  %v74_v7 = vadd.f32 %v73_v63, %v72_v55  ;;  %s1893_s15 = sld [smem:[#allocation4 + $0x3]] }
  0x1d   :  { %v83_v8 = vadd.f32 %v82_v0, %v81_v56  ;;  %v122_v9 = vrot.slane %v121_v1, 1  ;;  %v130_v12 = vmax.f32 %v128_v60, %v129_v4  ;;  %v139_v13 = vmax.f32 %v137_v61, %v138_v5  ;;  %s1899_s16 = sld [smem:[#allocation4 + $0x34]] }
  0x1e   :  { %v58_v10 = vadd.f32 %v57_v2, %v56_v58  ;;  %v114_v11 = vmax.f32 %v112_v59, %v113_v3  ;;  %v67_v14 = vadd.f32 %v66_v6, %v65_v62  ;;  %v75_v15 = vrot.slane %v74_v7, 1  ;;  %s1905_s17 = sld [smem:[#allocation4 + $0x4]] }
  0x1f   :  { %v84_v16 = vrot.slane %v83_v8, 1  ;;  %v123_v17 = vmax.f32 %v121_v1, %v122_v9  ;;  %v131_v18 = vrot.slane %v130_v12, 1  ;;  %v140_v19 = vrot.slane %v139_v13, 1 }
  0x20   :  { %v76_v20 = vadd.f32 %v75_v15, %v74_v7  ;;  %v87_v22 = vmul.f32 0.03125, %v67_v14  ;;  %v86_v24 = vmul.f32 0.03125, %v58_v10 }
  0x21   :  { %v85_v21 = vadd.f32 %v84_v16, %v83_v8  ;;  %v146_v23 = vrot.slane %v123_v17, 4  ;;  %v132_v25 = vmax.f32 %v130_v12, %v131_v18  ;;  %v141_v26 = vmax.f32 %v139_v13, %v140_v19 }
  0x22   :  { %v88_v27 = vmul.f32 0.03125, %v76_v20  ;;  %v94_v29 = vrot.slane %v87_v22, 4  ;;  %v159_v20 = vlaneseq }
  0x23   :  { %v89_v28 = vmul.f32 0.03125, %v85_v21  ;;  %v148_v30 = vsel %vm96_vm0, %v114_v11, %v146_v23  ;;  %v147_v31 = vrot.slane %v141_v26, 4  ;;  %v203_v26 = vstv %s1510_s8  ;;  %s2090_s8 = sld [smem:[#allocation4 + $0x3c]] }
  0x24   :  { %v150_v33 = vrot.slane %v148_v30, 6  ;;  %v97_v35 = vsel %vm96_vm0, %v86_v24, %v94_v29  ;;  %v1844_v23 = vand.u32 127, %v159_v20  ;;  %v1846_v24 = vshrl.u32 %v159_v20, 7 }
  0x25   :  { %v95_v32 = vrot.slane %v89_v28, 4  ;;  %v149_v34 = vsel %vm96_vm0, %v132_v25, %v147_v31  ;;  %v202_v25 = vstv %s200_s7  ;;  %v300_v20 = vstv %s1905_s17  ;;  %s2088_s7 = sld [smem:[#allocation4 + $0xb]]  ;;  %s1762_s17 = smov 125  }
  0x26   :  { %v151_v37 = vrot.slane %v149_v34, 5  ;;  %v161_v28 = vadd.s32 128, %v1844_v23  ;;  %v1851_v29 = vshra.s32 %v1844_v23, 4  ;;  %v1854_v30 = vand.u32 15, %v1844_v23 }
  0x27   :  { %v98_v36 = vsel %vm96_vm0, %v88_v27, %v95_v32  ;;  %v227_v27 = vstv %s1837_s9  ;;  %vm168_vm5 = vcmp.lt.s32.totalorder %v1846_v24, 2  ;;  %vm193_vm6 = vcmp.lt.s32.totalorder %v1844_v23, 51  ;;  %s2092_s9 = sld [smem:[#allocation4 + $0xc]] }
  0x28   :  { %v99_v38 = vrot.slane %v98_v36, 7  ;;  %v153_v39 = vsel %vm152_vm2, %v151_v37, %v150_v33  ;;  %v204_v31 = vsel %vm168_vm5, %v202_v25, %v203_v26  ;;  %vm218_vm7 = vcmp.lt.s32.totalorder %v1844_v23, 50 }
  0x29   :  { %v155_v41 = vsel %vm154_vm3, %v151_v37, %v153_v39  ;;  %v228_v32 = vstv %s1839_s10  ;;  %v1864_v33 = vshra.s32 %v161_v28, 4  ;;  %v1866_v34 = vand.u32 15, %v161_v28  ;;  %s2094_s10 = sld [smem:[#allocation4 + $0x3d]] }
  0x2a   :  { %v101_v40 = vsel %vm3077_vm1, %v99_v38, %v97_v35  ;;  %157 = vst [vmem:[#allocation2] sm:$0xcc] %v155_v41  ;;  %vm169_vm8 = vcmp.ge.s32.totalorder %v1854_v30, 3  ;;  %vm181_vm9 = vcmp.ge.s32.totalorder %v1851_v29, 3  ;;  %vm171_vm13 = vcmp.ge.s32.totalorder %v1854_v30, 2 }
  0x2b   :  { %v103_v42 = vsel %vm102_vm4, %v99_v38, %v101_v40  ;;  %vm1876_vm10 = vmand %vm181_vm9, %vm169_vm8  ;;  %vm170_vm11 = vcmp.ge.s32.totalorder %v1866_v34, 3  ;;  %vm182_vm12 = vcmp.ge.s32.totalorder %v1864_v33, 3  ;;  %vm3085_vm15 = vcmp.ge.s32.totalorder %v1866_v34, 2 }
  0x2c   :  { %105 = vst [vmem:[#allocation2] sm:$0x33] %v103_v42  ;;  %vm197_vm14 = vmand %vm182_vm12, %vm170_vm11  ;;  %vm3084_vm3 = vcmp.ge.s32.totalorder %v1854_v30, 1  ;;  %vm3083_vm4 = vcmp.ge.s32.totalorder %v1866_v34, 1  ;;  %vm316_vm1 = vcmp.lt.s32.totalorder %v1844_v23, 46 }
  0x2d   :  { %vm221_vm0 = vmand %vm181_vm9, %vm171_vm13 }
  0x2e   :  { %vm222_vm2 = vmand %vm182_vm12, %vm3085_vm15 }
  0x33   :  { %v1814_v43 = vld [vmem:[#allocation2] sm:$0xff] }
  0x34   :  { %184 = vst [vmem:[#allocation1] ss:$2 sm:$0xff] %v1814_v43 }
  0x3b   :  { %v185_v44 = vld.sshfl [vmem:[#allocation1] sm:$0xff pattern:$0x75316420]  ;;  %v186_v45 = vld.sshfl [vmem:[#allocation1 + $0x8] sm:$0xff pattern:$0x75316420] }
  0x3c   :  { %189 = vrot.lane.b32.xlu0 %v185_v44, %s1737_s0  ;;  %209 = vst [vmem:[#allocation1] ss:$2 sm:$0xff] %v1814_v43 }
  0x43   :  { %v210_v46 = vld.sshfl [vmem:[#allocation1] sm:$0xff pattern:$0x75316420]  ;;  %v211_v47 = vld.sshfl [vmem:[#allocation1 + $0x8] sm:$0xff pattern:$0x75316420] }
  0x44   :  { %214 = vrot.lane.b32.xlu1 %v210_v46, %s1738_s1  ;;  %191 = vrot.lane.b32.xlu0 %v186_v45, %s1737_s0  ;;  %234 = vst [vmem:[#allocation1] ss:$2 sm:$0xff] %v1814_v43  ;;  %v229_v45 = vsel %vm168_vm5, %v227_v27, %v228_v32  ;;  %s1907_s0 = sld [smem:[#allocation4 + $0x35]] }
  0x4a   :  { %v301_v25 = vstv %s1907_s0  ;;  %s2162_s0 = sld [smem:[#allocation4 + $0xf]] }
  0x4b   :  { %v235_v48 = vld.sshfl [vmem:[#allocation1] sm:$0xff pattern:$0x75316420]  ;;  %v236_v49 = vld.sshfl [vmem:[#allocation1 + $0x8] sm:$0xff pattern:$0x75316420]  ;;  %v302_v32 = vsel %vm168_vm5, %v300_v20, %v301_v25 }
  0x4c   :  { %216 = vrot.lane.b32.xlu1 %v211_v47, %s1738_s1  ;;  %259 = vst [vmem:[#allocation1] ss:$2 sm:$0xff] %v1814_v43  ;;  %239 = vrot.lane.b32.xlu2 %v235_v48, %s1739_s20  ;;  %s1756_s1 = smov 13  }
  0x53   :  { %v260_v50 = vld.sshfl [vmem:[#allocation1] sm:$0xff pattern:$0x75316420]  ;;  %v261_v51 = vld.sshfl [vmem:[#allocation1 + $0x8] sm:$0xff pattern:$0x75316420] }
  0x54   :  { %264 = vrot.lane.b32.xlu0 %v260_v50, %s1740_s21  ;;  %266 = vrot.lane.b32.xlu1 %v261_v51, %s1740_s21  ;;  %282 = vst [vmem:[#allocation1] ss:$2 sm:$0xff] %v1814_v43  ;;  %s1934_s21 = sld [smem:[#allocation4 + $0x36]] }
  0x55   :  { %241 = vrot.lane.b32.xlu2 %v236_v49, %s1739_s20  ;;  %s1930_s20 = sld [smem:[#allocation4 + $0x5]] }
  0x5b   :  { %v284_v52 = vld.sshfl [vmem:[#allocation1 + $0x8] sm:$0xff pattern:$0x75316420]  ;;  %v283_v53 = vld.sshfl [vmem:[#allocation1] sm:$0xff pattern:$0x75316420] }
  0x5c   :  { %289 = vrot.lane.b32.xlu0 %v284_v52, %s1741_s22  ;;  %307 = vst [vmem:[#allocation1] ss:$2 sm:$0xff] %v1814_v43 }
  0x5d   :  { %287 = vrot.lane.b32.xlu2 %v283_v53, %s1741_s22  ;;  %s1950_s22 = sld [smem:[#allocation4 + $0x6]] }
  0x63   :  { %v308_v54 = vld.sshfl [vmem:[#allocation1] sm:$0xff pattern:$0x75316420]  ;;  %v309_v55 = vld.sshfl [vmem:[#allocation1 + $0x8] sm:$0xff pattern:$0x75316420] }
  0x64   :  { %312 = vrot.lane.b32.xlu1 %v308_v54, %s1742_s23  ;;  %332 = vst [vmem:[#allocation1] ss:$2 sm:$0xff] %v1814_v43 }
  0x65   :  { %314 = vrot.lane.b32.xlu2 %v309_v55, %s1742_s23  ;;  %s1962_s23 = sld [smem:[#allocation4 + $0x37]] }
  0x6b   :  { %v333_v56 = vld.sshfl [vmem:[#allocation1] sm:$0xff pattern:$0x75316420]  ;;  %v334_v57 = vld.sshfl [vmem:[#allocation1 + $0x8] sm:$0xff pattern:$0x75316420] }
  0x6c   :  { %337 = vrot.lane.b32.xlu0 %v333_v56, %s1743_s24  ;;  %339 = vrot.lane.b32.xlu1 %v334_v57, %s1743_s24  ;;  %359 = vst [vmem:[#allocation1] ss:$2 sm:$0xff] %v1814_v43  ;;  %s1757_s24 = smov 3  }
  0x73   :  { %v361_v58 = vld.sshfl [vmem:[#allocation1 + $0x8] sm:$0xff pattern:$0x75316420]  ;;  %v360_v59 = vld.sshfl [vmem:[#allocation1] sm:$0xff pattern:$0x75316420] }
  0x74   :  { %366 = vrot.lane.b32.xlu0 %v361_v58, %s1744_s25  ;;  %384 = vst [vmem:[#allocation1] ss:$2 sm:$0xff] %v1814_v43  ;;  %364 = vrot.lane.b32.xlu2 %v360_v59, %s1744_s25  ;;  %v252_v59 = vstv %s1862_s12  ;;  %s1968_s25 = sld [smem:[#allocation4 + $0x7]] }
  0x75   :  { %s2106_s12 = sld [smem:[#allocation4 + $0xd]] }
  0x7b   :  { %v385_v60 = vld.sshfl [vmem:[#allocation1] sm:$0xff pattern:$0x75316420]  ;;  %v386_v61 = vld.sshfl [vmem:[#allocation1 + $0x8] sm:$0xff pattern:$0x75316420] }
  0x7c   :  { %389 = vrot.lane.b32.xlu1 %v385_v60, %s1745_s26  ;;  %409 = vst [vmem:[#allocation1] ss:$2 sm:$0xff] %v1814_v43  ;;  %391 = vrot.lane.b32.xlu2 %v386_v61, %s1745_s26  ;;  %v253_v61 = vstv %s1870_s13  ;;  %s1976_s26 = sld [smem:[#allocation4 + $0x38]] }
  0x7d   :  { %s2108_s13 = sld [smem:[#allocation4 + $0x3e]] }
  0x83   :  { %v410_v62 = vld.sshfl [vmem:[#allocation1] sm:$0xff pattern:$0x75316420]  ;;  %v411_v63 = vld.sshfl [vmem:[#allocation1 + $0x8] sm:$0xff pattern:$0x75316420] }
  0x84   :  { %414 = vrot.lane.b32.xlu0 %v410_v62, %s1746_s27  ;;  %416 = vrot.lane.b32.xlu1 %v411_v63, %s1746_s27  ;;  %434 = vst [vmem:[#allocation1] ss:$2 sm:$0xff] %v1814_v43  ;;  %s1993_s27 = sld [smem:[#allocation4 + $0x8]] }
  0x8b   :  { %v436_v0 = vld.sshfl [vmem:[#allocation1 + $0x8] sm:$0xff pattern:$0x75316420]  ;;  %v435_v1 = vld.sshfl [vmem:[#allocation1] sm:$0xff pattern:$0x75316420] }
  0x8c   :  { %441 = vrot.lane.b32.xlu0 %v436_v0, %s1747_s28  ;;  %457 = vst [vmem:[#allocation1] ss:$2 sm:$0xff] %v1814_v43  ;;  %439 = vrot.lane.b32.xlu2 %v435_v1, %s1747_s28  ;;  %v254_v0 = vsel %vm168_vm5, %v252_v59, %v253_v61  ;;  %s2006_s28 = sld [smem:[#allocation4 + $0x39]] }
  0x93   :  { %v458_v2 = vld.sshfl [vmem:[#allocation1] sm:$0xff pattern:$0x75316420]  ;;  %v459_v3 = vld.sshfl [vmem:[#allocation1 + $0x8] sm:$0xff pattern:$0x75316420] }
  0x94   :  { %462 = vrot.lane.b32.xlu1 %v458_v2, %s1748_s29  ;;  %482 = vst [vmem:[#allocation1] ss:$2 sm:$0xff] %v1814_v43  ;;  %464 = vrot.lane.b32.xlu2 %v459_v3, %s1748_s29  ;;  %v275_v2 = vstv %s1893_s15  ;;  %v276_v3 = vstv %s1899_s16  ;;  %s1758_s29 = smov 2   ;;  %s2143_s15 = sld [smem:[#allocation4 + $0xe]] }
  0x95   :  { %s2145_s16 = sld [smem:[#allocation4 + $0x3f]] }
  0x9b   :  { %v483_v4 = vld.sshfl [vmem:[#allocation1] sm:$0xff pattern:$0x75316420]  ;;  %v484_v5 = vld.sshfl [vmem:[#allocation1 + $0x8] sm:$0xff pattern:$0x75316420] }
  0x9c   :  { %487 = vrot.lane.b32.xlu0 %v483_v4, %s1749_s30  ;;  %489 = vrot.lane.b32.xlu1 %v484_v5, %s1749_s30  ;;  %507 = vst [vmem:[#allocation1] ss:$2 sm:$0xff] %v1814_v43  ;;  %s2048_s30 = sld [smem:[#allocation4 + $0x9]] }
  0xa3   :  { %v509_v6 = vld.sshfl [vmem:[#allocation1 + $0x8] sm:$0xff pattern:$0x75316420]  ;;  %v508_v7 = vld.sshfl [vmem:[#allocation1] sm:$0xff pattern:$0x75316420] }
  0xa4   :  { %514 = vrot.lane.b32.xlu0 %v509_v6, %s1750_s3  ;;  %534 = vst [vmem:[#allocation1] ss:$2 sm:$0xff] %v1814_v43  ;;  %512 = vrot.lane.b32.xlu2 %v508_v7, %s1750_s3  ;;  %s2050_s3 = sld [smem:[#allocation4 + $0x3a]] }
  0xa6   :  { %v1842_v22 = vpop.permute.xlu2 %239 }
  0xab   :  { %v535_v8 = vld.sshfl [vmem:[#allocation1] sm:$0xff pattern:$0x75316420]  ;;  %v536_v9 = vld.sshfl [vmem:[#allocation1 + $0x8] sm:$0xff pattern:$0x75316420] }
  0xac   :  { %539 = vrot.lane.b32.xlu1 %v535_v8, %s1751_s4  ;;  %559 = vst [vmem:[#allocation1] ss:$2 sm:$0xff] %v1814_v43  ;;  %541 = vrot.lane.b32.xlu2 %v536_v9, %s1751_s4  ;;  %v277_v8 = vsel %vm168_vm5, %v275_v2, %v276_v3  ;;  %v377_v3 = vstv %s1968_s25  ;;  %s1759_s4 = smov 1   ;;  %s2201_s25 = sld [smem:[#allocation4 + $0x42]] }
  0xae   :  { %v190_v16 = vpop.permute.xlu0 %189 }
  0xaf   :  { %v242_v48 = vpop.permute.xlu2 %241 }
  0xb3   :  { %v560_v10 = vld.sshfl [vmem:[#allocation1] sm:$0xff pattern:$0x75316420]  ;;  %v561_v11 = vld.sshfl [vmem:[#allocation1 + $0x8] sm:$0xff pattern:$0x75316420] }
  0xb4   :  { %564 = vrot.lane.b32.xlu0 %v560_v10, %s1752_s5  ;;  %566 = vrot.lane.b32.xlu1 %v561_v11, %s1752_s5  ;;  %584 = vst [vmem:[#allocation1] ss:$2 sm:$0xff] %v1814_v43  ;;  %s2068_s5 = sld [smem:[#allocation4 + $0xa]] }
  0xb6   :  { %v215_v17 = vpop.permute.xlu1 %214  ;;  %v192_v21 = vpop.permute.xlu0 %191 }
  0xb7   :  { %v194_v39 = vsel %vm193_vm6, %v190_v16, %v192_v21  ;;  %v195_v40 = vsel %vm193_vm6, %v192_v21, %v190_v16  ;;  %vm243_vm6 = vcmp.lt.s32.totalorder %v1844_v23, 49  ;;  %v288_v5 = vpop.permute.xlu2 %287 }
  0xb8   :  { %v198_v44 = vsel %vm1876_vm10, %v195_v40, 0.0  ;;  %v199_v46 = vsel %vm197_vm14, %v194_v39, 0.0  ;;  %v244_v62 = vsel %vm243_vm6, %v1842_v22, %v242_v48  ;;  %v245_v63 = vsel %vm243_vm6, %v242_v48, %v1842_v22  ;;  %vm247_vm14 = vmand %vm182_vm12, %vm3083_vm4 }
  0xb9   :  { %v205_v47 = vmul.f32 %v204_v31, %v198_v44  ;;  %v206_v50 = vmul.f32 %v204_v31, %v199_v46  ;;  %vm268_vm10 = vcmp.lt.s32.totalorder %v1844_v23, 48  ;;  %v249_v6 = vsel %vm247_vm14, %v244_v62, 0.0 }
  0xba   :  { %v256_v10 = vmul.f32 %v254_v0, %v249_v6  ;;  %vm3079_vm14 = vcmp.lt.s32.totalorder %v1854_v30, 14  ;;  %v325_v40 = vstv %s1930_s20  ;;  %v326_v44 = vstv %s1934_s21  ;;  %s1763_s20 = smov 115   ;;  %s2181_s21 = sld [smem:[#allocation4 + $0x10]] }
  0xbb   :  { %v586_v12 = vld.sshfl [vmem:[#allocation1 + $0x8] sm:$0xff pattern:$0x75316420]  ;;  %v585_v13 = vld.sshfl [vmem:[#allocation1] sm:$0xff pattern:$0x75316420] }
  0xbc   :  { %591 = vrot.lane.b32.xlu0 %v586_v12, %s1753_s6  ;;  %609 = vst [vmem:[#allocation1] ss:$2 sm:$0xff] %v1814_v43  ;;  %589 = vrot.lane.b32.xlu2 %v585_v13, %s1753_s6  ;;  %s2075_s6 = sld [smem:[#allocation4 + $0x3b]] }
  0xbe   :  { %v217_v35 = vpop.permute.xlu1 %216 }
  0xbf   :  { %v219_v41 = vsel %vm218_vm7, %v215_v17, %v217_v35  ;;  %v220_v42 = vsel %vm218_vm7, %v217_v35, %v215_v17  ;;  %vm246_vm7 = vmand %vm181_vm9, %vm3084_vm3 }
  0xc0   :  { %v223_v51 = vsel %vm221_vm0, %v220_v42, 0.0  ;;  %v224_v52 = vsel %vm222_vm2, %v219_v41, 0.0  ;;  %v248_v1 = vsel %vm246_vm7, %v245_v63, 0.0  ;;  %vm3082_vm0 = vcmp.lt.s32.totalorder %v1854_v30, 15  ;;  %v315_v41 = vpop.permute.xlu2 %314 }
  0xc1   :  { %v230_v53 = vmul.f32 %v229_v45, %v223_v51  ;;  %v231_v54 = vmul.f32 %v229_v45, %v224_v52  ;;  %v255_v7 = vmul.f32 %v254_v0, %v248_v1  ;;  %vm3078_vm2 = vcmp.lt.s32.totalorder %v1866_v34, 15  ;;  %vm1946_vm6 = vmand %vm181_vm9, %vm3082_vm0 }
  0xc2   :  { %vm291_vm7 = vcmp.lt.s32.totalorder %v1844_v23, 47 }
  0xc3   :  { %v610_v14 = vld.sshfl [vmem:[#allocation1] sm:$0xff pattern:$0x75316420]  ;;  %v611_v15 = vld.sshfl [vmem:[#allocation1 + $0x8] sm:$0xff pattern:$0x75316420]  ;;  %v232_v55 = vadd.f32 %v230_v53, %v205_v47  ;;  %v233_v58 = vadd.f32 %v231_v54, %v206_v50 }
  0xc4   :  { %614 = vrot.lane.b32.xlu1 %v610_v14, %s1736_s19  ;;  %632 = vst [vmem:[#allocation1] ss:$2 sm:$0xff] %v1814_v43  ;;  %616 = vrot.lane.b32.xlu2 %v611_v15, %s1736_s19 }
  0xc5   :  { %v257_v13 = vadd.f32 %v255_v7, %v232_v55  ;;  %v258_v17 = vadd.f32 %v256_v10, %v233_v58  ;;  %v350_v55 = vstv %s1950_s22  ;;  %s2183_s22 = sld [smem:[#allocation4 + $0x41]] }
  0xc6   :  { %v265_v49 = vpop.permute.xlu0 %264  ;;  %v267_v60 = vpop.permute.xlu1 %266 }
  0xc7   :  { %v269_v9 = vsel %vm268_vm10, %v265_v49, %v267_v60  ;;  %v270_v11 = vsel %vm268_vm10, %v267_v60, %v265_v49  ;;  %vm1957_vm10 = vmand %vm182_vm12, %vm3078_vm2  ;;  %v327_v49 = vsel %vm168_vm5, %v325_v40, %v326_v44 }
  0xc8   :  { %v272_v12 = vsel %vm182_vm12, %v269_v9, 0.0  ;;  %v271_v14 = vsel %vm181_vm9, %v270_v11, 0.0  ;;  %vm319_vm2 = vmand %vm181_vm9, %vm3079_vm14  ;;  %vm180_vm14 = vcmp.lt.s32.totalorder %v1866_v34, 13 }
  0xc9   :  { %v279_v15 = vmul.f32 %v277_v8, %v272_v12 }
  0xcb   :  { %v633_v18 = vld.sshfl [vmem:[#allocation1] sm:$0xff pattern:$0x75316420]  ;;  %v634_v19 = vld.sshfl [vmem:[#allocation1 + $0x8] sm:$0xff pattern:$0x75316420]  ;;  %v281_v31 = vadd.f32 %v279_v15, %v258_v17 }
  0xcc   :  { %637 = vrot.lane.b32.xlu0 %v633_v18, %s1754_s11  ;;  %639 = vrot.lane.b32.xlu1 %v634_v19, %s1754_s11  ;;  %657 = vst [vmem:[#allocation1] ss:$2 sm:$0xff] %v1814_v43  ;;  %v278_v18 = vmul.f32 %v277_v8, %v271_v14  ;;  %s1760_s11 = smov 127  }
  0xce   :  { %v290_v4 = vpop.permute.xlu0 %289  ;;  %v280_v28 = vadd.f32 %v278_v18, %v257_v13  ;;  %v365_v9 = vpop.permute.xlu2 %364 }
  0xcf   :  { %v292_v26 = vsel %vm291_vm7, %v288_v5, %v290_v4  ;;  %v293_v27 = vsel %vm291_vm7, %v290_v4, %v288_v5  ;;  %vm3080_vm7 = vcmp.lt.s32.totalorder %v1866_v34, 14  ;;  %v378_v4 = vstv %s1976_s26  ;;  %s1765_s26 = smov 113  }
  0xd0   :  { %v379_v8 = vsel %vm168_vm5, %v377_v3, %v378_v4 }
  0xd3   :  { %v659_v36 = vld.sshfl [vmem:[#allocation1 + $0x8] sm:$0xff pattern:$0x75316420]  ;;  %v658_v37 = vld.sshfl [vmem:[#allocation1] sm:$0xff pattern:$0x75316420] }
  0xd4   :  { %664 = vrot.lane.b32.xlu0 %v659_v36, %s1755_s14  ;;  %682 = vst [vmem:[#allocation1] ss:$2 sm:$0xff] %v1814_v43  ;;  %662 = vrot.lane.b32.xlu2 %v658_v37, %s1755_s14  ;;  %v296_v36 = vsel %vm1946_vm6, %v293_v27, 0.0  ;;  %v297_v37 = vsel %vm1957_vm10, %v292_v26, 0.0  ;;  %vm320_vm6 = vmand %vm182_vm12, %vm3080_vm7  ;;  %vm3081_vm10 = vcmp.lt.s32.totalorder %v1854_v30, 13  ;;  %vm341_vm7 = vcmp.lt.s32.totalorder %v1844_v23, 45 }
  0xd5   :  { %v303_v38 = vmul.f32 %v302_v32, %v296_v36  ;;  %v304_v39 = vmul.f32 %v302_v32, %v297_v37  ;;  %v402_v27 = vstv %s1993_s27  ;;  %s1761_s14 = smov 126   ;;  %s2217_s27 = sld [smem:[#allocation4 + $0x12]] }
  0xd6   :  { %v313_v35 = vpop.permute.xlu1 %312  ;;  %v392_v32 = vpop.permute.xlu2 %391 }
  0xd7   :  { %v317_v45 = vsel %vm316_vm1, %v313_v35, %v315_v41  ;;  %v318_v46 = vsel %vm316_vm1, %v315_v41, %v313_v35  ;;  %v305_v47 = vadd.f32 %v303_v38, %v280_v28  ;;  %v306_v48 = vadd.f32 %v304_v39, %v281_v31  ;;  %vm2000_vm1 = vmand %vm181_vm9, %vm3081_vm10 }
  0xd8   :  { %v321_v50 = vsel %vm319_vm2, %v318_v46, 0.0  ;;  %v322_v51 = vsel %vm320_vm6, %v317_v45, 0.0  ;;  %vm2012_vm2 = vmand %vm182_vm12, %vm180_vm14  ;;  %vm357_vm9 = vcmp.ge.s32.totalorder %v1851_v29, 2  ;;  %vm358_vm6 = vcmp.ge.s32.totalorder %v1864_v33, 2 }
  0xd9   :  { %v328_v52 = vmul.f32 %v327_v49, %v321_v50  ;;  %v329_v53 = vmul.f32 %v327_v49, %v322_v51  ;;  %vm368_vm10 = vcmp.lt.s32.totalorder %v1844_v23, 35  ;;  %vm2030_vm12 = vmand %vm357_vm9, %vm169_vm8  ;;  %v403_v28 = vstv %s2006_s28  ;;  %s2219_s28 = sld [smem:[#allocation4 + $0x43]] }
  0xda   :  { %v404_v31 = vsel %vm168_vm5, %v402_v27, %v403_v28  ;;  %v427_v41 = vstv %s2048_s30  ;;  %s2231_s30 = sld [smem:[#allocation4 + $0x13]] }
  0xdb   :  { %v683_v56 = vld.sshfl [vmem:[#allocation1] sm:$0xff pattern:$0x75316420]  ;;  %v684_v57 = vld.sshfl [vmem:[#allocation1 + $0x8] sm:$0xff pattern:$0x75316420]  ;;  %v330_v59 = vadd.f32 %v328_v52, %v305_v47  ;;  %v331_v62 = vadd.f32 %v329_v53, %v306_v48 }
  0xdc   :  { %687 = vrot.lane.b32.xlu1 %v683_v56, %s1756_s1  ;;  %707 = vst [vmem:[#allocation1] ss:$2 sm:$0xff] %v1814_v43  ;;  %689 = vrot.lane.b32.xlu2 %v684_v57, %s1756_s1  ;;  %v351_v56 = vstv %s1962_s23  ;;  %s2165_s1 = sld [smem:[#allocation4 + $0x40]]  ;;  %s1764_s23 = smov 114  }
  0xdd   :  { %v352_v61 = vsel %vm168_vm5, %v350_v55, %v351_v56 }
  0xde   :  { %v338_v42 = vpop.permute.xlu0 %337  ;;  %v340_v63 = vpop.permute.xlu1 %339 }
  0xdf   :  { %v342_v0 = vsel %vm341_vm7, %v338_v42, %v340_v63  ;;  %v343_v1 = vsel %vm341_vm7, %v340_v63, %v338_v42  ;;  %vm372_vm7 = vmand %vm358_vm6, %vm170_vm11  ;;  %v428_v42 = vstv %s2050_s3  ;;  %v451_v63 = vstv %s2075_s6  ;;  %s2233_s3 = sld [smem:[#allocation4 + $0x44]] }
  0xe0   :  { %v346_v5 = vsel %vm2000_vm1, %v343_v1, 0.0  ;;  %v347_v6 = vsel %vm2012_vm2, %v342_v0, 0.0  ;;  %vm396_vm1 = vmand %vm357_vm9, %vm171_vm13  ;;  %v429_v49 = vsel %vm168_vm5, %v427_v41, %v428_v42  ;;  %s2251_s6 = sld [smem:[#allocation4 + $0x45]] }
  0xe1   :  { %v353_v10 = vmul.f32 %v352_v61, %v346_v5  ;;  %v354_v11 = vmul.f32 %v352_v61, %v347_v6  ;;  %vm397_vm2 = vmand %vm358_vm6, %vm3085_vm15 }
  0xe3   :  { %v708_v21 = vld.sshfl [vmem:[#allocation1] sm:$0xff pattern:$0x75316420]  ;;  %v709_v22 = vld.sshfl [vmem:[#allocation1 + $0x8] sm:$0xff pattern:$0x75316420]  ;;  %v355_v16 = vadd.f32 %v353_v10, %v330_v59  ;;  %v356_v17 = vadd.f32 %v354_v11, %v331_v62  ;;  %v450_v62 = vstv %s2068_s5 }
  0xe4   :  { %712 = vrot.lane.b32.xlu0 %v708_v21, %s1757_s24  ;;  %714 = vrot.lane.b32.xlu1 %v709_v22, %s1757_s24  ;;  %730 = vst [vmem:[#allocation1] ss:$2 sm:$0xff] %v1814_v43  ;;  %v452_v1 = vsel %vm168_vm5, %v450_v62, %v451_v63  ;;  %s2199_s24 = sld [smem:[#allocation4 + $0x11]] }
  0xe5   :  { %s2249_s5 = sld [smem:[#allocation4 + $0x14]] }
  0xe6   :  { %v367_v7 = vpop.permute.xlu0 %366 }
  0xe7   :  { %v369_v12 = vsel %vm368_vm10, %v365_v9, %v367_v7  ;;  %v370_v13 = vsel %vm368_vm10, %v367_v7, %v365_v9  ;;  %vm393_vm10 = vcmp.lt.s32.totalorder %v1844_v23, 34 }
  0xe8   :  { %v373_v14 = vsel %vm2030_vm12, %v370_v13, 0.0  ;;  %v374_v15 = vsel %vm372_vm7, %v369_v12, 0.0  ;;  %vm418_vm12 = vcmp.lt.s32.totalorder %v1844_v23, 33  ;;  %vm421_vm7 = vmand %vm357_vm9, %vm3084_vm3  ;;  %vm3102_vm3 = vcmp.lt.s32.totalorder %v1866_v34, 14 }
  0xe9   :  { %v380_v18 = vmul.f32 %v379_v8, %v373_v14  ;;  %v381_v19 = vmul.f32 %v379_v8, %v374_v15  ;;  %v475_v15 = vstv %s2088_s7  ;;  %s1768_s7 = smov 110  }
  0xeb   :  { %v732_v57 = vld.sshfl [vmem:[#allocation1 + $0x8] sm:$0xff pattern:$0x75316420]  ;;  %v731_v58 = vld.sshfl [vmem:[#allocation1] sm:$0xff pattern:$0x75316420]  ;;  %v382_v22 = vadd.f32 %v380_v18, %v355_v16  ;;  %v383_v25 = vadd.f32 %v381_v19, %v356_v17  ;;  %v476_v16 = vstv %s2090_s8  ;;  %v500_v17 = vstv %s2092_s9 }
  0xec   :  { %737 = vrot.lane.b32.xlu0 %v732_v57, %s1758_s29  ;;  %753 = vst [vmem:[#allocation1] ss:$2 sm:$0xff] %v1814_v43  ;;  %735 = vrot.lane.b32.xlu2 %v731_v58, %s1758_s29  ;;  %v440_v57 = vpop.permute.xlu2 %439  ;;  %v501_v18 = vstv %s2094_s10  ;;  %v477_v19 = vsel %vm168_vm5, %v475_v15, %v476_v16  ;;  %v577_v16 = vstv %s2162_s0  ;;  %s1766_s29 = smov 112   ;;  %s2267_s8 = sld [smem:[#allocation4 + $0x15]] }
  0xed   :  { %v502_v27 = vsel %vm168_vm5, %v500_v17, %v501_v18  ;;  %v578_v17 = vstv %s2165_s1  ;;  %s2269_s9 = sld [smem:[#allocation4 + $0x46]]  ;;  %s1769_s10 = smov 109  }
  0xee   :  { %v390_v26 = vpop.permute.xlu1 %389  ;;  %s1557_s0 = sld [smem:[#allocation4 + $0x18]] }
  0xef   :  { %v394_v35 = vsel %vm393_vm10, %v390_v26, %v392_v32  ;;  %v395_v36 = vsel %vm393_vm10, %v392_v32, %v390_v26  ;;  %vm422_vm10 = vmand %vm358_vm6, %vm3083_vm4  ;;  %s1558_s1 = sld [smem:[#allocation4 + $0x49]] }
  0xf0   :  { %v398_v37 = vsel %vm396_vm1, %v395_v36, 0.0  ;;  %v399_v38 = vsel %vm397_vm2, %v394_v35, 0.0  ;;  %vm443_vm1 = vcmp.lt.s32.totalorder %v1844_v23, 32  ;;  %vm2114_vm2 = vmand %vm357_vm9, %vm3082_vm0  ;;  %vm3101_vm0 = vcmp.lt.s32.totalorder %v1854_v30, 14 }
  0xf1   :  { %v405_v39 = vmul.f32 %v404_v31, %v398_v37  ;;  %v406_v40 = vmul.f32 %v404_v31, %v399_v38  ;;  %vm494_vm4 = vmand %vm357_vm9, %vm3101_vm0 }
  0xf3   :  { %v754_v20 = vld.sshfl [vmem:[#allocation1] sm:$0xff pattern:$0x75316420]  ;;  %v755_v21 = vld.sshfl [vmem:[#allocation1 + $0x8] sm:$0xff pattern:$0x75316420]  ;;  %v407_v47 = vadd.f32 %v405_v39, %v382_v22  ;;  %v408_v48 = vadd.f32 %v406_v40, %v383_v25 }
  0xf4   :  { %758 = vrot.lane.b32.xlu1 %v754_v20, %s1759_s4  ;;  %781 = vst [vmem:[#allocation1] ss:$2 sm:$0xff] %v1814_v43  ;;  %760 = vrot.lane.b32.xlu2 %v755_v21, %s1759_s4  ;;  %v465_v11 = vpop.permute.xlu2 %464  ;;  %s1767_s4 = smov 111  }
  0xf6   :  { %v415_v44 = vpop.permute.xlu0 %414  ;;  %v417_v50 = vpop.permute.xlu1 %416 }
  0xf7   :  { %v419_v51 = vsel %vm418_vm12, %v415_v44, %v417_v50  ;;  %v420_v52 = vsel %vm418_vm12, %v417_v50, %v415_v44  ;;  %vm466_vm12 = vcmp.lt.s32.totalorder %v1844_v23, 31  ;;  %v525_v50 = vstv %s2106_s12  ;;  %s2287_s12 = sld [smem:[#allocation4 + $0x47]] }
  0xf8   :  { %v423_v53 = vsel %vm421_vm7, %v420_v52, 0.0  ;;  %v424_v54 = vsel %vm422_vm10, %v419_v51, 0.0  ;;  %vm3100_vm7 = vcmp.lt.s32.totalorder %v1866_v34, 15  ;;  %v526_v51 = vstv %s2108_s13  ;;  %s1770_s13 = smov 99  }
  0xf9   :  { %v430_v55 = vmul.f32 %v429_v49, %v423_v53  ;;  %v431_v56 = vmul.f32 %v429_v49, %v424_v54  ;;  %vm470_vm10 = vmand %vm358_vm6, %vm3100_vm7  ;;  %v527_v54 = vsel %vm168_vm5, %v525_v50, %v526_v51 }
  0xfa   :  { %vm495_vm7 = vmand %vm358_vm6, %vm3102_vm3  ;;  %vm516_vm3 = vcmp.lt.s32.totalorder %v1844_v23, 29 }
  0xfb   :  { %v2077_v45 = vld.sshfl [vmem:[#allocation1] sm:$0xff pattern:$0x75316420]  ;;  %v2079_v46 = vld.sshfl [vmem:[#allocation1 + $0x8] sm:$0xff pattern:$0x75316420]  ;;  %v432_v58 = vadd.f32 %v430_v55, %v407_v47  ;;  %v433_v59 = vadd.f32 %v431_v56, %v408_v48 }
  0xfc   :  { %790 = vst [vmem:[#allocation1] ss:$2 sm:$0xff] %v1814_v43 }
  0xfe   :  { %v442_v0 = vpop.permute.xlu0 %441  ;;  %v513_v52 = vpop.permute.xlu2 %512 }
  0xff   :  { %v444_v2 = vsel %vm443_vm1, %v440_v57, %v442_v0  ;;  %v445_v3 = vsel %vm443_vm1, %v442_v0, %v440_v57  ;;  %vm491_vm1 = vcmp.lt.s32.totalorder %v1844_v23, 30 }
 0x100   :  { %v446_v4 = vsel %vm357_vm9, %v445_v3, 0.0  ;;  %v447_v5 = vsel %vm358_vm6, %v444_v2, 0.0  ;;  %v553_v2 = vstv %s2145_s16  ;;  %s1771_s16 = smov 98  }
 0x101   :  { %v453_v7 = vmul.f32 %v452_v1, %v446_v4  ;;  %v454_v8 = vmul.f32 %v452_v1, %v447_v5  ;;  %v552_v1 = vstv %s2143_s15  ;;  %s2301_s15 = sld [smem:[#allocation4 + $0x48]] }
 0x102   :  { %v554_v4 = vsel %vm168_vm5, %v552_v1, %v553_v2 }
 0x103   :  { %v792_v60 = vld.sshfl [vmem:[#allocation1 + $0x8] sm:$0xff pattern:$0x75316420]  ;;  %v791_v61 = vld.sshfl [vmem:[#allocation1] sm:$0xff pattern:$0x75316420]  ;;  %v455_v9 = vadd.f32 %v453_v7, %v432_v58  ;;  %v456_v10 = vadd.f32 %v454_v8, %v433_v59 }
 0x104   :  { %797 = vrot.lane.b32.xlu1 %v792_v60, %s1760_s11  ;;  %795 = vrot.lane.b32.xlu0 %v791_v61, %s1760_s11  ;;  %813 = vst [vmem:[#allocation1] ss:$2 sm:$0xff] %v1814_v43  ;;  %s2285_s11 = sld [smem:[#allocation4 + $0x16]] }
 0x106   :  { %v463_v6 = vpop.permute.xlu1 %462  ;;  %v542_v5 = vpop.permute.xlu2 %541 }
 0x107   :  { %v467_v20 = vsel %vm466_vm12, %v463_v6, %v465_v11  ;;  %v468_v21 = vsel %vm466_vm12, %v465_v11, %v463_v6  ;;  %vm533_vm12 = vcmp.ge.s32.totalorder %v1864_v33, 1 }
 0x108   :  { %v471_v22 = vsel %vm2114_vm2, %v468_v21, 0.0  ;;  %v472_v25 = vsel %vm470_vm10, %v467_v20, 0.0  ;;  %vm520_vm2 = vmand %vm358_vm6, %vm180_vm14  ;;  %vm543_vm6 = vcmp.lt.s32.totalorder %v1844_v23, 19 }
 0x109   :  { %v478_v31 = vmul.f32 %v477_v19, %v471_v22  ;;  %v479_v32 = vmul.f32 %v477_v19, %v472_v25  ;;  %v579_v19 = vsel %vm168_vm5, %v577_v16, %v578_v17 }
 0x10b   :  { %v815_v12 = vld.sshfl [vmem:[#allocation1 + $0x8] sm:$0xff pattern:$0x75316420]  ;;  %v814_v13 = vld.sshfl [vmem:[#allocation1] sm:$0xff pattern:$0x75316420]  ;;  %v480_v39 = vadd.f32 %v478_v31, %v455_v9  ;;  %v481_v40 = vadd.f32 %v479_v32, %v456_v10 }
 0x10c   :  { %820 = vrot.lane.b32.xlu0 %v815_v12, %s1761_s14  ;;  %836 = vst [vmem:[#allocation1] ss:$2 sm:$0xff] %v1814_v43  ;;  %818 = vrot.lane.b32.xlu2 %v814_v13, %s1761_s14  ;;  %s2299_s14 = sld [smem:[#allocation4 + $0x17]] }
 0x10e   :  { %v488_v26 = vpop.permute.xlu0 %487  ;;  %v490_v28 = vpop.permute.xlu1 %489 }
 0x10f   :  { %v492_v35 = vsel %vm491_vm1, %v488_v26, %v490_v28  ;;  %v493_v36 = vsel %vm491_vm1, %v490_v28, %v488_v26  ;;  %vm547_vm1 = vmand %vm533_vm12, %vm170_vm11 }
 0x110   :  { %v496_v37 = vsel %vm494_vm4, %v493_v36, 0.0  ;;  %v497_v38 = vsel %vm495_vm7, %v492_v35, 0.0  ;;  %vm3103_vm4 = vcmp.lt.s32.totalorder %v1854_v30, 13  ;;  %vm568_vm7 = vcmp.lt.s32.totalorder %v1844_v23, 18 }
 0x111   :  { %v503_v41 = vmul.f32 %v502_v27, %v496_v37  ;;  %v504_v42 = vmul.f32 %v502_v27, %v497_v38  ;;  %vm519_vm0 = vmand %vm357_vm9, %vm3103_vm4  ;;  %vm532_vm9 = vcmp.ge.s32.totalorder %v1851_v29, 1  ;;  %v602_v37 = vstv %s2181_s21  ;;  %s1560_s21 = sld [smem:[#allocation4 + $0x4a]] }
 0x112   :  { %vm546_vm10 = vmand %vm532_vm9, %vm169_vm8  ;;  %v603_v38 = vstv %s2183_s22  ;;  %s1773_s22 = smov 96  }
 0x113   :  { %v837_v44 = vld.sshfl [vmem:[#allocation1] sm:$0xff pattern:$0x75316420]  ;;  %v838_v47 = vld.sshfl [vmem:[#allocation1 + $0x8] sm:$0xff pattern:$0x75316420]  ;;  %v505_v48 = vadd.f32 %v503_v41, %v480_v39  ;;  %v506_v49 = vadd.f32 %v504_v42, %v481_v40  ;;  %vm572_vm4 = vmand %vm533_vm12, %vm3085_vm15  ;;  %v604_v41 = vsel %vm168_vm5, %v602_v37, %v603_v38 }
 0x114   :  { %841 = vrot.lane.b32.xlu1 %v837_v44, %s1762_s17  ;;  %861 = vst [vmem:[#allocation1] ss:$2 sm:$0xff] %v1814_v43  ;;  %843 = vrot.lane.b32.xlu2 %v838_v47, %s1762_s17  ;;  %s1772_s17 = smov 97  }
 0x116   :  { %v515_v53 = vpop.permute.xlu0 %514  ;;  %v590_v39 = vpop.permute.xlu2 %589 }
 0x117   :  { %v517_v55 = vsel %vm516_vm3, %v513_v52, %v515_v53  ;;  %v518_v56 = vsel %vm516_vm3, %v515_v53, %v513_v52  ;;  %vm571_vm3 = vmand %vm532_vm9, %vm171_vm13 }
 0x118   :  { %v521_v57 = vsel %vm519_vm0, %v518_v56, 0.0  ;;  %v522_v58 = vsel %vm520_vm2, %v517_v55, 0.0  ;;  %vm593_vm0 = vcmp.lt.s32.totalorder %v1844_v23, 17  ;;  %vm3104_vm2 = vcmp.ge.s32.totalorder %v1854_v30, 1 }
 0x119   :  { %v528_v59 = vmul.f32 %v527_v54, %v521_v57  ;;  %v529_v60 = vmul.f32 %v527_v54, %v522_v58  ;;  %v625_v55 = vstv %s2199_s24  ;;  %v626_v56 = vstv %s2201_s25  ;;  %s2328_s24 = sld [smem:[#allocation4 + $0x4b]]  ;;  %s1774_s25 = smov 95  }
 0x11a   :  { %v627_v58 = vsel %vm168_vm5, %v625_v55, %v626_v56 }
 0x11b   :  { %v863_v61 = vld.sshfl [vmem:[#allocation1 + $0x8] sm:$0xff pattern:$0x75316420]  ;;  %v862_v62 = vld.sshfl [vmem:[#allocation1] sm:$0xff pattern:$0x75316420]  ;;  %v530_v63 = vadd.f32 %v528_v59, %v505_v48  ;;  %v531_v0 = vadd.f32 %v529_v60, %v506_v49 }
 0x11c   :  { %868 = vrot.lane.b32.xlu1 %v863_v61, %s1763_s20  ;;  %866 = vrot.lane.b32.xlu0 %v862_v62, %s1763_s20  ;;  %886 = vst [vmem:[#allocation1] ss:$2 sm:$0xff] %v1814_v43  ;;  %s1559_s20 = sld [smem:[#allocation4 + $0x19]] }
 0x11e   :  { %v540_v3 = vpop.permute.xlu1 %539  ;;  %v617_v59 = vpop.permute.xlu2 %616 }
 0x11f   :  { %v544_v6 = vsel %vm543_vm6, %v540_v3, %v542_v5  ;;  %v545_v7 = vsel %vm543_vm6, %v542_v5, %v540_v3  ;;  %vm596_vm6 = vmand %vm532_vm9, %vm3104_vm2  ;;  %vm3107_vm2 = vcmp.lt.s32.totalorder %v1866_v34, 15 }
 0x120   :  { %v548_v8 = vsel %vm546_vm10, %v545_v7, 0.0  ;;  %v549_v9 = vsel %vm547_vm1, %v544_v6, 0.0  ;;  %vm3105_vm10 = vcmp.ge.s32.totalorder %v1866_v34, 1  ;;  %v650_v6 = vstv %s2217_s27  ;;  %s2342_s27 = sld [smem:[#allocation4 + $0x4c]] }
 0x121   :  { %v555_v10 = vmul.f32 %v554_v4, %v548_v8  ;;  %v556_v11 = vmul.f32 %v554_v4, %v549_v9  ;;  %vm597_vm1 = vmand %vm533_vm12, %vm3105_vm10  ;;  %v651_v7 = vstv %s2219_s28  ;;  %vm666_vm10 = vcmp.lt.s32.totalorder %v1844_v23, 14  ;;  %s1775_s28 = smov 94  }
 0x122   :  { %v652_v9 = vsel %vm168_vm5, %v650_v6, %v651_v7 }
 0x123   :  { %v887_v12 = vld.sshfl [vmem:[#allocation1] sm:$0xff pattern:$0x75316420]  ;;  %v888_v13 = vld.sshfl [vmem:[#allocation1 + $0x8] sm:$0xff pattern:$0x75316420]  ;;  %v557_v14 = vadd.f32 %v555_v10, %v530_v63  ;;  %v558_v15 = vadd.f32 %v556_v11, %v531_v0 }
 0x124   :  { %893 = vrot.lane.b32.xlu0 %v888_v13, %s1764_s23  ;;  %911 = vst [vmem:[#allocation1] ss:$2 sm:$0xff] %v1814_v43  ;;  %891 = vrot.lane.b32.xlu2 %v887_v12, %s1764_s23  ;;  %s2324_s23 = sld [smem:[#allocation4 + $0x1a]] }
 0x126   :  { %v565_v18 = vpop.permute.xlu0 %564  ;;  %v567_v20 = vpop.permute.xlu1 %566 }
 0x127   :  { %v569_v21 = vsel %vm568_vm7, %v565_v18, %v567_v20  ;;  %v570_v22 = vsel %vm568_vm7, %v567_v20, %v565_v18  ;;  %vm618_vm7 = vcmp.lt.s32.totalorder %v1844_v23, 16 }
 0x128   :  { %v573_v25 = vsel %vm571_vm3, %v570_v22, 0.0  ;;  %v574_v26 = vsel %vm572_vm4, %v569_v21, 0.0  ;;  %vm641_vm3 = vcmp.lt.s32.totalorder %v1844_v23, 15  ;;  %vm3106_vm4 = vcmp.lt.s32.totalorder %v1854_v30, 15 }
 0x129   :  { %v580_v27 = vmul.f32 %v579_v19, %v573_v25  ;;  %v581_v28 = vmul.f32 %v579_v19, %v574_v26  ;;  %v675_v21 = vstv %s2231_s30  ;;  %v676_v22 = vstv %s2233_s3  ;;  %s2356_s30 = sld [smem:[#allocation4 + $0x4d]]  ;;  %s1776_s3 = smov 93  }
 0x12b   :  { %v913_v31 = vld.sshfl [vmem:[#allocation1 + $0x8] sm:$0xff pattern:$0x75316420]  ;;  %v912_v32 = vld.sshfl [vmem:[#allocation1] sm:$0xff pattern:$0x75316420]  ;;  %v582_v35 = vadd.f32 %v580_v27, %v557_v14  ;;  %v583_v36 = vadd.f32 %v581_v28, %v558_v15  ;;  %v677_v27 = vsel %vm168_vm5, %v675_v21, %v676_v22 }
 0x12c   :  { %916 = vrot.lane.b32.xlu1 %v912_v32, %s1765_s26  ;;  %936 = vst [vmem:[#allocation1] ss:$2 sm:$0xff] %v1814_v43  ;;  %918 = vrot.lane.b32.xlu2 %v913_v31, %s1765_s26  ;;  %s2340_s26 = sld [smem:[#allocation4 + $0x1b]] }
 0x12e   :  { %v592_v40 = vpop.permute.xlu0 %591  ;;  %v663_v25 = vpop.permute.xlu2 %662 }
 0x12f   :  { %v594_v42 = vsel %vm593_vm0, %v590_v39, %v592_v40  ;;  %v595_v44 = vsel %vm593_vm0, %v592_v40, %v590_v39  ;;  %vm644_vm0 = vmand %vm532_vm9, %vm3106_vm4 }
 0x130   :  { %v598_v47 = vsel %vm596_vm6, %v595_v44, 0.0  ;;  %v599_v48 = vsel %vm597_vm1, %v594_v42, 0.0  ;;  %vm645_vm6 = vmand %vm533_vm12, %vm3107_vm2  ;;  %vm3108_vm1 = vcmp.lt.s32.totalorder %v1854_v30, 14  ;;  %v700_v42 = vstv %s2249_s5  ;;  %s2372_s5 = sld [smem:[#allocation4 + $0x4e]] }
 0x131   :  { %v605_v49 = vmul.f32 %v604_v41, %v598_v47  ;;  %v606_v50 = vmul.f32 %v604_v41, %v599_v48  ;;  %v701_v44 = vstv %s2251_s6  ;;  %vm3110_vm2 = vcmp.lt.s32.totalorder %v1854_v30, 13  ;;  %s1777_s6 = smov 83  }
 0x132   :  { %v702_v48 = vsel %vm168_vm5, %v700_v42, %v701_v44 }
 0x133   :  { %v938_v51 = vld.sshfl [vmem:[#allocation1 + $0x8] sm:$0xff pattern:$0x75316420]  ;;  %v937_v52 = vld.sshfl [vmem:[#allocation1] sm:$0xff pattern:$0x75316420]  ;;  %v607_v53 = vadd.f32 %v605_v49, %v582_v35  ;;  %v608_v54 = vadd.f32 %v606_v50, %v583_v36 }
 0x134   :  { %943 = vrot.lane.b32.xlu1 %v938_v51, %s1766_s29  ;;  %941 = vrot.lane.b32.xlu0 %v937_v52, %s1766_s29  ;;  %959 = vst [vmem:[#allocation1] ss:$2 sm:$0xff] %v1814_v43  ;;  %s2354_s29 = sld [smem:[#allocation4 + $0x1c]] }
 0x136   :  { %v615_v57 = vpop.permute.xlu1 %614  ;;  %v690_v49 = vpop.permute.xlu2 %689 }
 0x137   :  { %v619_v60 = vsel %vm618_vm7, %v615_v57, %v617_v59  ;;  %v620_v61 = vsel %vm618_vm7, %v617_v59, %v615_v57  ;;  %vm669_vm7 = vmand %vm532_vm9, %vm3108_vm1  ;;  %v723_v59 = vstv %s2267_s8  ;;  %vm762_vm1 = vcmp.lt.s32.totalorder %v1844_v23, 1  ;;  %s1779_s8 = smov 81  }
 0x138   :  { %v621_v62 = vsel %vm532_vm9, %v620_v61, 0.0  ;;  %v622_v63 = vsel %vm533_vm12, %v619_v60, 0.0  ;;  %v724_v60 = vstv %s2269_s9  ;;  %s1780_s9 = smov 80  }
 0x139   :  { %v628_v0 = vmul.f32 %v627_v58, %v621_v62  ;;  %v629_v1 = vmul.f32 %v627_v58, %v622_v63  ;;  %v725_v63 = vsel %vm168_vm5, %v723_v59, %v724_v60 }
 0x13b   :  { %v961_v2 = vld.sshfl [vmem:[#allocation1 + $0x8] sm:$0xff pattern:$0x75316420]  ;;  %v960_v3 = vld.sshfl [vmem:[#allocation1] sm:$0xff pattern:$0x75316420]  ;;  %v630_v4 = vadd.f32 %v628_v0, %v607_v53  ;;  %v631_v5 = vadd.f32 %v629_v1, %v608_v54 }
 0x13c   :  { %966 = vrot.lane.b32.xlu0 %v961_v2, %s1767_s4  ;;  %984 = vst [vmem:[#allocation1] ss:$2 sm:$0xff] %v1814_v43  ;;  %964 = vrot.lane.b32.xlu2 %v960_v3, %s1767_s4  ;;  %s2369_s4 = sld [smem:[#allocation4 + $0x1d]] }
 0x13e   :  { %v638_v8 = vpop.permute.xlu0 %637  ;;  %v640_v10 = vpop.permute.xlu1 %639 }
 0x13f   :  { %v642_v11 = vsel %vm641_vm3, %v638_v8, %v640_v10  ;;  %v643_v12 = vsel %vm641_vm3, %v640_v10, %v638_v8  ;;  %vm3109_vm3 = vcmp.lt.s32.totalorder %v1866_v34, 14 }
 0x140   :  { %v646_v13 = vsel %vm644_vm0, %v643_v12, 0.0  ;;  %v647_v14 = vsel %vm645_vm6, %v642_v11, 0.0  ;;  %vm670_vm4 = vmand %vm533_vm12, %vm3109_vm3  ;;  %vm691_vm0 = vcmp.lt.s32.totalorder %v1844_v23, 13  ;;  %v746_v11 = vstv %s2285_s11  ;;  %s1782_s11 = smov 78  }
 0x141   :  { %v653_v15 = vmul.f32 %v652_v9, %v646_v13  ;;  %v654_v16 = vmul.f32 %v652_v9, %v647_v14  ;;  %vm694_vm6 = vmand %vm532_vm9, %vm3110_vm2  ;;  %vm716_vm9 = vcmp.lt.s32.totalorder %v1844_v23, 3  ;;  %v747_v12 = vstv %s2287_s12  ;;  %s1783_s12 = smov 77  }
 0x142   :  { %vm3112_vm3 = vcmp.ge.s32.totalorder %v1866_v34, 1  ;;  %vm3114_vm2 = vcmp.lt.s32.totalorder %v1866_v34, 15 }
 0x143   :  { %v985_v17 = vld.sshfl [vmem:[#allocation1] sm:$0xff pattern:$0x75316420]  ;;  %v655_v18 = vadd.f32 %v653_v15, %v630_v4  ;;  %v656_v19 = vadd.f32 %v654_v16, %v631_v5  ;;  %v986_v20 = vld.sshfl [vmem:[#allocation1 + $0x8] sm:$0xff pattern:$0x75316420]  ;;  %v748_v15 = vsel %vm168_vm5, %v746_v11, %v747_v12 }
 0x144   :  { %989 = vrot.lane.b32.xlu1 %v985_v17, %s1768_s7  ;;  %1009 = vst [vmem:[#allocation1] ss:$2 sm:$0xff] %v1814_v43  ;;  %991 = vrot.lane.b32.xlu2 %v986_v20, %s1768_s7  ;;  %s1778_s7 = smov 82  }
 0x146   :  { %v665_v26 = vpop.permute.xlu0 %664  ;;  %v736_v7 = vpop.permute.xlu2 %735 }
 0x147   :  { %v667_v28 = vsel %vm666_vm10, %v663_v25, %v665_v26  ;;  %v668_v31 = vsel %vm666_vm10, %v665_v26, %v663_v25  ;;  %vm695_vm10 = vmand %vm533_vm12, %vm180_vm14  ;;  %vm739_vm12 = vcmp.lt.s32.totalorder %v1844_v23, 2 }
 0x148   :  { %v671_v32 = vsel %vm669_vm7, %v668_v31, 0.0  ;;  %v672_v35 = vsel %vm670_vm4, %v667_v28, 0.0  ;;  %v769_v28 = vstv %s2299_s14  ;;  %v770_v31 = vstv %s2301_s15  ;;  %s1570_s14 = sld [smem:[#allocation4 + $0x4f]] }
 0x149   :  { %v678_v36 = vmul.f32 %v677_v27, %v671_v32  ;;  %v679_v37 = vmul.f32 %v677_v27, %v672_v35  ;;  %v771_v35 = vsel %vm168_vm5, %v769_v28, %v770_v31  ;;  %vm3111_vm7 = vcmp.ge.s32.totalorder %v1854_v30, 1  ;;  %s2432_s15 = sld [smem:[#allocation4 + $0x1f]] }
 0x14a   :  { %vm799_vm4 = vcmp.lt.s32.totalorder %v1844_v23, 127 }
 0x14b   :  { %v1011_v38 = vld.sshfl [vmem:[#allocation1 + $0x8] sm:$0xff pattern:$0x75316420]  ;;  %v1010_v39 = vld.sshfl [vmem:[#allocation1] sm:$0xff pattern:$0x75316420]  ;;  %v680_v40 = vadd.f32 %v678_v36, %v655_v18  ;;  %v681_v41 = vadd.f32 %v679_v37, %v656_v19 }
 0x14c   :  { %1016 = vrot.lane.b32.xlu1 %v1011_v38, %s1769_s10  ;;  %1014 = vrot.lane.b32.xlu0 %v1010_v39, %s1769_s10  ;;  %1036 = vst [vmem:[#allocation1] ss:$2 sm:$0xff] %v1814_v43  ;;  %s1781_s10 = smov 79  }
 0x14e   :  { %v688_v47 = vpop.permute.xlu1 %687  ;;  %v761_v32 = vpop.permute.xlu2 %760 }
 0x14f   :  { %v692_v50 = vsel %vm691_vm0, %v688_v47, %v690_v49  ;;  %v693_v51 = vsel %vm691_vm0, %v690_v49, %v688_v47  ;;  %vm3113_vm0 = vcmp.lt.s32.totalorder %v1854_v30, 15 }
 0x150   :  { %v696_v52 = vsel %vm694_vm6, %v693_v51, 0.0  ;;  %v697_v53 = vsel %vm695_vm10, %v692_v50, 0.0  ;;  %v778_v50 = vstv %s1557_s0  ;;  %v779_v51 = vstv %s1558_s1  ;;  %s2442_s0 = sld [smem:[#allocation4 + $0x51]] }
 0x151   :  { %v703_v54 = vmul.f32 %v702_v48, %v696_v52  ;;  %v704_v55 = vmul.f32 %v702_v48, %v697_v53  ;;  %v780_v52 = vsel %vm168_vm5, %v778_v50, %v779_v51  ;;  %vm822_vm6 = vcmp.lt.s32.totalorder %v1844_v23, 126  ;;  %s2444_s1 = sld [smem:[#allocation4 + $0x21]] }
 0x152   :  { %vm3115_vm10 = vcmp.lt.s32.totalorder %v1854_v30, 14 }
 0x153   :  { %v1038_v56 = vld.sshfl [vmem:[#allocation1 + $0x8] sm:$0xff pattern:$0x75316420]  ;;  %v705_v57 = vadd.f32 %v703_v54, %v680_v40  ;;  %v706_v58 = vadd.f32 %v704_v55, %v681_v41  ;;  %v1037_v61 = vld.sshfl [vmem:[#allocation1] sm:$0xff pattern:$0x75316420]  ;;  %v806_v54 = vstv %s1559_s20  ;;  %v807_v55 = vstv %s1560_s21 }
 0x154   :  { %1043 = vrot.lane.b32.xlu0 %v1038_v56, %s1770_s13  ;;  %1061 = vst [vmem:[#allocation1] ss:$2 sm:$0xff] %v1814_v43  ;;  %1041 = vrot.lane.b32.xlu2 %v1037_v61, %s1770_s13  ;;  %v808_v60 = vsel %vm168_vm5, %v806_v54, %v807_v55  ;;  %s1569_s13 = sld [smem:[#allocation4 + $0x1e]] }
 0x155   :  { %s2447_s20 = sld [smem:[#allocation4 + $0x52]] }
 0x156   :  { %v713_v62 = vpop.permute.xlu0 %712  ;;  %v715_v0 = vpop.permute.xlu1 %714  ;;  %s2449_s21 = sld [smem:[#allocation4 + $0x22]] }
 0x157   :  { %v717_v1 = vsel %vm716_vm9, %v713_v62, %v715_v0  ;;  %v718_v2 = vsel %vm716_vm9, %v715_v0, %v713_v62  ;;  %vm3116_vm9 = vcmp.lt.s32.totalorder %v1866_v34, 14 }
 0x158   :  { %v719_v3 = vsel %vm169_vm8, %v718_v2, 0.0  ;;  %v720_v4 = vsel %vm170_vm11, %v717_v1, 0.0 }
 0x159   :  { %v726_v5 = vmul.f32 %v725_v63, %v719_v3  ;;  %v727_v6 = vmul.f32 %v725_v63, %v720_v4 }
 0x15b   :  { %v728_v8 = vadd.f32 %v726_v5, %v705_v57  ;;  %v729_v9 = vadd.f32 %v727_v6, %v706_v58  ;;  %v1062_v10 = vld.sshfl [vmem:[#allocation1] sm:$0xff pattern:$0x75316420]  ;;  %v1063_v13 = vld.sshfl [vmem:[#allocation1 + $0x8] sm:$0xff pattern:$0x75316420]  ;;  %v787_v57 = vmul.f32 %v2079_v46, %v780_v52  ;;  %v786_v58 = vmul.f32 %v2077_v45, %v780_v52 }
 0x15c   :  { %1066 = vrot.lane.b32.xlu1 %v1062_v10, %s1771_s16  ;;  %1086 = vst [vmem:[#allocation1] ss:$2 sm:$0xff] %v1814_v43  ;;  %1068 = vrot.lane.b32.xlu2 %v1063_v13, %s1771_s16  ;;  %v830_v10 = vstv %s2328_s24  ;;  %s2438_s16 = sld [smem:[#allocation4 + $0x50]] }
 0x15d   :  { %s2484_s24 = sld [smem:[#allocation4 + $0x54]] }
 0x15e   :  { %v738_v14 = vpop.permute.xlu0 %737 }
 0x15f   :  { %v740_v16 = vsel %vm739_vm12, %v736_v7, %v738_v14  ;;  %v741_v17 = vsel %vm739_vm12, %v738_v14, %v736_v7  ;;  %vm845_vm12 = vcmp.lt.s32.totalorder %v1844_v23, 125 }
 0x160   :  { %v742_v18 = vsel %vm171_vm13, %v741_v17, 0.0  ;;  %v743_v19 = vsel %vm3085_vm15, %v740_v16, 0.0 }
 0x161   :  { %v749_v20 = vmul.f32 %v748_v15, %v742_v18  ;;  %v750_v21 = vmul.f32 %v748_v15, %v743_v19 }
 0x163   :  { %v751_v22 = vadd.f32 %v749_v20, %v728_v8  ;;  %v752_v25 = vadd.f32 %v750_v21, %v729_v9  ;;  %v1088_v26 = vld.sshfl [vmem:[#allocation1 + $0x8] sm:$0xff pattern:$0x75316420]  ;;  %v1087_v27 = vld.sshfl [vmem:[#allocation1] sm:$0xff pattern:$0x75316420]  ;;  %v829_v9 = vstv %s2324_s23 }
 0x164   :  { %1093 = vrot.lane.b32.xlu1 %v1088_v26, %s1772_s17  ;;  %1091 = vrot.lane.b32.xlu0 %v1087_v27, %s1772_s17  ;;  %1111 = vst [vmem:[#allocation1] ss:$2 sm:$0xff] %v1814_v43  ;;  %v831_v12 = vsel %vm168_vm5, %v829_v9, %v830_v10  ;;  %s2440_s17 = sld [smem:[#allocation4 + $0x20]] }
 0x165   :  { %s2474_s23 = sld [smem:[#allocation4 + $0x23]] }
 0x166   :  { %v759_v36 = vpop.permute.xlu1 %758  ;;  %v819_v45 = vpop.permute.xlu2 %818 }
 0x167   :  { %v763_v37 = vsel %vm762_vm1, %v759_v36, %v761_v32  ;;  %v764_v38 = vsel %vm762_vm1, %v761_v32, %v759_v36  ;;  %vm3117_vm1 = vcmp.lt.s32.totalorder %v1854_v30, 13 }
 0x168   :  { %v765_v39 = vsel %vm3111_vm7, %v764_v38, 0.0  ;;  %v766_v40 = vsel %vm3112_vm3, %v763_v37, 0.0  ;;  %vm859_vm7 = vcmp.lt.s32.totalorder %v1851_v29, 15  ;;  %vm860_vm3 = vcmp.lt.s32.totalorder %v1864_v33, 15 }
 0x169   :  { %v772_v41 = vmul.f32 %v771_v35, %v765_v39  ;;  %v773_v42 = vmul.f32 %v771_v35, %v766_v40 }
 0x16b   :  { %v774_v44 = vadd.f32 %v772_v41, %v751_v22  ;;  %v775_v47 = vadd.f32 %v773_v42, %v752_v25  ;;  %v1113_v48 = vld.sshfl [vmem:[#allocation1 + $0x8] sm:$0xff pattern:$0x75316420]  ;;  %v1112_v49 = vld.sshfl [vmem:[#allocation1] sm:$0xff pattern:$0x75316420]  ;;  %v852_v22 = vstv %s2340_s26  ;;  %v853_v25 = vstv %s2342_s27 }
 0x16c   :  { %1118 = vrot.lane.b32.xlu0 %v1113_v48, %s1773_s22  ;;  %1134 = vst [vmem:[#allocation1] ss:$2 sm:$0xff] %v1814_v43  ;;  %1116 = vrot.lane.b32.xlu2 %v1112_v49, %s1773_s22  ;;  %v854_v28 = vsel %vm168_vm5, %v852_v22, %v853_v25  ;;  %s2461_s22 = sld [smem:[#allocation4 + $0x53]] }
 0x16d   :  { %v789_v2 = vadd.f32 %v787_v57, %v775_v47  ;;  %v788_v3 = vadd.f32 %v786_v58, %v774_v44  ;;  %v879_v44 = vstv %s2354_s29  ;;  %v880_v47 = vstv %s2356_s30  ;;  %s2493_s26 = sld [smem:[#allocation4 + $0x55]] }
 0x16e   :  { %v844_v27 = vpop.permute.xlu2 %843  ;;  %v881_v50 = vsel %vm168_vm5, %v879_v44, %v880_v47  ;;  %v929_v47 = vstv %s1569_s13  ;;  %s2517_s27 = sld [smem:[#allocation4 + $0x25]] }
 0x16f   :  { %s2545_s29 = sld [smem:[#allocation4 + $0x26]] }
 0x170   :  { %s2561_s30 = sld [smem:[#allocation4 + $0x57]] }
 0x171   :  { %s2799_s13 = sld [smem:[#allocation4 + $0x2c]] }
 0x173   :  { %v1135_v53 = vld.sshfl [vmem:[#allocation1] sm:$0xff pattern:$0x75316420]  ;;  %v1136_v56 = vld.sshfl [vmem:[#allocation1 + $0x8] sm:$0xff pattern:$0x75316420] }
 0x174   :  { %1139 = vrot.lane.b32.xlu1 %v1135_v53, %s1774_s25  ;;  %1159 = vst [vmem:[#allocation1] ss:$2 sm:$0xff] %v1814_v43  ;;  %1141 = vrot.lane.b32.xlu2 %v1136_v56, %s1774_s25  ;;  %s2489_s25 = sld [smem:[#allocation4 + $0x24]] }
 0x176   :  { %v798_v59 = vpop.permute.xlu1 %797  ;;  %v796_v61 = vpop.permute.xlu0 %795 }
 0x177   :  { %v800_v62 = vsel %vm799_vm4, %v796_v61, %v798_v59  ;;  %v801_v63 = vsel %vm799_vm4, %v798_v59, %v796_v61  ;;  %vm870_vm4 = vcmp.lt.s32.totalorder %v1844_v23, 115 }
 0x178   :  { %v802_v0 = vsel %vm3113_vm0, %v800_v62, 0.0  ;;  %v803_v1 = vsel %vm3114_vm2, %v801_v63, 0.0  ;;  %vm873_vm0 = vmand %vm859_vm7, %vm169_vm8  ;;  %v904_v62 = vstv %s2369_s4  ;;  %v905_v63 = vstv %s2372_s5  ;;  %s2620_s4 = sld [smem:[#allocation4 + $0x58]] }
 0x179   :  { %v809_v46 = vmul.f32 %v808_v60, %v802_v0  ;;  %v810_v4 = vmul.f32 %v808_v60, %v803_v1  ;;  %vm874_vm2 = vmand %vm860_vm3, %vm170_vm11  ;;  %s2657_s5 = sld [smem:[#allocation4 + $0x28]] }
 0x17b   :  { %v811_v5 = vadd.f32 %v809_v46, %v788_v3  ;;  %v812_v6 = vadd.f32 %v810_v4, %v789_v2  ;;  %v1161_v7 = vld.sshfl [vmem:[#allocation1 + $0x8] sm:$0xff pattern:$0x75316420]  ;;  %v1160_v8 = vld.sshfl [vmem:[#allocation1] sm:$0xff pattern:$0x75316420]  ;;  %v906_v2 = vsel %vm168_vm5, %v904_v62, %v905_v63 }
 0x17c   :  { %1166 = vrot.lane.b32.xlu1 %v1161_v7, %s1775_s28  ;;  %1164 = vrot.lane.b32.xlu0 %v1160_v8, %s1775_s28  ;;  %1184 = vst [vmem:[#allocation1] ss:$2 sm:$0xff] %v1814_v43  ;;  %s2538_s28 = sld [smem:[#allocation4 + $0x56]] }
 0x17e   :  { %v821_v11 = vpop.permute.xlu0 %820  ;;  %v892_v0 = vpop.permute.xlu2 %891 }
 0x17f   :  { %v823_v13 = vsel %vm822_vm6, %v819_v45, %v821_v11  ;;  %v824_v14 = vsel %vm822_vm6, %v821_v11, %v819_v45  ;;  %vm895_vm6 = vcmp.lt.s32.totalorder %v1844_v23, 114 }
 0x180   :  { %v825_v15 = vsel %vm3115_vm10, %v823_v13, 0.0  ;;  %v826_v16 = vsel %vm3116_vm9, %v824_v14, 0.0  ;;  %vm898_vm10 = vmand %vm859_vm7, %vm171_vm13 }
 0x181   :  { %v832_v17 = vmul.f32 %v831_v12, %v825_v15  ;;  %v833_v18 = vmul.f32 %v831_v12, %v826_v16  ;;  %vm899_vm9 = vmand %vm860_vm3, %vm3085_vm15 }
 0x182   :  { %vm2599_vm15 = vmand %vm860_vm3, %vm180_vm14 }
 0x183   :  { %v834_v19 = vadd.f32 %v832_v17, %v811_v5  ;;  %v835_v20 = vadd.f32 %v833_v18, %v812_v6  ;;  %v1186_v21 = vld.sshfl [vmem:[#allocation1 + $0x8] sm:$0xff pattern:$0x75316420]  ;;  %v1185_v26 = vld.sshfl [vmem:[#allocation1] sm:$0xff pattern:$0x75316420] }
 0x184   :  { %1191 = vrot.lane.b32.xlu0 %v1186_v21, %s1776_s3  ;;  %1211 = vst [vmem:[#allocation1] ss:$2 sm:$0xff] %v1814_v43  ;;  %1189 = vrot.lane.b32.xlu2 %v1185_v26, %s1776_s3  ;;  %s2614_s3 = sld [smem:[#allocation4 + $0x27]] }
 0x186   :  { %v842_v31 = vpop.permute.xlu1 %841 }
 0x187   :  { %v846_v32 = vsel %vm845_vm12, %v842_v31, %v844_v27  ;;  %v847_v35 = vsel %vm845_vm12, %v844_v27, %v842_v31  ;;  %vm920_vm12 = vcmp.lt.s32.totalorder %v1844_v23, 113 }
 0x188   :  { %v848_v36 = vsel %vm3117_vm1, %v846_v32, 0.0  ;;  %v849_v37 = vsel %vm180_vm14, %v847_v35, 0.0  ;;  %vm3118_vm1 = vcmp.ge.s32.totalorder %v1854_v30, 1 }
 0x189   :  { %v855_v38 = vmul.f32 %v854_v28, %v848_v36  ;;  %v856_v39 = vmul.f32 %v854_v28, %v849_v37 }
 0x18b   :  { %v857_v40 = vadd.f32 %v855_v38, %v834_v19  ;;  %v858_v41 = vadd.f32 %v856_v39, %v835_v20  ;;  %v1212_v42 = vld.sshfl [vmem:[#allocation1] sm:$0xff pattern:$0x75316420]  ;;  %v1213_v48 = vld.sshfl [vmem:[#allocation1 + $0x8] sm:$0xff pattern:$0x75316420]  ;;  %v919_v20 = vpop.permute.xlu2 %918 }
 0x18c   :  { %1216 = vrot.lane.b32.xlu1 %v1212_v42, %s1777_s6  ;;  %1236 = vst [vmem:[#allocation1] ss:$2 sm:$0xff] %v1814_v43  ;;  %1218 = vrot.lane.b32.xlu2 %v1213_v48, %s1777_s6  ;;  %v930_v48 = vstv %s1570_s14  ;;  %s2663_s6 = sld [smem:[#allocation4 + $0x59]] }
 0x18d   :  { %s2810_s14 = sld [smem:[#allocation4 + $0x5d]] }
 0x18e   :  { %v869_v49 = vpop.permute.xlu1 %868  ;;  %v867_v51 = vpop.permute.xlu0 %866 }
 0x18f   :  { %v871_v52 = vsel %vm870_vm4, %v867_v51, %v869_v49  ;;  %v872_v53 = vsel %vm870_vm4, %v869_v49, %v867_v51  ;;  %vm2457_vm4 = vmand %vm859_vm7, %vm3118_vm1  ;;  %vm3127_vm1 = vcmp.lt.s32.totalorder %v1866_v34, 15 }
 0x190   :  { %v875_v54 = vsel %vm873_vm0, %v871_v52, 0.0  ;;  %v876_v55 = vsel %vm874_vm2, %v872_v53, 0.0  ;;  %vm3121_vm0 = vcmp.ge.s32.totalorder %v1866_v34, 1  ;;  %v931_v53 = vsel %vm168_vm5, %v929_v47, %v930_v48 }
 0x191   :  { %v882_v56 = vmul.f32 %v881_v50, %v875_v54  ;;  %v883_v57 = vmul.f32 %v881_v50, %v876_v55  ;;  %vm2467_vm2 = vmand %vm860_vm3, %vm3121_vm0  ;;  %vm993_vm0 = vcmp.lt.s32.totalorder %v1844_v23, 110  ;;  %v1079_v48 = vstv %s2489_s25 }
 0x193   :  { %v884_v58 = vadd.f32 %v882_v56, %v857_v40  ;;  %v885_v59 = vadd.f32 %v883_v57, %v858_v41  ;;  %v1238_v60 = vld.sshfl [vmem:[#allocation1 + $0x8] sm:$0xff pattern:$0x75316420]  ;;  %v1237_v61 = vld.sshfl [vmem:[#allocation1] sm:$0xff pattern:$0x75316420]  ;;  %v952_v56 = vstv %s2432_s15  ;;  %v953_v57 = vstv %s2438_s16 }
 0x194   :  { %1243 = vrot.lane.b32.xlu1 %v1238_v60, %s1778_s7  ;;  %1241 = vrot.lane.b32.xlu0 %v1237_v61, %s1778_s7  ;;  %1261 = vst [vmem:[#allocation1] ss:$2 sm:$0xff] %v1814_v43  ;;  %v977_v60 = vstv %s2440_s17  ;;  %v978_v61 = vstv %s2442_s0  ;;  %s2698_s7 = sld [smem:[#allocation4 + $0x29]] }
 0x195   :  { %s2832_s15 = sld [smem:[#allocation4 + $0x2d]] }
 0x196   :  { %v894_v1 = vpop.permute.xlu0 %893  ;;  %v2410_v25 = vpop.permute.xlu2 %964  ;;  %s2844_s16 = sld [smem:[#allocation4 + $0x5e]] }
 0x197   :  { %v896_v3 = vsel %vm895_vm6, %v892_v0, %v894_v1  ;;  %v897_v46 = vsel %vm895_vm6, %v894_v1, %v892_v0  ;;  %vm945_vm6 = vcmp.lt.s32.totalorder %v1844_v23, 112  ;;  %v1002_v0 = vstv %s2444_s1  ;;  %s2876_s17 = sld [smem:[#allocation4 + $0x2e]] }
 0x198   :  { %v900_v4 = vsel %vm898_vm10, %v896_v3, 0.0  ;;  %v901_v45 = vsel %vm899_vm9, %v897_v46, 0.0  ;;  %vm968_vm10 = vcmp.lt.s32.totalorder %v1844_v23, 111  ;;  %v1003_v1 = vstv %s2447_s20  ;;  %s2880_s0 = sld [smem:[#allocation4 + $0x5f]] }
 0x199   :  { %v907_v5 = vmul.f32 %v906_v2, %v900_v4  ;;  %v908_v6 = vmul.f32 %v906_v2, %v901_v45  ;;  %v1027_v3 = vstv %s2449_s21  ;;  %v1028_v46 = vstv %s2461_s22  ;;  %s2892_s1 = sld [smem:[#allocation4 + $0x2f]] }
 0x19a   :  { %v954_v4 = vsel %vm168_vm5, %v952_v56, %v953_v57  ;;  %vm3124_vm9 = vcmp.lt.s32.totalorder %v1854_v30, 15  ;;  %s2910_s20 = sld [smem:[#allocation4 + $0x60]] }
 0x19b   :  { %v2402_v7 = vadd.f32 %v907_v5, %v884_v58  ;;  %v2404_v8 = vadd.f32 %v908_v6, %v885_v59  ;;  %v1263_v9 = vld.sshfl [vmem:[#allocation1 + $0x8] sm:$0xff pattern:$0x75316420]  ;;  %v1262_v10 = vld.sshfl [vmem:[#allocation1] sm:$0xff pattern:$0x75316420] }
 0x19c   :  { %1268 = vrot.lane.b32.xlu0 %v1263_v9, %s1779_s8  ;;  %1286 = vst [vmem:[#allocation1] ss:$2 sm:$0xff] %v1814_v43  ;;  %1266 = vrot.lane.b32.xlu2 %v1262_v10, %s1779_s8  ;;  %v979_v9 = vsel %vm168_vm5, %v977_v60, %v978_v61  ;;  %v1127_v10 = vstv %s2545_s29  ;;  %s2711_s8 = sld [smem:[#allocation4 + $0x5a]] }
 0x19d   :  { %s2972_s21 = sld [smem:[#allocation4 + $0x30]] }
 0x19e   :  { %v917_v19 = vpop.permute.xlu1 %916  ;;  %v2416_v28 = vpop.permute.xlu2 %991  ;;  %s2978_s22 = sld [smem:[#allocation4 + $0x61]] }
 0x19f   :  { %v921_v49 = vsel %vm920_vm12, %v917_v19, %v919_v20  ;;  %v922_v50 = vsel %vm920_vm12, %v919_v20, %v917_v19  ;;  %vm2511_vm12 = vmand %vm859_vm7, %vm3124_vm9  ;;  %vm3133_vm9 = vcmp.lt.s32.totalorder %v1866_v34, 14 }
 0x1a0   :  { %v925_v54 = vsel %vm2457_vm4, %v921_v49, 0.0  ;;  %v926_v55 = vsel %vm2467_vm2, %v922_v50, 0.0  ;;  %vm2523_vm4 = vmand %vm860_vm3, %vm3127_vm1  ;;  %vm1018_vm2 = vcmp.lt.s32.totalorder %v1844_v23, 109  ;;  %v1080_v49 = vstv %s2493_s26 }
 0x1a1   :  { %v932_v62 = vmul.f32 %v931_v53, %v925_v54  ;;  %v933_v63 = vmul.f32 %v931_v53, %v926_v55  ;;  %vm2571_vm1 = vmand %vm860_vm3, %vm3133_vm9  ;;  %vm1035_vm9 = vcmp.lt.s32.totalorder %v1864_v33, 14 }
 0x1a3   :  { %v1287_v11 = vld.sshfl [vmem:[#allocation1] sm:$0xff pattern:$0x75316420]  ;;  %v1288_v12 = vld.sshfl [vmem:[#allocation1 + $0x8] sm:$0xff pattern:$0x75316420] }
 0x1a4   :  { %1291 = vrot.lane.b32.xlu1 %v1287_v11, %s1780_s9  ;;  %1309 = vst [vmem:[#allocation1] ss:$2 sm:$0xff] %v1814_v43  ;;  %1293 = vrot.lane.b32.xlu2 %v1288_v12, %s1780_s9  ;;  %s2749_s9 = sld [smem:[#allocation4 + $0x2a]] }
 0x1a6   :  { %v942_v21 = vpop.permute.xlu0 %941  ;;  %v944_v22 = vpop.permute.xlu1 %943 }
 0x1a7   :  { %v946_v58 = vsel %vm945_vm6, %v942_v21, %v944_v22  ;;  %v947_v59 = vsel %vm945_vm6, %v944_v22, %v942_v21  ;;  %vm3130_vm6 = vcmp.lt.s32.totalorder %v1854_v30, 14  ;;  %v1055_v21 = vstv %s2484_s24 }
 0x1a8   :  { %v948_v45 = vsel %vm859_vm7, %v946_v58, 0.0  ;;  %v949_v5 = vsel %vm860_vm3, %v947_v59, 0.0  ;;  %vm1070_vm3 = vcmp.lt.s32.totalorder %v1844_v23, 98  ;;  %v1081_v58 = vsel %vm168_vm5, %v1079_v48, %v1080_v49 }
 0x1a9   :  { %v955_v19 = vmul.f32 %v954_v4, %v948_v45  ;;  %v956_v20 = vmul.f32 %v954_v4, %v949_v5 }
 0x1ab   :  { %v1311_v13 = vld.sshfl [vmem:[#allocation1 + $0x8] sm:$0xff pattern:$0x75316420]  ;;  %v1310_v14 = vld.sshfl [vmem:[#allocation1] sm:$0xff pattern:$0x75316420] }
 0x1ac   :  { %1316 = vrot.lane.b32.xlu1 %v1311_v13, %s1781_s10  ;;  %1314 = vrot.lane.b32.xlu0 %v1310_v14, %s1781_s10  ;;  %1334 = vst [vmem:[#allocation1] ss:$2 sm:$0xff] %v1814_v43  ;;  %v1004_v13 = vsel %vm168_vm5, %v1002_v0, %v1003_v1  ;;  %v934_v14 = vadd.f32 %v932_v62, %v2402_v7  ;;  %v1105_v0 = vstv %s2538_s28  ;;  %s2756_s10 = sld [smem:[#allocation4 + $0x5b]] }
 0x1ae   :  { %v2412_v26 = vpop.permute.xlu0 %966  ;;  %v2422_v32 = vpop.permute.xlu2 %1041 }
 0x1af   :  { %v969_v11 = vsel %vm968_vm10, %v2410_v25, %v2412_v26  ;;  %v970_v12 = vsel %vm968_vm10, %v2412_v26, %v2410_v25  ;;  %vm2555_vm10 = vmand %vm859_vm7, %vm3130_vm6  ;;  %vm1034_vm6 = vcmp.lt.s32.totalorder %v1851_v29, 14 }
 0x1b0   :  { %v973_v22 = vsel %vm2511_vm12, %v969_v11, 0.0  ;;  %v974_v25 = vsel %vm2523_vm4, %v970_v12, 0.0  ;;  %vm3136_vm12 = vcmp.lt.s32.totalorder %v1854_v30, 13  ;;  %v1128_v11 = vstv %s2561_s30 }
 0x1b1   :  { %vm2587_vm4 = vmand %vm859_vm7, %vm3136_vm12  ;;  %vm1045_vm7 = vcmp.lt.s32.totalorder %v1844_v23, 99  ;;  %v980_v54 = vmul.f32 %v979_v9, %v973_v22  ;;  %v981_v55 = vmul.f32 %v979_v9, %v974_v25  ;;  %v1129_v25 = vsel %vm168_vm5, %v1127_v10, %v1128_v11 }
 0x1b2   :  { %v1203_v10 = vstv %s2711_s8 }
 0x1b3   :  { %v1336_v15 = vld.sshfl [vmem:[#allocation1 + $0x8] sm:$0xff pattern:$0x75316420]  ;;  %v1335_v16 = vld.sshfl [vmem:[#allocation1] sm:$0xff pattern:$0x75316420] }
 0x1b4   :  { %1341 = vrot.lane.b32.xlu0 %v1336_v15, %s1782_s11  ;;  %1359 = vst [vmem:[#allocation1] ss:$2 sm:$0xff] %v1814_v43  ;;  %1339 = vrot.lane.b32.xlu2 %v1335_v16, %s1782_s11  ;;  %v935_v15 = vadd.f32 %v933_v63, %v2404_v8  ;;  %v1029_v16 = vsel %vm168_vm5, %v1027_v3, %v1028_v46  ;;  %v1054_v8 = vstv %s2474_s23  ;;  %v1104_v63 = vstv %s2517_s27  ;;  %s2771_s11 = sld [smem:[#allocation4 + $0x2b]]  ;;  %s1784_s23 = smov [#allocation8]  }
 0x1b5   :  { %v1056_v53 = vsel %vm168_vm5, %v1054_v8, %v1055_v21  ;;  %s1495_s24 = sshll.u32 %s1784_s23, 4  ;;  %s1497_s27 = sshll.u32 %s3076_s2, 4  ;;  %s1496_s24 = int_to_ptr.vmem [resolvable:$true] %s1495_s24  ;;  %s1498_s27 = int_to_ptr.hbm [resolvable:$true] %s1497_s27 }
 0x1b6   :  { %v2414_v27 = vpop.permute.xlu1 %989  ;;  %v2428_v37 = vpop.permute.xlu2 %1068 }
 0x1b7   :  { %v994_v42 = vsel %vm993_vm0, %v2414_v27, %v2416_v28  ;;  %v995_v44 = vsel %vm993_vm0, %v2416_v28, %v2414_v27  ;;  %vm2635_vm0 = vmand %vm1034_vm6, %vm169_vm8 }
 0x1b8   :  { %v998_v56 = vsel %vm2555_vm10, %v994_v42, 0.0  ;;  %v999_v57 = vsel %vm2571_vm1, %v995_v44, 0.0  ;;  %vm1095_vm10 = vcmp.lt.s32.totalorder %v1844_v23, 97  ;;  %vm3147_vm1 = vcmp.ge.s32.totalorder %v1866_v34, 2 }
 0x1b9   :  { %v1005_v1 = vmul.f32 %v1004_v13, %v998_v56  ;;  %v1006_v3 = vmul.f32 %v1004_v13, %v999_v57  ;;  %vm2686_vm12 = vmand %vm1035_vm9, %vm3147_vm1  ;;  %v1152_v42 = vstv %s2614_s3  ;;  %v1153_v44 = vstv %s2620_s4 }
 0x1ba   :  { %v1177_v56 = vstv %s2657_s5 }
 0x1bb   :  { %v1360_v17 = vld.sshfl [vmem:[#allocation1] sm:$0xff pattern:$0x75316420]  ;;  %v1361_v18 = vld.sshfl [vmem:[#allocation1 + $0x8] sm:$0xff pattern:$0x75316420] }
 0x1bc   :  { %1364 = vrot.lane.b32.xlu1 %v1360_v17, %s1783_s12  ;;  %1366 = vrot.lane.b32.xlu2 %v1361_v18, %s1783_s12  ;;  %s2791_s12 = sld [smem:[#allocation4 + $0x5c]] }
 0x1be   :  { %v2418_v31 = vpop.permute.xlu0 %1014  ;;  %v2420_v43 = vpop.permute.xlu1 %1016 }
 0x1bf   :  { %v1019_v28 = vsel %vm1018_vm2, %v2418_v31, %v2420_v43  ;;  %v1020_v50 = vsel %vm1018_vm2, %v2420_v43, %v2418_v31  ;;  %v957_v31 = vadd.f32 %v955_v19, %v934_v14  ;;  %v958_v43 = vadd.f32 %v956_v20, %v935_v15  ;;  %vm2645_vm2 = vmand %vm1035_vm9, %vm170_vm11 }
 0x1c0   :  { %v1023_v60 = vsel %vm2587_vm4, %v1019_v28, 0.0  ;;  %v1024_v61 = vsel %vm2599_vm15, %v1020_v50, 0.0  ;;  %vm2669_vm15 = vmand %vm1034_vm6, %vm171_vm13  ;;  %vm3150_vm4 = vcmp.ge.s32.totalorder %v1854_v30, 1 }
 0x1c1   :  { %v982_v6 = vadd.f32 %v980_v54, %v957_v31  ;;  %v983_v9 = vadd.f32 %v981_v55, %v958_v43  ;;  %v1030_v12 = vmul.f32 %v1029_v16, %v1023_v60  ;;  %v1031_v13 = vmul.f32 %v1029_v16, %v1024_v61 }
 0x1c2   :  { %v1154_v55 = vsel %vm168_vm5, %v1152_v42, %v1153_v44  ;;  %v1178_v60 = vstv %s2663_s6 }
 0x1c3   :  { %v1007_v8 = vadd.f32 %v1005_v1, %v982_v6  ;;  %v1008_v21 = vadd.f32 %v1006_v3, %v983_v9  ;;  %v1179_v6 = vsel %vm168_vm5, %v1177_v56, %v1178_v60  ;;  %v1202_v9 = vstv %s2698_s7 }
 0x1c4   :  { %v1302_v3 = vstv %s2832_s15 }
 0x1c5   :  { %v1032_v50 = vadd.f32 %v1030_v12, %v1007_v8  ;;  %v1033_v54 = vadd.f32 %v1031_v13, %v1008_v21  ;;  %v1204_v21 = vsel %vm168_vm5, %v1202_v9, %v1203_v10 }
 0x1c6   :  { %v2424_v35 = vpop.permute.xlu0 %1043  ;;  %v2436_v40 = vpop.permute.xlu2 %1116 }
 0x1c7   :  { %v1046_v4 = vsel %vm1045_vm7, %v2422_v32, %v2424_v35  ;;  %v1047_v45 = vsel %vm1045_vm7, %v2424_v35, %v2422_v32  ;;  %v1106_v32 = vsel %vm168_vm5, %v1104_v63, %v1105_v0  ;;  %vm2704_vm7 = vmand %vm1034_vm6, %vm3150_vm4  ;;  %vm3159_vm4 = vcmp.lt.s32.totalorder %v1866_v34, 15 }
 0x1c8   :  { %v1050_v15 = vsel %vm2635_vm0, %v1046_v4, 0.0  ;;  %v1051_v16 = vsel %vm2645_vm2, %v1047_v45, 0.0  ;;  %vm1120_vm0 = vcmp.lt.s32.totalorder %v1844_v23, 96 }
 0x1c9   :  { %v1057_v47 = vmul.f32 %v1056_v53, %v1050_v15  ;;  %v1058_v48 = vmul.f32 %v1056_v53, %v1051_v16 }
 0x1cb   :  { %v1059_v61 = vadd.f32 %v1057_v47, %v1032_v50  ;;  %v1060_v62 = vadd.f32 %v1058_v48, %v1033_v54  ;;  %v1229_v47 = vstv %s2749_s9 }
 0x1ce   :  { %v2426_v36 = vpop.permute.xlu1 %1066  ;;  %v2476_v52 = vpop.permute.xlu2 %1141 }
 0x1cf   :  { %v1071_v20 = vsel %vm1070_vm3, %v2426_v36, %v2428_v37  ;;  %v1072_v7 = vsel %vm1070_vm3, %v2428_v37, %v2426_v36  ;;  %vm3153_vm3 = vcmp.ge.s32.totalorder %v1866_v34, 1 }
 0x1d0   :  { %vm2717_vm2 = vmand %vm1035_vm9, %vm3153_vm3  ;;  %v1075_v49 = vsel %vm2669_vm15, %v1071_v20, 0.0  ;;  %v1076_v27 = vsel %vm2686_vm12, %v1072_v7, 0.0  ;;  %vm3156_vm15 = vcmp.lt.s32.totalorder %v1854_v30, 15  ;;  %vm1168_vm12 = vcmp.lt.s32.totalorder %v1844_v23, 94 }
 0x1d1   :  { %v1082_v57 = vmul.f32 %v1081_v58, %v1075_v49  ;;  %v1083_v31 = vmul.f32 %v1081_v58, %v1076_v27  ;;  %vm2764_vm1 = vmand %vm1034_vm6, %vm3156_vm15 }
 0x1d3   :  { %v1084_v11 = vadd.f32 %v1082_v57, %v1059_v61  ;;  %v1085_v12 = vadd.f32 %v1083_v31, %v1060_v62  ;;  %v1279_v31 = vstv %s2799_s13 }
 0x1d6   :  { %v2430_v38 = vpop.permute.xlu0 %1091  ;;  %v2434_v39 = vpop.permute.xlu1 %1093 }
 0x1d7   :  { %v1096_v37 = vsel %vm1095_vm10, %v2430_v38, %v2434_v39  ;;  %v1097_v26 = vsel %vm1095_vm10, %v2434_v39, %v2430_v38  ;;  %vm1143_vm10 = vcmp.lt.s32.totalorder %v1844_v23, 95 }
 0x1d8   :  { %v1100_v39 = vsel %vm2704_vm7, %v1096_v37, 0.0  ;;  %v1101_v53 = vsel %vm2717_vm2, %v1097_v26, 0.0  ;;  %vm2779_vm7 = vmand %vm1035_vm9, %vm3159_vm4  ;;  %vm1193_vm2 = vcmp.lt.s32.totalorder %v1844_v23, 93 }
 0x1d9   :  { %v1107_v0 = vmul.f32 %v1106_v32, %v1100_v39  ;;  %v1108_v1 = vmul.f32 %v1106_v32, %v1101_v53  ;;  %v1255_v39 = vstv %s2791_s12 }
 0x1db   :  { %v1109_v19 = vadd.f32 %v1107_v0, %v1084_v11  ;;  %v1110_v20 = vadd.f32 %v1108_v1, %v1085_v12 }
 0x1de   :  { %v2451_v41 = vpop.permute.xlu0 %1118  ;;  %v2549_v18 = vpop.permute.xlu2 %1189 }
 0x1df   :  { %v1121_v38 = vsel %vm1120_vm0, %v2436_v40, %v2451_v41  ;;  %v1122_v43 = vsel %vm1120_vm0, %v2451_v41, %v2436_v40  ;;  %vm3162_vm0 = vcmp.lt.s32.totalorder %v1854_v30, 14 }
 0x1e0   :  { %v1123_v63 = vsel %vm1034_vm6, %v1121_v38, 0.0  ;;  %v1124_v45 = vsel %vm1035_vm9, %v1122_v43, 0.0  ;;  %vm2805_vm3 = vmand %vm1034_vm6, %vm3162_vm0  ;;  %vm1245_vm0 = vcmp.lt.s32.totalorder %v1844_v23, 82  ;;  %v1254_v38 = vstv %s2771_s11 }
 0x1e1   :  { %v1130_v13 = vmul.f32 %v1129_v25, %v1123_v63  ;;  %v1131_v7 = vmul.f32 %v1129_v25, %v1124_v45  ;;  %v1280_v43 = vstv %s2810_s14  ;;  %v1256_v1 = vsel %vm168_vm5, %v1254_v38, %v1255_v39 }
 0x1e3   :  { %v1132_v44 = vadd.f32 %v1130_v13, %v1109_v19  ;;  %v1133_v48 = vadd.f32 %v1131_v7, %v1110_v20 }
 0x1e6   :  { %v2471_v51 = vpop.permute.xlu1 %1139  ;;  %v2676_v35 = vpop.permute.xlu2 %1218 }
 0x1e7   :  { %v1144_v46 = vsel %vm1143_vm10, %v2471_v51, %v2476_v52  ;;  %v1145_v4 = vsel %vm1143_vm10, %v2476_v52, %v2471_v51  ;;  %vm3165_vm10 = vcmp.lt.s32.totalorder %v1866_v34, 14 }
 0x1e8   :  { %v1148_v52 = vsel %vm2764_vm1, %v1144_v46, 0.0  ;;  %v1149_v14 = vsel %vm2779_vm7, %v1145_v4, 0.0  ;;  %vm2820_vm15 = vmand %vm1035_vm9, %vm3165_vm10  ;;  %vm3168_vm1 = vcmp.lt.s32.totalorder %v1854_v30, 13  ;;  %vm1210_vm7 = vcmp.lt.s32.totalorder %v1864_v33, 13 }
 0x1e9   :  { %vm2838_vm4 = vmand %vm1034_vm6, %vm3168_vm1  ;;  %vm1209_vm6 = vcmp.lt.s32.totalorder %v1851_v29, 13  ;;  %v1155_v36 = vmul.f32 %v1154_v55, %v1148_v52  ;;  %v1156_v37 = vmul.f32 %v1154_v55, %v1149_v14  ;;  %v1303_v46 = vstv %s2844_s16 }
 0x1ea   :  { %vm3179_vm10 = vcmp.ge.s32.totalorder %v1866_v34, 2  ;;  %v1304_v32 = vsel %vm168_vm5, %v1302_v3, %v1303_v46 }
 0x1eb   :  { %v1157_v55 = vadd.f32 %v1155_v36, %v1132_v44  ;;  %v1158_v56 = vadd.f32 %v1156_v37, %v1133_v48 }
 0x1ee   :  { %v2497_v2 = vpop.permute.xlu0 %1164  ;;  %v2547_v17 = vpop.permute.xlu1 %1166 }
 0x1ef   :  { %v1169_v15 = vsel %vm1168_vm12, %v2497_v2, %v2547_v17  ;;  %v1170_v16 = vsel %vm1168_vm12, %v2547_v17, %v2497_v2  ;;  %vm2850_vm12 = vmand %vm1035_vm9, %vm180_vm14  ;;  %vm1220_vm9 = vcmp.lt.s32.totalorder %v1844_v23, 83 }
 0x1f0   :  { %v1173_v26 = vsel %vm2805_vm3, %v1169_v15, 0.0  ;;  %v1174_v42 = vsel %vm2820_vm15, %v1170_v16, 0.0  ;;  %vm2886_vm3 = vmand %vm1209_vm6, %vm169_vm8  ;;  %vm3182_vm15 = vcmp.ge.s32.totalorder %v1854_v30, 1  ;;  %v1327_v16 = vstv %s2876_s17 }
 0x1f1   :  { %v1180_v50 = vmul.f32 %v1179_v6, %v1173_v26  ;;  %v1181_v54 = vmul.f32 %v1179_v6, %v1174_v42  ;;  %vm2922_vm8 = vmand %vm1209_vm6, %vm171_vm13  ;;  %v1352_v26 = vstv %s2892_s1  ;;  %v1353_v42 = vstv %s2910_s20 }
 0x1f2   :  { %vm2937_vm13 = vmand %vm1210_vm7, %vm3179_vm10  ;;  %v1354_v62 = vsel %vm168_vm5, %v1352_v26, %v1353_v42 }
 0x1f3   :  { %v1182_v4 = vadd.f32 %v1180_v50, %v1157_v55  ;;  %v1183_v45 = vadd.f32 %v1181_v54, %v1158_v56  ;;  %vm2953_vm1 = vmand %vm1209_vm6, %vm3182_vm15 }
 0x1f6   :  { %v2625_v59 = vpop.permute.xlu0 %1191  ;;  %v2773_v41 = vpop.permute.xlu2 %1266 }
 0x1f7   :  { %v1194_v17 = vsel %vm1193_vm2, %v2549_v18, %v2625_v59  ;;  %v1195_v22 = vsel %vm1193_vm2, %v2625_v59, %v2549_v18  ;;  %v1230_v18 = vstv %s2756_s10  ;;  %vm2898_vm2 = vmand %vm1210_vm7, %vm170_vm11  ;;  %vm1270_vm11 = vcmp.lt.s32.totalorder %v1844_v23, 81 }
 0x1f8   :  { %v1198_v49 = vsel %vm2838_vm4, %v1194_v17, 0.0  ;;  %v1199_v27 = vsel %vm2850_vm12, %v1195_v22, 0.0  ;;  %v1231_v0 = vsel %vm168_vm5, %v1229_v47, %v1230_v18  ;;  %vm1295_vm4 = vcmp.lt.s32.totalorder %v1844_v23, 80 }
 0x1f9   :  { %v1205_v60 = vmul.f32 %v1204_v21, %v1198_v49  ;;  %v1206_v61 = vmul.f32 %v1204_v21, %v1199_v27  ;;  %vm3185_vm12 = vcmp.ge.s32.totalorder %v1866_v34, 1  ;;  %v1328_v22 = vstv %s2880_s0 }
 0x1fb   :  { %v1207_v51 = vadd.f32 %v1205_v60, %v1182_v4  ;;  %v1208_v52 = vadd.f32 %v1206_v61, %v1183_v45  ;;  %v1377_v4 = vstv %s2972_s21  ;;  %v1378_v45 = vstv %s2978_s22 }
 0x1fe   :  { %v2659_v5 = vpop.permute.xlu1 %1216  ;;  %v1294_v53 = vpop.permute.xlu2 %1293 }
 0x1ff   :  { %v1221_v63 = vsel %vm1220_vm9, %v2659_v5, %v2676_v35  ;;  %v1222_v58 = vsel %vm1220_vm9, %v2676_v35, %v2659_v5  ;;  %v1281_v5 = vsel %vm168_vm5, %v1279_v31, %v1280_v43  ;;  %vm2964_vm9 = vmand %vm1210_vm7, %vm3185_vm12  ;;  %v1329_v43 = vsel %vm168_vm5, %v1327_v16, %v1328_v22 }
 0x200   :  { %v1225_v9 = vsel %vm2886_vm3, %v1221_v63, 0.0  ;;  %v1226_v10 = vsel %vm2898_vm2, %v1222_v58, 0.0  ;;  %vm1343_vm3 = vcmp.lt.s32.totalorder %v1844_v23, 78  ;;  %vm3188_vm2 = vcmp.lt.s32.totalorder %v1854_v30, 15 }
 0x201   :  { %v1232_v19 = vmul.f32 %v1231_v0, %v1225_v9  ;;  %v1233_v20 = vmul.f32 %v1231_v0, %v1226_v10  ;;  %vm1368_vm12 = vcmp.lt.s32.totalorder %v1844_v23, 77 }
 0x203   :  { %v1234_v49 = vadd.f32 %v1232_v19, %v1207_v51  ;;  %v1235_v27 = vadd.f32 %v1233_v20, %v1208_v52 }
 0x206   :  { %v2735_v28 = vpop.permute.xlu0 %1241  ;;  %v2769_v40 = vpop.permute.xlu1 %1243 }
 0x207   :  { %v1246_v12 = vsel %vm1245_vm0, %v2735_v28, %v2769_v40  ;;  %v1247_v13 = vsel %vm1245_vm0, %v2769_v40, %v2735_v28  ;;  %vm1318_vm0 = vcmp.lt.s32.totalorder %v1844_v23, 79  ;;  %v1379_v23 = vsel %vm168_vm5, %v1377_v4, %v1378_v45  ;;  %v1431_v4 = vld [vmem:[#allocation5 + $0x18] sm:$0xff] }
 0x208   :  { %v1250_v7 = vsel %vm2922_vm8, %v1246_v12, 0.0  ;;  %v1251_v8 = vsel %vm2937_vm13, %v1247_v13, 0.0  ;;  %vm2994_vm8 = vmand %vm1209_vm6, %vm3188_vm2  ;;  %vm3194_vm13 = vcmp.lt.s32.totalorder %v1854_v30, 14 }
 0x209   :  { %v1257_v44 = vmul.f32 %v1256_v1, %v1250_v7  ;;  %v1258_v47 = vmul.f32 %v1256_v1, %v1251_v8  ;;  %vm3020_vm15 = vmand %vm1209_vm6, %vm3194_vm13 }
 0x20b   :  { %v1259_v63 = vadd.f32 %v1257_v44, %v1234_v49  ;;  %v1260_v58 = vadd.f32 %v1258_v47, %v1235_v27 }
 0x20e   :  { %v1269_v25 = vpop.permute.xlu0 %1268  ;;  %v1340_v2 = vpop.permute.xlu2 %1339 }
 0x20f   :  { %v1271_v40 = vsel %vm1270_vm11, %v2773_v41, %v1269_v25  ;;  %v1272_v15 = vsel %vm1270_vm11, %v1269_v25, %v2773_v41  ;;  %vm3191_vm11 = vcmp.lt.s32.totalorder %v1866_v34, 15 }
 0x210   :  { %v1275_v25 = vsel %vm2953_vm1, %v1271_v40, 0.0  ;;  %v1276_v36 = vsel %vm2964_vm9, %v1272_v15, 0.0  ;;  %vm3004_vm10 = vmand %vm1210_vm7, %vm3191_vm11  ;;  %vm3197_vm1 = vcmp.lt.s32.totalorder %v1866_v34, 14  ;;  %vm3200_vm9 = vcmp.lt.s32.totalorder %v1854_v30, 13 }
 0x211   :  { %v1283_v55 = vmul.f32 %v1281_v5, %v1276_v36 }
 0x216   :  { %v1292_v59 = vpop.permute.xlu1 %1291  ;;  %v1367_v10 = vpop.permute.xlu2 %1366 }
 0x217   :  { %v1296_v41 = vsel %vm1295_vm4, %v1292_v59, %v1294_v53  ;;  %v1297_v17 = vsel %vm1295_vm4, %v1294_v53, %v1292_v59  ;;  %v1282_v53 = vmul.f32 %v1281_v5, %v1275_v25  ;;  %vm3028_vm4 = vmand %vm1210_vm7, %vm3197_vm1  ;;  %v1285_v5 = vadd.f32 %v1283_v55, %v1260_v58  ;;  %v1428_v58 = vld [vmem:[#allocation5] sm:$0xff] }
 0x218   :  { %v1298_v50 = vsel %vm1209_vm6, %v1296_v41, 0.0  ;;  %v1299_v54 = vsel %vm1210_vm7, %v1297_v17, 0.0 }
 0x219   :  { %v1305_v0 = vmul.f32 %v1304_v32, %v1298_v50  ;;  %v1306_v1 = vmul.f32 %v1304_v32, %v1299_v54  ;;  %v1284_v6 = vadd.f32 %v1282_v53, %v1259_v63 }
 0x21b   :  { %v1307_v12 = vadd.f32 %v1305_v0, %v1284_v6  ;;  %v1308_v13 = vadd.f32 %v1306_v1, %v1285_v5  ;;  %v1429_v0 = vld [vmem:[#allocation5 + $0x8] sm:$0xff] }
 0x21e   :  { %v1315_v35 = vpop.permute.xlu0 %1314  ;;  %v1317_v21 = vpop.permute.xlu1 %1316 }
 0x21f   :  { %v1319_v59 = vsel %vm1318_vm0, %v1315_v35, %v1317_v21  ;;  %v1320_v48 = vsel %vm1318_vm0, %v1317_v21, %v1315_v35  ;;  %vm3055_vm0 = vmand %vm1209_vm6, %vm3200_vm9 }
 0x220   :  { %v1323_v60 = vsel %vm2994_vm8, %v1319_v59, 0.0  ;;  %v1324_v61 = vsel %vm3004_vm10, %v1320_v48, 0.0  ;;  %vm1447_vm10 = vcmask 1040384  }
 0x221   :  { %v1330_v35 = vmul.f32 %v1329_v43, %v1323_v60  ;;  %v1331_v9 = vmul.f32 %v1329_v43, %v1324_v61 }
 0x223   :  { %v1332_v30 = vadd.f32 %v1330_v35, %v1307_v12  ;;  %v1333_v32 = vadd.f32 %v1331_v9, %v1308_v13  ;;  %v1432_v35 = vld [vmem:[#allocation5 + $0x20] sm:$0xff]  ;;  %v1433_v9 = vld [vmem:[#allocation5 + $0x28] sm:$0xff]  ;;  %v1434_v12 = vld [vmem:[#allocation5 + $0x30] sm:$0xff] }
 0x226   :  { %v1342_v38 = vpop.permute.xlu0 %1341 }
 0x227   :  { %v1344_v57 = vsel %vm1343_vm3, %v1340_v2, %v1342_v38  ;;  %v1345_v31 = vsel %vm1343_vm3, %v1342_v38, %v1340_v2  ;;  %vm1372_vm3 = vmand %vm1210_vm7, %vm180_vm14 }
 0x228   :  { %v1348_v3 = vsel %vm3020_vm15, %v1344_v57, 0.0  ;;  %v1349_v46 = vsel %vm3028_vm4, %v1345_v31, 0.0  ;;  %vm3203_vm15 = vcmask 1041409  }
 0x229   :  { %v1355_v51 = vmul.f32 %v1354_v62, %v1348_v3  ;;  %v1356_v52 = vmul.f32 %v1354_v62, %v1349_v46  ;;  %v1430_v46 = vld [vmem:[#allocation5 + $0x10] sm:$0xff] }
 0x22b   :  { %v1357_v16 = vadd.f32 %v1355_v51, %v1332_v30  ;;  %v1358_v19 = vadd.f32 %v1356_v52, %v1333_v32  ;;  %v1435_v52 = vld [vmem:[#allocation5 + $0x38] sm:$0xff]  ;;  %v1436_v30 = vld [vmem:[#allocation5 + $0x40] sm:$0xff] }
 0x22e   :  { %v1365_v14 = vpop.permute.xlu1 %1364 }
 0x22f   :  { %v1369_v29 = vsel %vm1368_vm12, %v1365_v14, %v1367_v10  ;;  %v1370_v28 = vsel %vm1368_vm12, %v1367_v10, %v1365_v14 }
 0x230   :  { %v1373_v40 = vsel %vm3055_vm0, %v1369_v29, 0.0  ;;  %v1374_v15 = vsel %vm1372_vm3, %v1370_v28, 0.0  ;;  %v1437_v28 = vld [vmem:[#allocation5 + $0x48] sm:$0xff] }
 0x231   :  { %v1380_v20 = vmul.f32 %v1379_v23, %v1373_v40  ;;  %v1381_v7 = vmul.f32 %v1379_v23, %v1374_v15  ;;  %v1438_v15 = vld [vmem:[#allocation5 + $0x50] sm:$0xff] }
 0x233   :  { %v1382_v34 = vadd.f32 %v1380_v20, %v1357_v16  ;;  %v1383_v8 = vadd.f32 %v1381_v7, %v1358_v19  ;;  %v1439_v19 = vld [vmem:[#allocation5 + $0x58] sm:$0xff]  ;;  %v1440_v7 = vld [vmem:[#allocation5 + $0x60] sm:$0xff] }
 0x235   :  { %v1386_v33 = vrot.slane %v1382_v34, 2  ;;  %v1387_v21 = vrot.slane %v1383_v8, 2 }
 0x237   :  { %v1390_v2 = vadd.f32 %v1386_v33, %v1382_v34  ;;  %v1391_v24 = vadd.f32 %v1387_v21, %v1383_v8  ;;  %v1441_v8 = vld [vmem:[#allocation5 + $0x68] sm:$0xff]  ;;  %v1442_v21 = vld [vmem:[#allocation5 + $0x70] sm:$0xff] }
 0x239   :  { %v1392_v41 = vsub.f32 0.0, %v1390_v2  ;;  %v1393_v17 = vsub.f32 0.0, %v1391_v24  ;;  %v1443_v24 = vld [vmem:[#allocation5 + $0x78] sm:$0xff] }
 0x23b   :  { %v1394_v22 = vmul.f32 1.442695, %v1392_v41  ;;  %v1396_v25 = vmul.f32 1.442695, %v1393_v17 }
 0x23d   :  { %1659 = vpow2.f32 %v1394_v22 }
 0x23e   :  { %1661 = vpow2.f32 %v1396_v25 }
 0x243   :  { %v1660_v36 = vpop.eup %1659 }
 0x244   :  { %v1662_v37 = vpop.eup %1661  ;;  %v1398_v26 = vadd.f32 1.0, %v1660_v36 }
 0x245   :  { %v1399_v42 = vadd.f32 1.0, %v1662_v37 }
 0x246   :  { %1663 = vrcp.f32 %v1398_v26  ;;  %vm1405_vm6 = vweird.f32 %v1398_v26  ;;  %v1411_v53 = vand.u32 2147483648, %v1398_v26  ;;  %v1409_v55 = vand.u32 2147483647, %v1398_v26 }
 0x247   :  { %1665 = vrcp.f32 %v1399_v42  ;;  %v1425_v50 = vand.u32 2147483648, %v1399_v42  ;;  %v1423_v38 = vand.u32 2147483647, %v1399_v42  ;;  %vm1419_vm2 = vweird.f32 %v1399_v42 }
 0x248   :  { %v1412_v60 = vor.u32 1.1754944e-38, %v1411_v53  ;;  %vm1410_vm13 = vcmp.eq.f32.partialorder %v1409_v55, 8.507059e+37 }
 0x249   :  { %v1426_v57 = vor.u32 1.1754944e-38, %v1425_v50  ;;  %vm1424_vm11 = vcmp.eq.f32.partialorder %v1423_v38, 8.507059e+37 }
 0x24c   :  { %v1664_v44 = vpop.eup %1663 }
 0x24d   :  { %v1666_v47 = vpop.eup %1665  ;;  %v1401_v18 = vmul.f32 %v1664_v44, %v1398_v26  ;;  %vm1406_vm5 = vweird.f32 %v1664_v44 }
 0x24e   :  { %v1415_v59 = vmul.f32 %v1666_v47, %v1399_v42  ;;  %vm1420_vm14 = vweird.f32 %v1666_v47  ;;  %vm1407_vm7 = vmor %vm1405_vm6, %vm1406_vm5 }
 0x24f   :  { %v1402_v48 = vsub.f32 1.0, %v1401_v18  ;;  %vm1421_vm8 = vmor %vm1419_vm2, %vm1420_vm14 }
 0x250   :  { %v1416_v49 = vsub.f32 1.0, %v1415_v59 }
 0x251   :  { %v1403_v27 = vmul.f32 %v1664_v44, %v1402_v48 }
 0x252   :  { %v1417_v54 = vmul.f32 %v1666_v47, %v1416_v49 }
 0x253   :  { %v1404_v39 = vadd.f32 %v1664_v44, %v1403_v27 }
 0x254   :  { %v1418_v56 = vadd.f32 %v1666_v47, %v1417_v54 }
 0x255   :  { %v1408_v31 = vsel %vm1407_vm7, %v1664_v44, %v1404_v39 }
 0x256   :  { %v1422_v43 = vsel %vm1421_vm8, %v1666_v47, %v1418_v56  ;;  %v1413_v63 = vsel %vm1410_vm13, %v1412_v60, %v1408_v31 }
 0x257   :  { %v1427_v61 = vsel %vm1424_vm11, %v1426_v57, %v1422_v43 }
 0x258   :  { %v1446_v62 = vrot.slane %v1427_v61, 7 }
 0x25a   :  { %v1448_v1 = vsel %vm1447_vm10, %v1413_v63, %v1446_v62  ;;  %v1449_v3 = vsel %vm3203_vm15, %v1413_v63, %v1446_v62 }
 0x25b   :  { %v1450_v45 = vrot.slane %v1449_v3, 1  ;;  %v1451_v6 = vperm.slane %v1448_v1, 0  ;;  %v1452_v5 = vperm.slane %v1448_v1, 1 }
 0x25d   :  { %v1459_v10 = vmul.f32 %v1451_v6, %v1428_v58  ;;  %v1460_v11 = vmul.f32 %v1452_v5, %v1429_v0  ;;  %v1461_v13 = vmul.f32 %v1451_v6, %v1430_v46  ;;  %v1462_v51 = vmul.f32 %v1452_v5, %v1431_v4 }
 0x25e   :  { %v1453_v23 = vperm.slane %v1450_v45, 0  ;;  %v1463_v14 = vmul.f32 %v1451_v6, %v1432_v35  ;;  %v1454_v32 = vperm.slane %v1450_v45, 1  ;;  %v1464_v29 = vmul.f32 %v1452_v5, %v1433_v9 }
 0x25f   :  { %1475 = vst [vmem:[#allocation8] sm:$0xff] %v1459_v10  ;;  %v1465_v40 = vmul.f32 %v1451_v6, %v1434_v12  ;;  %v1466_v16 = vmul.f32 %v1452_v5, %v1435_v52 }
 0x260   :  { %1476 = vst [vmem:[#allocation8 + $0x8] sm:$0xff] %v1460_v11  ;;  %v1467_v20 = vmul.f32 %v1453_v23, %v1436_v30  ;;  %v1468_v34 = vmul.f32 %v1454_v32, %v1437_v28  ;;  %v1469_v33 = vmul.f32 %v1453_v23, %v1438_v15  ;;  %v1470_v2 = vmul.f32 %v1454_v32, %v1439_v19 }
 0x261   :  { %1477 = vst [vmem:[#allocation8 + $0x10] sm:$0xff] %v1461_v13  ;;  %v1471_v41 = vmul.f32 %v1453_v23, %v1440_v7  ;;  %v1472_v17 = vmul.f32 %v1454_v32, %v1441_v8  ;;  %v1473_v22 = vmul.f32 %v1453_v23, %v1442_v21  ;;  %v1474_v25 = vmul.f32 %v1454_v32, %v1443_v24 }
 0x262   :  { %1478 = vst [vmem:[#allocation8 + $0x18] sm:$0xff] %v1462_v51 }
 0x263   :  { %1479 = vst [vmem:[#allocation8 + $0x20] sm:$0xff] %v1463_v14 }
 0x264   :  { %1480 = vst [vmem:[#allocation8 + $0x28] sm:$0xff] %v1464_v29 }
 0x265   :  { %1481 = vst [vmem:[#allocation8 + $0x30] sm:$0xff] %v1465_v40 }
 0x266   :  { %1482 = vst [vmem:[#allocation8 + $0x38] sm:$0xff] %v1466_v16 }
 0x267   :  { %1483 = vst [vmem:[#allocation8 + $0x40] sm:$0xff] %v1467_v20 }
 0x268   :  { %1484 = vst [vmem:[#allocation8 + $0x48] sm:$0xff] %v1468_v34 }
 0x269   :  { %1485 = vst [vmem:[#allocation8 + $0x50] sm:$0xff] %v1469_v33 }
 0x26a   :  { %1486 = vst [vmem:[#allocation8 + $0x58] sm:$0xff] %v1470_v2 }
 0x26b   :  { %1487 = vst [vmem:[#allocation8 + $0x60] sm:$0xff] %v1471_v41 }
 0x26c   :  { %1488 = vst [vmem:[#allocation8 + $0x68] sm:$0xff] %v1472_v17 }
 0x26d   :  { %1489 = vst [vmem:[#allocation8 + $0x70] sm:$0xff] %v1473_v22 }
 0x26e   :  { %1490 = vst [vmem:[#allocation8 + $0x78] sm:$0xff] %v1474_v25 }
 0x26f   :  { %1503 = dma.vmem_to_hbm [thread:$0]  %s1496_s24, 2048, %s1498_s27, [#allocation7], %s1735_s18, %s1735_s18, %s1736_s19  }
 0x270   :  { %1731 = dma.done.wait [#allocation7], 2048  }
 0x271   :  { %1732 = vsyncadd [#allocation7], 4294965248 }
 0x272   :  { %1508 = vsyncpa [#allocation6], 1 }
 0x273   :  { %1509 = vsyncpa [#allocation7], 1 }

</bundles_post_ra>
